<compile_context>
chip_gen: v7x
topology: tpu7x:2x2x1
jax: 0.10.0
libtpu: 0.0.40
codegen_flags: <defaults>
</compile_context>

<pallas_src>
import jax
import jax.numpy as jnp
from jax import lax
from jax.experimental import pallas as pl
from jax.experimental.pallas import tpu as pltpu

EPS = 1e-6   # matches nn.LayerNorm(eps=1e-06) in the module spec


def _concat_dnn_kernel(x_ref, y_ref, vec_ref,
                       w0_ref, w1_ref, w2_ref, w3_ref,
                       o_ref):
    vec = vec_ref[...]            # (8, D) f32: rows = lnw, lnb, b0, b1, b2, b3, pad, pad
    lnw = vec[0:1, :]
    lnb = vec[1:2, :]
    b0 = vec[2:3, :]
    b1 = vec[3:4, :]
    b2 = vec[4:5, :]
    b3 = vec[5:6, :]

    def layer_norm(v):
        v = v.astype(jnp.float32)
        # Two independent cross-lane reductions (E[v] and E[v^2]) -> shorter XLU chain.
        mu = jnp.mean(v, axis=-1, keepdims=True)
        m2 = jnp.mean(v * v, axis=-1, keepdims=True)
        var = m2 - mu * mu
        inv = lax.rsqrt(var + EPS)                    # EUP
        # Cast to bf16 BEFORE the concat (halves the (TB,2D) buffer).
        return ((v - mu) * inv * lnw + lnb).astype(jnp.bfloat16)

    xn = layer_norm(x_ref[...])   # (TB, D) bf16
    yn = layer_norm(y_ref[...])   # (TB, D) bf16

    # fc_out: one fused K=2D matmul on the virtually-concatenated features
    # (fills the 256-deep contraction on v6e/v7x); f32 accumulation, f32 bias add.
    cat = jnp.concatenate([xn, yn], axis=-1)          # (TB, 2D) bf16
    h = jnp.dot(cat, w0_ref[...], preferred_element_type=jnp.float32) + b0

    def lin_relu(h, w_ref, b):
        z = jnp.dot(h.astype(jnp.bfloat16), w_ref[...],
                    preferred_element_type=jnp.float32) + b
        return jnp.maximum(z, 0.0)

    # MLP: 3 x (Linear + ReLU); dropouts are identity at inference.
    h = lin_relu(h, w1_ref, b1)
    h = lin_relu(h, w2_ref, b2)
    h = lin_relu(h, w3_ref, b3)

    o_ref[...] = h.astype(o_ref.dtype)


def prepare_params(params):
    """One-time conversion: bf16 weight copies + packed (8, D) f32 vector slab."""
    (lnw, lnb, w0, b0, w1, b1, w2, b2, w3, b3) = params
    D = lnw.shape[0]
    vec = jnp.zeros((8, D), jnp.float32)
    vec = (vec.at[0].set(lnw).at[1].set(lnb)
              .at[2].set(b0).at[3].set(b1).at[4].set(b2).at[5].set(b3))
    return {
        "vec": vec,                              # (8, D)  f32
        "w0": w0.astype(jnp.bfloat16),           # (2D, D) bf16
        "w1": w1.astype(jnp.bfloat16),           # (D, D)  bf16
        "w2": w2.astype(jnp.bfloat16),
        "w3": w3.astype(jnp.bfloat16),
    }


def concat_dnn(x, y, prepared, *, tb=512):
    B, D = x.shape
    vec, w0, w1, w2, w3 = (prepared["vec"], prepared["w0"], prepared["w1"],
                           prepared["w2"], prepared["w3"])

    tb = max(8, min(tb, B))
    grid = (pl.cdiv(B, tb),)

    act_spec = pl.BlockSpec((tb, D), lambda i: (i, 0))

    def resident(shape):
        # Constant block index -> fetched once; single-buffered (never re-fetched).
        idx = lambda i: (0,) * len(shape)
        try:
            return pl.BlockSpec(shape, idx, pipeline_mode=pl.Buffered(1))
        except Exception:
            return pl.BlockSpec(shape, idx)

    in_specs = [act_spec, act_spec,
                resident(vec.shape), resident(w0.shape),
                resident(w1.shape), resident(w2.shape), resident(w3.shape)]

    # VMEM budget: single-buffered residents + double-buffered act/out tiles
    # + in-kernel intermediates (xn/yn bf16, cat bf16, f32 h chain) + slack.
    resident_bytes = sum(int(a.size) * jnp.dtype(a.dtype).itemsize
                         for a in (vec, w0, w1, w2, w3))
    tile_bytes = tb * D * jnp.dtype(x.dtype).itemsize
    intermediate_bytes = tb * D * (2 + 2 + 2 * 2 + 4 + 4)   # xn, yn, cat, h, scratch
    need = resident_bytes + 2 * 3 * tile_bytes + intermediate_bytes + (4 << 20)

    # Generation-aware cap: physical VMEM minus headroom for compiler scratch.
    try:
        phys = int(pltpu.get_tpu_info().vmem_capacity_bytes)
    except Exception:
        phys = 128 << 20
    cap = max(32 << 20, phys - (16 << 20))
    vmem_limit = int(min(cap, max(16 << 20, need)))

    return pl.pallas_call(
        _concat_dnn_kernel,
        out_shape=jax.ShapeDtypeStruct((B, D), x.dtype),
        grid_spec=pltpu.PrefetchScalarGridSpec(
            num_scalar_prefetch=0,
            grid=grid,
            in_specs=in_specs,
            out_specs=act_spec,
        ),
        compiler_params=pltpu.CompilerParams(
            dimension_semantics=("parallel",),
            vmem_limit_bytes=vmem_limit),
    )(x, y, vec, w0, w1, w2, w3)


def _xavier_normal(key, shape):
    # PyTorch xavier_normal_ on a Linear weight (out, in): std = sqrt(2/(fan_in+fan_out)).
    fan_out, fan_in = shape[0], shape[1]
    std = (2.0 / (fan_in + fan_out)) ** 0.5
    return std * jax.random.normal(key, shape, dtype=jnp.float32)


def init_params(key, D):
    ks = jax.random.split(key, 4)
    # LayerNorm: weight=1, bias=0 (default init, untouched by _init_weights).
    lnw = jnp.ones((D,), jnp.float32)
    lnb = jnp.zeros((D,), jnp.float32)
    # fc_out: torch weight shape (D, 2D); stored transposed (2D, D) for h = x @ W.
    w0 = _xavier_normal(ks[0], (D, 2 * D)).T
    b0 = jnp.zeros((D,), jnp.float32)
    # MLP linears: torch weight (D, D); stored transposed.
    w1 = _xavier_normal(ks[1], (D, D)).T
    b1 = jnp.zeros((D,), jnp.float32)
    w2 = _xavier_normal(ks[2], (D, D)).T
    b2 = jnp.zeros((D,), jnp.float32)
    w3 = _xavier_normal(ks[3], (D, D)).T
    b3 = jnp.zeros((D,), jnp.float32)
    return (lnw, lnb, w0, b0, w1, b1, w2, b2, w3, b3)


def reference(x, y, params):
    # Pure f32 reference (the kernel uses bf16 MXU inputs with f32 accumulation).
    (lnw, lnb, w0, b0, w1, b1, w2, b2, w3, b3) = params

    def ln(v):
        mu = jnp.mean(v, -1, keepdims=True)
        var = jnp.mean((v - mu) ** 2, -1, keepdims=True)
        return (v - mu) / jnp.sqrt(var + EPS) * lnw + lnb

    h = jnp.concatenate([ln(x), ln(y)], axis=1) @ w0 + b0
    h = jnp.maximum(h @ w1 + b1, 0.0)
    h = jnp.maximum(h @ w2 + b2, 0.0)
    h = jnp.maximum(h @ w3 + b3, 0.0)
    return h


if __name__ == "__main__":
    B, D = 1024, 128   # batch, embedding_dim (lane-aligned); grid = (2,) with TB=512
    key = jax.random.PRNGKey(0)
    kx, ky, kp = jax.random.split(key, 3)
    x = jax.random.normal(kx, (B, D), dtype=jnp.float32)
    y = jax.random.normal(ky, (B, D), dtype=jnp.float32)
    params = init_params(kp, D)
    prepared = prepare_params(params)

    out = concat_dnn(x, y, prepared)
    out = jax.block_until_ready(out)

    ref = reference(x, y, params)
    assert out.shape == (B, D)
    # bf16 matmuls (f32 accumulation) vs. f32 reference -> loosened tolerance.
    assert jnp.allclose(out, ref, atol=5e-2, rtol=5e-2), float(jnp.max(jnp.abs(out - ref)))

    print("KERNEL_OK")
</pallas_src>

<mosaic_0001>
module attributes {stable_mosaic.version = 11 : i64} {
  func.func @_concat_dnn_kernel(%arg0: i32, %arg1: memref<512x128xf32, #tpu.memory_space<vmem>>, %arg2: memref<512x128xf32, #tpu.memory_space<vmem>>, %arg3: memref<8x128xf32, #tpu.memory_space<vmem>>, %arg4: memref<256x128xbf16, #tpu.memory_space<vmem>>, %arg5: memref<128x128xbf16, #tpu.memory_space<vmem>>, %arg6: memref<128x128xbf16, #tpu.memory_space<vmem>>, %arg7: memref<128x128xbf16, #tpu.memory_space<vmem>>, %arg8: memref<512x128xf32, #tpu.memory_space<vmem>>) attributes {dimension_semantics = [#tpu.dimension_semantics<parallel>], iteration_bounds = array<i64: 2>, scalar_prefetch = 0 : i64, scratch_operands = 0 : i64, tpu.core_type = #tpu.core_type<tc>, window_params = [{transform_indices = @transform_0, window_bounds = array<i64: 512, 128>}, {transform_indices = @transform_1, window_bounds = array<i64: 512, 128>}, {pipeline_mode = #tpu.pipeline_mode<synchronous>, transform_indices = @transform_2, window_bounds = array<i64: 8, 128>}, {pipeline_mode = #tpu.pipeline_mode<synchronous>, transform_indices = @transform_3, window_bounds = array<i64: 256, 128>}, {pipeline_mode = #tpu.pipeline_mode<synchronous>, transform_indices = @transform_4, window_bounds = array<i64: 128, 128>}, {pipeline_mode = #tpu.pipeline_mode<synchronous>, transform_indices = @transform_5, window_bounds = array<i64: 128, 128>}, {pipeline_mode = #tpu.pipeline_mode<synchronous>, transform_indices = @transform_6, window_bounds = array<i64: 128, 128>}, {transform_indices = @transform_7, window_bounds = array<i64: 512, 128>}]} {
    %c0 = arith.constant 0 : index
    %c0_0 = arith.constant 0 : index
    %0 = vector.load %arg3[%c0, %c0_0] : memref<8x128xf32, #tpu.memory_space<vmem>>, vector<8x128xf32>
    %1 = vector.extract_strided_slice %0 {offsets = [0, 0], sizes = [1, 128], strides = [1, 1]} : vector<8x128xf32> to vector<1x128xf32>
    %2 = vector.extract_strided_slice %0 {offsets = [1, 0], sizes = [1, 128], strides = [1, 1]} : vector<8x128xf32> to vector<1x128xf32>
    %3 = vector.extract_strided_slice %0 {offsets = [2, 0], sizes = [1, 128], strides = [1, 1]} : vector<8x128xf32> to vector<1x128xf32>
    %4 = vector.extract_strided_slice %0 {offsets = [3, 0], sizes = [1, 128], strides = [1, 1]} : vector<8x128xf32> to vector<1x128xf32>
    %5 = vector.extract_strided_slice %0 {offsets = [4, 0], sizes = [1, 128], strides = [1, 1]} : vector<8x128xf32> to vector<1x128xf32>
    %6 = vector.extract_strided_slice %0 {offsets = [5, 0], sizes = [1, 128], strides = [1, 1]} : vector<8x128xf32> to vector<1x128xf32>
    %c0_1 = arith.constant 0 : index
    %c0_2 = arith.constant 0 : index
    %7 = vector.load %arg1[%c0_1, %c0_2] : memref<512x128xf32, #tpu.memory_space<vmem>>, vector<512x128xf32>
    %cst = arith.constant dense<0.000000e+00> : vector<512xf32>
    %8 = vector.multi_reduction <add>, %7, %cst [1] : vector<512x128xf32> to vector<512xf32>
    %9 = vector.shape_cast %8 : vector<512xf32> to vector<512x1xf32>
    %cst_3 = arith.constant 1.280000e+02 : f32
    %10 = vector.broadcast %cst_3 : f32 to vector<512x1xf32>
    %11 = arith.divf %9, %10 : vector<512x1xf32>
    %12 = arith.mulf %7, %7 : vector<512x128xf32>
    %cst_4 = arith.constant dense<0.000000e+00> : vector<512xf32>
    %13 = vector.multi_reduction <add>, %12, %cst_4 [1] : vector<512x128xf32> to vector<512xf32>
    %14 = vector.shape_cast %13 : vector<512xf32> to vector<512x1xf32>
    %cst_5 = arith.constant 1.280000e+02 : f32
    %15 = vector.broadcast %cst_5 : f32 to vector<512x1xf32>
    %16 = arith.divf %14, %15 : vector<512x1xf32>
    %17 = arith.mulf %11, %11 : vector<512x1xf32>
    %18 = arith.subf %16, %17 : vector<512x1xf32>
    %cst_6 = arith.constant 9.99999997E-7 : f32
    %19 = vector.broadcast %cst_6 : f32 to vector<512x1xf32>
    %20 = arith.addf %18, %19 : vector<512x1xf32>
    %21 = math.rsqrt %20 : vector<512x1xf32>
    %22 = vector.broadcast %11 : vector<512x1xf32> to vector<512x128xf32>
    %23 = arith.subf %7, %22 : vector<512x128xf32>
    %24 = vector.broadcast %21 : vector<512x1xf32> to vector<512x128xf32>
    %25 = arith.mulf %23, %24 : vector<512x128xf32>
    %26 = vector.broadcast %1 : vector<1x128xf32> to vector<512x128xf32>
    %27 = arith.mulf %25, %26 : vector<512x128xf32>
    %28 = vector.broadcast %2 : vector<1x128xf32> to vector<512x128xf32>
    %29 = arith.addf %27, %28 : vector<512x128xf32>
    %30 = arith.truncf %29 : vector<512x128xf32> to vector<512x128xbf16>
    %c0_7 = arith.constant 0 : index
    %c0_8 = arith.constant 0 : index
    %31 = vector.load %arg2[%c0_7, %c0_8] : memref<512x128xf32, #tpu.memory_space<vmem>>, vector<512x128xf32>
    %cst_9 = arith.constant dense<0.000000e+00> : vector<512xf32>
    %32 = vector.multi_reduction <add>, %31, %cst_9 [1] : vector<512x128xf32> to vector<512xf32>
    %33 = vector.shape_cast %32 : vector<512xf32> to vector<512x1xf32>
    %cst_10 = arith.constant 1.280000e+02 : f32
    %34 = vector.broadcast %cst_10 : f32 to vector<512x1xf32>
    %35 = arith.divf %33, %34 : vector<512x1xf32>
    %36 = arith.mulf %31, %31 : vector<512x128xf32>
    %cst_11 = arith.constant dense<0.000000e+00> : vector<512xf32>
    %37 = vector.multi_reduction <add>, %36, %cst_11 [1] : vector<512x128xf32> to vector<512xf32>
    %38 = vector.shape_cast %37 : vector<512xf32> to vector<512x1xf32>
    %cst_12 = arith.constant 1.280000e+02 : f32
    %39 = vector.broadcast %cst_12 : f32 to vector<512x1xf32>
    %40 = arith.divf %38, %39 : vector<512x1xf32>
    %41 = arith.mulf %35, %35 : vector<512x1xf32>
    %42 = arith.subf %40, %41 : vector<512x1xf32>
    %cst_13 = arith.constant 9.99999997E-7 : f32
    %43 = vector.broadcast %cst_13 : f32 to vector<512x1xf32>
    %44 = arith.addf %42, %43 : vector<512x1xf32>
    %45 = math.rsqrt %44 : vector<512x1xf32>
    %46 = vector.broadcast %35 : vector<512x1xf32> to vector<512x128xf32>
    %47 = arith.subf %31, %46 : vector<512x128xf32>
    %48 = vector.broadcast %45 : vector<512x1xf32> to vector<512x128xf32>
    %49 = arith.mulf %47, %48 : vector<512x128xf32>
    %50 = vector.broadcast %1 : vector<1x128xf32> to vector<512x128xf32>
    %51 = arith.mulf %49, %50 : vector<512x128xf32>
    %52 = vector.broadcast %2 : vector<1x128xf32> to vector<512x128xf32>
    %53 = arith.addf %51, %52 : vector<512x128xf32>
    %54 = arith.truncf %53 : vector<512x128xf32> to vector<512x128xbf16>
    %55 = tpu.concatenate %30, %54 in 1 : vector<512x128xbf16>, vector<512x128xbf16> -> vector<512x256xbf16>
    %c0_14 = arith.constant 0 : index
    %c0_15 = arith.constant 0 : index
    %56 = vector.load %arg4[%c0_14, %c0_15] : memref<256x128xbf16, #tpu.memory_space<vmem>>, vector<256x128xbf16>
    %cst_16 = arith.constant dense<0.000000e+00> : vector<512x128xf32>
    %57 = tpu.matmul %55, %56, %cst_16 {dimension_numbers = #tpu.dot_dimension_numbers<[1], [0], [0], [1], [0, 0, 1, 1], [], []>} : vector<512x256xbf16>, vector<256x128xbf16>, vector<512x128xf32> -> vector<512x128xf32>
    %58 = vector.broadcast %3 : vector<1x128xf32> to vector<512x128xf32>
    %59 = arith.addf %57, %58 : vector<512x128xf32>
    %60 = arith.truncf %59 : vector<512x128xf32> to vector<512x128xbf16>
    %c0_17 = arith.constant 0 : index
    %c0_18 = arith.constant 0 : index
    %61 = vector.load %arg5[%c0_17, %c0_18] : memref<128x128xbf16, #tpu.memory_space<vmem>>, vector<128x128xbf16>
    %cst_19 = arith.constant dense<0.000000e+00> : vector<512x128xf32>
    %62 = tpu.matmul %60, %61, %cst_19 {dimension_numbers = #tpu.dot_dimension_numbers<[1], [0], [0], [1], [0, 0, 1, 1], [], []>} : vector<512x128xbf16>, vector<128x128xbf16>, vector<512x128xf32> -> vector<512x128xf32>
    %63 = vector.broadcast %4 : vector<1x128xf32> to vector<512x128xf32>
    %64 = arith.addf %62, %63 : vector<512x128xf32>
    %cst_20 = arith.constant 0.000000e+00 : f32
    %65 = vector.broadcast %cst_20 : f32 to vector<512x128xf32>
    %66 = arith.maximumf %64, %65 : vector<512x128xf32>
    %67 = arith.truncf %66 : vector<512x128xf32> to vector<512x128xbf16>
    %c0_21 = arith.constant 0 : index
    %c0_22 = arith.constant 0 : index
    %68 = vector.load %arg6[%c0_21, %c0_22] : memref<128x128xbf16, #tpu.memory_space<vmem>>, vector<128x128xbf16>
    %cst_23 = arith.constant dense<0.000000e+00> : vector<512x128xf32>
    %69 = tpu.matmul %67, %68, %cst_23 {dimension_numbers = #tpu.dot_dimension_numbers<[1], [0], [0], [1], [0, 0, 1, 1], [], []>} : vector<512x128xbf16>, vector<128x128xbf16>, vector<512x128xf32> -> vector<512x128xf32>
    %70 = vector.broadcast %5 : vector<1x128xf32> to vector<512x128xf32>
    %71 = arith.addf %69, %70 : vector<512x128xf32>
    %cst_24 = arith.constant 0.000000e+00 : f32
    %72 = vector.broadcast %cst_24 : f32 to vector<512x128xf32>
    %73 = arith.maximumf %71, %72 : vector<512x128xf32>
    %74 = arith.truncf %73 : vector<512x128xf32> to vector<512x128xbf16>
    %c0_25 = arith.constant 0 : index
    %c0_26 = arith.constant 0 : index
    %75 = vector.load %arg7[%c0_25, %c0_26] : memref<128x128xbf16, #tpu.memory_space<vmem>>, vector<128x128xbf16>
    %cst_27 = arith.constant dense<0.000000e+00> : vector<512x128xf32>
    %76 = tpu.matmul %74, %75, %cst_27 {dimension_numbers = #tpu.dot_dimension_numbers<[1], [0], [0], [1], [0, 0, 1, 1], [], []>} : vector<512x128xbf16>, vector<128x128xbf16>, vector<512x128xf32> -> vector<512x128xf32>
    %77 = vector.broadcast %6 : vector<1x128xf32> to vector<512x128xf32>
    %78 = arith.addf %76, %77 : vector<512x128xf32>
    %cst_28 = arith.constant 0.000000e+00 : f32
    %79 = vector.broadcast %cst_28 : f32 to vector<512x128xf32>
    %80 = arith.maximumf %78, %79 : vector<512x128xf32>
    %c0_29 = arith.constant 0 : index
    %c0_30 = arith.constant 0 : index
    %81 = vector.load %arg8[%c0_29, %c0_30] : memref<512x128xf32, #tpu.memory_space<vmem>>, vector<512x128xf32>
    tpu.vector_store %arg8[%c0_29, %c0_30], %80 {strides = array<i32>} : memref<512x128xf32, #tpu.memory_space<vmem>>, vector<512x128xf32>,
    return
  }
  func.func @transform_0(%arg0: i32) -> (i32, i32) {
    %c0_i32 = arith.constant 0 : i32
    %c0_i32_0 = arith.constant 0 : i32
    return %arg0, %c0_i32 : i32, i32
  }
  func.func @transform_1(%arg0: i32) -> (i32, i32) {
    %c0_i32 = arith.constant 0 : i32
    %c0_i32_0 = arith.constant 0 : i32
    return %arg0, %c0_i32 : i32, i32
  }
  func.func @transform_2(%arg0: i32) -> (i32, i32) {
    %c0_i32 = arith.constant 0 : i32
    %c0_i32_0 = arith.constant 0 : i32
    %c0_i32_1 = arith.constant 0 : i32
    return %c0_i32, %c0_i32_0 : i32, i32
  }
  func.func @transform_3(%arg0: i32) -> (i32, i32) {
    %c0_i32 = arith.constant 0 : i32
    %c0_i32_0 = arith.constant 0 : i32
    %c0_i32_1 = arith.constant 0 : i32
    return %c0_i32, %c0_i32_0 : i32, i32
  }
  func.func @transform_4(%arg0: i32) -> (i32, i32) {
    %c0_i32 = arith.constant 0 : i32
    %c0_i32_0 = arith.constant 0 : i32
    %c0_i32_1 = arith.constant 0 : i32
    return %c0_i32, %c0_i32_0 : i32, i32
  }
  func.func @transform_5(%arg0: i32) -> (i32, i32) {
    %c0_i32 = arith.constant 0 : i32
    %c0_i32_0 = arith.constant 0 : i32
    %c0_i32_1 = arith.constant 0 : i32
    return %c0_i32, %c0_i32_0 : i32, i32
  }
  func.func @transform_6(%arg0: i32) -> (i32, i32) {
    %c0_i32 = arith.constant 0 : i32
    %c0_i32_0 = arith.constant 0 : i32
    %c0_i32_1 = arith.constant 0 : i32
    return %c0_i32, %c0_i32_0 : i32, i32
  }
  func.func @transform_7(%arg0: i32) -> (i32, i32) {
    %c0_i32 = arith.constant 0 : i32
    %c0_i32_0 = arith.constant 0 : i32
    return %arg0, %c0_i32 : i32, i32
  }
}

</mosaic_0001>

<bundles_post_ra>
// kernel: tpu_custom_call.1
= control target key start
LH: loop header
LB: loop body
LE: loop exit
PB: predicated region body
PF: predicated region fallthrough
CT: control target
= control target key end

     0   :  { %s7967_s0 = inlined_call_operand.hbm [shape: f32[1024,128], index: 0, kind: input, shape index: {}]   ;;  %s7968_s1 = inlined_call_operand.hbm [shape: f32[1024,128], index: 1, kind: input, shape index: {}]   ;;  %s7969_s2 = inlined_call_operand.hbm [shape: f32[8,128], index: 2, kind: input, shape index: {}]   ;;  %s7970_s3 = inlined_call_operand.hbm [shape: bf16[256,128], index: 3, kind: input, shape index: {}]   ;;  %s7971_s4 = inlined_call_operand.hbm [shape: bf16[128,128], index: 4, kind: input, shape index: {}]   ;;  %s7972_s5 = inlined_call_operand.hbm [shape: bf16[128,128], index: 5, kind: input, shape index: {}]   ;;  %s7973_s6 = inlined_call_operand.hbm [shape: bf16[128,128], index: 6, kind: input, shape index: {}]   ;;  %s7974_s7 = inlined_call_operand.hbm [shape: f32[1024,128], index: 7, kind: output, shape index: {}]  }
   0x1   :  { %7979 = sst [smem:[#allocation21_spill]] %s7967_s0 }
   0x2   :  { %7980 = sst [smem:[#allocation22_spill]] %s7969_s2 }
   0x3   :  { %7981 = sst [smem:[#allocation23_spill]] %s7970_s3 }
   0x4   :  { %7982 = sst [smem:[#allocation24_spill]] %s7971_s4 }
   0x5   :  { %12 = vsyncpa [#allocation3], 0 }
   0x6   :  { %14 = vsyncpa [#allocation3 + $0x1], 0 }
   0x7   :  { %15 = vsyncpa [#allocation6], 0 }
   0x8   :  { %17 = vsyncpa [#allocation6 + $0x1], 0 }
   0x9   :  { %18 = vsyncpa [#allocation9], 0 }
   0xa   :  { %19 = vsyncpa [#allocation12], 0 }
   0xb   :  { %20 = vsyncpa [#allocation4], 0 }
   0xc   :  { %22 = vsyncpa [#allocation4 + $0x1], 0  ;;  %s5832_s24 = smov 0   ;;  %s5834_s25 = smov 0  }
   0xd   :  { %s5836_s26 = smov 0   ;;  %s5838_s27 = smov 0  }
   0xe LB: > { %s5777_s28 = smov [#allocation7]   ;;  %s5853_s30 = sadd.s32 4294967295, %s5775_s27   ;;  %s5775_s27 = sphi %s5838_s27, %s8017_s27   ;;  %s5771_s26 = sphi %s5836_s26, %s8016_s26   ;;  %s5767_s25 = sphi %s5834_s25, %s8015_s25   ;;  %s5763_s24 = sphi %s5832_s24, %s8014_s24  }
   0xf   : > { %s229_s29 = sshll.u32 %s5777_s28, 4  ;;  %p4535_p0 = scmp.ge.s32.totalorder %s5775_s27, 1  ;;  %s230_s29 = int_to_ptr.vmem [resolvable:$true] %s229_s29 }
  0x10   : > { %p7975_p1 = scmp.eq.s32.totalorder %s5853_s30, 0  ;;  %p216_p2 = scmp.lt.s32.totalorder %s5775_s27, 3 }
  0x11   : > { %s5778_s9 = smov [#allocation8]   ;;  %s5779_s12 = smov [#allocation11]  }
  0x12   : > { %p5858_p3 = pnand %p4535_p0, %p216_p2  ;;  %s239_s10 = sshll.u32 %s5778_s9, 4  ;;  %s5865_s10 = int_to_ptr.vmem [resolvable:$true] %s239_s10 }
  0x13   : > { %s265_s13 = sshll.u32 %s5779_s12, 4  ;;  %s7985_s2 = sld [smem:[#allocation22_spill]]  ;;  %s5873_s13 = int_to_ptr.vmem [resolvable:$true] %s265_s13 }
  0x14   : > { %s7983_s8 = scalar_select %p5858_p3, 1, 0 }
  0x15   : > { %p5007_p5 = pneg %p5858_p3 }
  0x17   : > { %p5869_p6 = pnand %p5007_p5, %p7975_p1 }
  0x19   : > { %s5493_s16 = scalar_lea.hbm %s7985_s2, 128  ;;  %p5883_p8 = pneg %p5869_p6 }
  0x1a   : > { %p5494_p7 = scmp.ne.s32.totalorder %s7985_s2, %s5493_s16  ;;  %p5500_p11 = scmp.lt.u32.totalorder %s5493_s16, %s7985_s2 }
  0x1c   : > { %p5496_p9 = pnand %p5883_p8, %p5494_p7 }
  0x1e   : > { %p5497_p10 = pneg %p5496_p9 }
  0x20   : > { %p5502_p12 = pnand %p5500_p11, %p5497_p10 }
  0x22   : > { %5505 = shalt.err (!%p5502_p12)
}
  0x23   : > { %s5506_s22 = scalar_lea.vmem %s230_s29, 128  ;;  %p5514_p5 = scmp.lt.s32.totalorder %s230_s29, %s230_s29 }
  0x24   : > { %p5507_p13 = scmp.ne.s32.totalorder %s230_s29, %s5506_s22  ;;  %p5515_p4 = scmp.lt.s32.totalorder %s5506_s22, %s5506_s22 }
  0x26   : > { %p5509_p0 = pnand %p5507_p13, %p5883_p8  ;;  %p5516_p1 = por %p5515_p4, %p5514_p5 }
  0x28   : > { %p5510_p2 = pneg %p5509_p0 }
  0x2a   : > { %p5517_p3 = pnand %p5516_p1, %p5510_p2 }
  0x2c   : > { %5520 = shalt.err (!%p5517_p3)
}
  0x2d   : > { %5010 = dma.hbm_to_vmem [thread:$0]  (!%p5869_p6), %s7985_s2, 128, %s230_s29, [#allocation6]  }
  0x2e   : > { %s7987_s3 = sld [smem:[#allocation23_spill]] }
  0x34   : > { %s5521_s14 = scalar_lea.hbm %s7987_s3, 2048 }
  0x35   : > { %p5522_p7 = scmp.ne.s32.totalorder %s7987_s3, %s5521_s14  ;;  %p5528_p1 = scmp.lt.u32.totalorder %s5521_s14, %s7987_s3 }
  0x37   : > { %p5524_p9 = pnand %p5522_p7, %p5883_p8 }
  0x39   : > { %p5525_p4 = pneg %p5524_p9 }
  0x3b   : > { %p5530_p3 = pnand %p5528_p1, %p5525_p4 }
  0x3d   : > { %5533 = shalt.err (!%p5530_p3)
}
  0x3e   : > { %s5534_s29 = scalar_lea.vmem %s5865_s10, 2048  ;;  %p5542_p13 = scmp.lt.s32.totalorder %s5865_s10, %s5865_s10 }
  0x3f   : > { %p5535_p10 = scmp.ne.s32.totalorder %s5865_s10, %s5534_s29  ;;  %p5543_p0 = scmp.lt.s32.totalorder %s5534_s29, %s5534_s29 }
  0x41   : > { %p5537_p11 = pnand %p5535_p10, %p5883_p8  ;;  %p5544_p2 = por %p5543_p0, %p5542_p13 }
  0x43   : > { %p5538_p12 = pneg %p5537_p11 }
  0x45   : > { %p5545_p5 = pnand %p5544_p2, %p5538_p12 }
  0x47   : > { %5548 = shalt.err (!%p5545_p5)
}
  0x48   : > { %s5780_s20 = smov 64   ;;  %s5781_s21 = smov 4  }
  0x49   : > { %5013 = dma.hbm_to_vmem [thread:$0]  (!%p5869_p6), %s7987_s3, 2048, %s5865_s10, [#allocation9], %s5780_s20, %s5780_s20, %s5781_s21  }
  0x4a   : > { %s5549_s12 = scalar_lea.hbm %s7972_s5, 1024 }
  0x4b   : > { %p5550_p7 = scmp.ne.s32.totalorder %s7972_s5, %s5549_s12  ;;  %p5556_p1 = scmp.lt.u32.totalorder %s5549_s12, %s7972_s5 }
  0x4d   : > { %p5552_p9 = pnand %p5550_p7, %p5883_p8 }
  0x4f   : > { %p5553_p4 = pneg %p5552_p9 }
  0x51   : > { %p5558_p3 = pnand %p5556_p1, %p5553_p4 }
  0x53   : > { %5561 = shalt.err (!%p5558_p3)
}
  0x54   : > { %s5562_s10 = scalar_lea.vmem %s5873_s13, 1024  ;;  %p5570_p13 = scmp.lt.s32.totalorder %s5873_s13, %s5873_s13 }
  0x55   : > { %p5563_p10 = scmp.ne.s32.totalorder %s5873_s13, %s5562_s10  ;;  %p5571_p0 = scmp.lt.s32.totalorder %s5562_s10, %s5562_s10 }
  0x57   : > { %p5565_p11 = pnand %p5563_p10, %p5883_p8  ;;  %p5572_p2 = por %p5571_p0, %p5570_p13 }
  0x59   : > { %p5566_p12 = pneg %p5565_p11 }
  0x5b   : > { %p5573_p5 = pnand %p5572_p2, %p5566_p12 }
  0x5d   : > { %5576 = shalt.err (!%p5573_p5)
}
  0x5e   : > { %5019 = dma.hbm_to_vmem [thread:$0]  (!%p5869_p6), %s7972_s5, 1024, %s5873_s13, [#allocation12], %s5780_s20, %s5780_s20, %s5781_s21  }
  0x5f   : > { %s5782_s22 = smov [#allocation10]   ;;  %s5783_s28 = smov [#allocation13]  }
  0x60   : > { %s252_s23 = sshll.u32 %s5782_s22, 4  ;;  %s278_s9 = sshll.u32 %s5783_s28, 4  ;;  %s253_s23 = int_to_ptr.vmem [resolvable:$true] %s252_s23  ;;  %s279_s9 = int_to_ptr.vmem [resolvable:$true] %s278_s9 }
  0x61   : > { %s7988_s4 = sld [smem:[#allocation24_spill]] }
  0x67   : > { %s5577_s15 = scalar_lea.hbm %s7988_s4, 1024 }
  0x68   : > { %p5578_p7 = scmp.ne.s32.totalorder %s7988_s4, %s5577_s15  ;;  %p5584_p1 = scmp.lt.u32.totalorder %s5577_s15, %s7988_s4 }
  0x6a   : > { %p5580_p9 = pnand %p5578_p7, %p5883_p8 }
  0x6c   : > { %p5581_p4 = pneg %p5580_p9 }
  0x6e   : > { %p5586_p3 = pnand %p5584_p1, %p5581_p4 }
  0x70   : > { %5589 = shalt.err (!%p5586_p3)
}
  0x71   : > { %s5590_s13 = scalar_lea.vmem %s253_s23, 1024  ;;  %p5598_p13 = scmp.lt.s32.totalorder %s253_s23, %s253_s23 }
  0x72   : > { %p5591_p10 = scmp.ne.s32.totalorder %s253_s23, %s5590_s13  ;;  %p5599_p0 = scmp.lt.s32.totalorder %s5590_s13, %s5590_s13 }
  0x74   : > { %p5593_p11 = pnand %p5591_p10, %p5883_p8  ;;  %p5600_p2 = por %p5599_p0, %p5598_p13 }
  0x76   : > { %p5594_p12 = pneg %p5593_p11 }
  0x78   : > { %p5601_p5 = pnand %p5600_p2, %p5594_p12 }
  0x7a   : > { %5604 = shalt.err (!%p5601_p5)
}
  0x7b   : > { %5016 = dma.hbm_to_vmem [thread:$0]  (!%p5869_p6), %s7988_s4, 1024, %s253_s23, [#allocation9], %s5780_s20, %s5780_s20, %s5781_s21  }
  0x7c   : > { %s5605_s14 = scalar_lea.hbm %s7973_s6, 1024 }
  0x7d   : > { %p5606_p7 = scmp.ne.s32.totalorder %s7973_s6, %s5605_s14  ;;  %p5612_p1 = scmp.lt.u32.totalorder %s5605_s14, %s7973_s6 }
  0x7f   : > { %p5608_p9 = pnand %p5606_p7, %p5883_p8 }
  0x81   : > { %p5609_p4 = pneg %p5608_p9 }
  0x83   : > { %p5614_p3 = pnand %p5612_p1, %p5609_p4 }
  0x85   : > { %5617 = shalt.err (!%p5614_p3)
}
  0x86   : > { %s5618_s18 = scalar_lea.vmem %s279_s9, 1024  ;;  %p5626_p13 = scmp.lt.s32.totalorder %s279_s9, %s279_s9 }
  0x87   : > { %p5619_p10 = scmp.ne.s32.totalorder %s279_s9, %s5618_s18  ;;  %p5627_p0 = scmp.lt.s32.totalorder %s5618_s18, %s5618_s18 }
  0x89   : > { %p5621_p11 = pnand %p5619_p10, %p5883_p8  ;;  %p5628_p2 = por %p5627_p0, %p5626_p13 }
  0x8b   : > { %p5622_p12 = pneg %p5621_p11 }
  0x8d   : > { %p5629_p5 = pnand %p5628_p2, %p5622_p12 }
  0x8f   : > { %5632 = shalt.err (!%p5629_p5)
}
  0x90   : > { %5022 = dma.hbm_to_vmem [thread:$0]  (!%p5869_p6), %s7973_s6, 1024, %s279_s9, [#allocation12], %s5780_s20, %s5780_s20, %s5781_s21  }
  0x91   : > { %s4534_s11 = sadd.s32 4294967294, %s5775_s27   ;;  %s5995_s19 = sadd.s32 1, %s5775_s27  }
  0x92   : > { %s35_s29 = sadd.s32 1, %s5771_s26  ;;  %s32_s22 = ssub.s32 %s5775_s27, %s5995_s19 }
  0x93   : > { %p42_p8 = scmp.ne.s32.totalorder %s5771_s26, %s5767_s25  ;;  %p33_p7 = scmp.eq.s32.totalorder %s32_s22, 0 }
  0x94   : > { %p43_p9 = scmp.eq.s32.totalorder %s5775_s27, 0  ;;  %p48_p4 = scmp.ne.s32.totalorder %s5767_s25, %s5763_s24 }
  0x95   : > { %p203_p1 = scmp.eq.s32.totalorder %s5853_s30, 1  ;;  %p7989_p10 = scmp.eq.s32.totalorder %s5853_s30, 0 }
  0x96   : > { %s6007_s28 = scalar_select %p33_p7, %s5771_s26, %s35_s29  }
  0x97   : > { %p44_p3 = por %p43_p9, %p42_p8  ;;  %p6011_p11 = por %p7989_p10, %p48_p4 }
  0x98   : > { %p6015_p6 = por %p203_p1, %p42_p8  ;;  %p209_p12 = scmp.eq.s32.totalorder %s4534_s11, 1 }
  0x99   : > { %p5039_p13 = scmp.lt.s32.totalorder %s5775_s27, 2  ;;  %s292_s9 = sand.u32 1, %s5771_s26  }
  0x9a   : > { %s7991_s21 = scalar_select %p6015_p6, 1, 0 }
  0x9b   : > { %p6021_p0 = por %p209_p12, %p48_p4  ;;  %s6025_s14 = sshll.u32 %s292_s9, 9 }
  0x9c   : > { %s7977_s15 = sshll.u32 %s5775_s27, 13  ;;  %s7993_s0 = sld [smem:[#allocation21_spill]] }
  0x9d   : > { %s7992_s12 = scalar_select %p6021_p0, 1, 0 }
  0x9e   : > { %s296_s18 = scalar_lea.vmem [#allocation2], %s6025_s14  ;;  %p6036_p2 = pnand %p5039_p13, %p44_p3 }
  0x9f   : > { %s303_s23 = sshll.u32 %s296_s18, 4  ;;  %s6042_s11 = scalar_lea.sflag [#allocation3], %s292_s9  ;;  %s6040_s23 = int_to_ptr.vmem [resolvable:$true] %s303_s23 }
  0xa0   : > { %p5635_p8 = pneg %p6036_p2 }
  0xa2   : > { %s6033_s10 = scalar_lea.hbm %s7993_s0, %s7977_s15  ;;  %s5638_s17 = scalar_lea.hbm %s7993_s0, 16384 }
  0xa3   : > { %s5633_s29 = scalar_lea.hbm %s6033_s10, 8192  ;;  %p5639_p4 = scmp.lt.u32.totalorder %s6033_s10, %s7993_s0 }
  0xa4   : > { %p5634_p5 = scmp.ne.s32.totalorder %s6033_s10, %s5633_s29  ;;  %p5640_p1 = scmp.lt.u32.totalorder %s5638_s17, %s5633_s29 }
  0xa5   : > { %p5642_p10 = scmp.lt.u32.totalorder %s5633_s29, %s6033_s10 }
  0xa6   : > { %p5636_p7 = pnand %p5635_p8, %p5634_p5  ;;  %p5641_p3 = por %p5640_p1, %p5639_p4 }
  0xa8   : > { %p5637_p9 = pneg %p5636_p7  ;;  %p5643_p12 = por %p5642_p10, %p5641_p3 }
  0xaa   : > { %p5644_p13 = pnand %p5643_p12, %p5637_p9 }
  0xac   : > { %5647 = shalt.err (!%p5644_p13)
}
  0xad   : > { %s5648_s9 = scalar_lea.vmem %s6040_s23, 8192  ;;  %s5784_s22 = smov [#allocation2]  }
  0xae   : > { %p5649_p5 = scmp.ne.s32.totalorder %s6040_s23, %s5648_s9  ;;  %s5653_s16 = sshll.u32 %s5784_s22, 4  ;;  %s5654_s16 = int_to_ptr.vmem [resolvable:$false] %s5653_s16 }
  0xaf   : > { %s5655_s15 = scalar_lea.vmem %s5654_s16, 16384  ;;  %p5656_p6 = scmp.lt.s32.totalorder %s6040_s23, %s5654_s16 }
  0xb0   : > { %p5651_p7 = pnand %p5649_p5, %p5635_p8  ;;  %p5657_p4 = scmp.lt.s32.totalorder %s5655_s15, %s5648_s9 }
  0xb2   : > { %p5652_p0 = pneg %p5651_p7  ;;  %p5658_p1 = por %p5657_p4, %p5656_p6 }
  0xb4   : > { %p5659_p3 = pnand %p5658_p1, %p5652_p0 }
  0xb6   : > { %5662 = shalt.err (!%p5659_p3)
}
  0xb7   : > { %s5785_s29 = smov 128   ;;  %s5786_s17 = smov 8  }
  0xb8   : > { %5026 = dma.hbm_to_vmem [thread:$0]  (!%p6036_p2), %s6033_s10, 8192, %s6040_s23, %s6042_s11, %s5785_s29, %s5785_s29, %s5786_s17  }
  0xb9   : > { %s7995_s18 = sshll.u32 %s5775_s27, 13  ;;  %s317_s15 = scalar_lea.vmem [#allocation5], %s6025_s14 }
  0xba   : > { %s6078_s16 = scalar_lea.hbm %s7968_s1, %s7995_s18  ;;  %s324_s0 = sshll.u32 %s317_s15, 4  ;;  %s6082_s0 = int_to_ptr.vmem [resolvable:$true] %s324_s0 }
  0xbb   : > { %s313_s2 = sand.u32 1, %s5775_s27   ;;  %s5663_s4 = scalar_lea.hbm %s6078_s16, 8192 }
  0xbc   : > { %s6084_s3 = scalar_lea.sflag [#allocation6], %s313_s2  ;;  %p5664_p6 = scmp.ne.s32.totalorder %s6078_s16, %s5663_s4 }
  0xbd   : > { %s5668_s11 = scalar_lea.hbm %s7968_s1, 16384  ;;  %p5669_p10 = scmp.lt.u32.totalorder %s6078_s16, %s7968_s1 }
  0xbe   : > { %p5666_p0 = pnand %p5664_p6, %p5635_p8  ;;  %p5670_p12 = scmp.lt.u32.totalorder %s5668_s11, %s5663_s4 }
  0xbf   : > { %p5672_p5 = scmp.lt.u32.totalorder %s5663_s4, %s6078_s16 }
  0xc0   : > { %p5667_p9 = pneg %p5666_p0  ;;  %p5671_p13 = por %p5670_p12, %p5669_p10 }
  0xc2   : > { %p5673_p7 = por %p5672_p5, %p5671_p13 }
  0xc4   : > { %p5674_p4 = pnand %p5673_p7, %p5667_p9 }
  0xc6   : > { %5677 = shalt.err (!%p5674_p4)
}
  0xc7   : > { %s5678_s2 = scalar_lea.vmem %s6082_s0, 8192  ;;  %s5787_s14 = smov [#allocation5]  }
  0xc8   : > { %p5679_p1 = scmp.ne.s32.totalorder %s6082_s0, %s5678_s2  ;;  %s5683_s22 = sshll.u32 %s5787_s14, 4  ;;  %s5684_s22 = int_to_ptr.vmem [resolvable:$false] %s5683_s22 }
  0xc9   : > { %s5685_s15 = scalar_lea.vmem %s5684_s22, 16384  ;;  %p5686_p0 = scmp.lt.s32.totalorder %s6082_s0, %s5684_s22 }
  0xca   : > { %p5681_p3 = pnand %p5679_p1, %p5635_p8  ;;  %p5687_p10 = scmp.lt.s32.totalorder %s5685_s15, %s5678_s2 }
  0xcc   : > { %p5682_p6 = pneg %p5681_p3  ;;  %p5688_p12 = por %p5687_p10, %p5686_p0 }
  0xce   : > { %p5689_p13 = pnand %p5688_p12, %p5682_p6 }
  0xd0   : > { %5692 = shalt.err (!%p5689_p13)
}
  0xd1   : > { %5029 = dma.hbm_to_vmem [thread:$0]  (!%p6036_p2), %s6078_s16, 8192, %s6082_s0, %s6084_s3, %s5785_s29, %s5785_s29, %s5786_s17  }
  0xd2   : > { %p7996_p8 = scmp.ne.s32.totalorder %s7983_s8, 0 }
  0xd3   : > { %s6116_s4 = sand.u32 (!%p7996_p8), 1, %s5767_s25  }
  0xd4   : > { %336 = sbr.rel (%p7996_p8) target bundleno = 1806 (0x70e), region = 48  ;;  %s6119_s10 = sshll.u32 (!%p7996_p8), %s6116_s4, 9 }
  0xd5   : > { %s339_s13 = scalar_lea.sflag (!%p7996_p8), [#allocation3], %s6116_s4  ;;  %s6123_s23 = scalar_lea.vmem (!%p7996_p8), [#allocation2], %s6119_s10 }
  0xdb   : > { %5738 = dma.done.wait (%p6011_p11), %s339_s13, 8192  }
  0xdc   : > { %5740 = vsyncadd (%p6011_p11), %s339_s13, 4294959104  ;;  %s347_s0 = sand.u32 1, %s5853_s30   ;;  %s6131_s8 = scalar_lea.vmem [#allocation5], %s6119_s10 }
  0xdd   : > { %s348_s3 = scalar_lea.sflag [#allocation6], %s347_s0 }
  0xde   : > { %5742 = dma.done.wait (%p6011_p11), %s348_s3, 8192  }
  0xdf   : > { %5744 = vsyncadd (%p6011_p11), %s348_s3, 4294959104  ;;  %p7997_p2 = scmp.eq.s32.totalorder %s5853_s30, 0 }
  0xe1   : > { %5746 = dma.done.wait (%p7997_p2), [#allocation6], 128   ;;  %p7998_p9 = pmov %p7997_p2 }
  0xe2   : > { %p7999_p5 = pmov %p7997_p2 }
  0xe3   : > { %5748 = vsyncadd (%p7998_p9), [#allocation6], 4294967168 }
  0xe4   : > { %5750 = dma.done.wait (%p7999_p5), [#allocation9], 3072   ;;  %p8000_p7 = pmov %p7997_p2 }
  0xe5   : > { %p8001_p4 = pmov %p7997_p2 }
  0xe6   : > { %5752 = vsyncadd (%p8000_p7), [#allocation9], 4294964224 }
  0xe7   : > { %5754 = dma.done.wait (%p8001_p4), [#allocation12], 2048   ;;  %p8002_p1 = pmov %p7997_p2 }
  0xe8   : > { %v5788_v0 = vmov 0   ;;  %v6151_v1 = vld [vmem:[%s6131_s8] sm:$0xff]  ;;  %v6159_v3 = vld [vmem:[%s6131_s8 + $0x8] sm:$0xff]  ;;  %v5091_v10 = vld [vmem:[#allocation8 + $0x8] sm:$0xff]   ;;  %s7790_s20 = scalar_lea.vmem [#allocation14], %s6119_s10  ;;  %s4604_s29 = sshll.u32 %s5853_s30, 13 }
  0xe9   : > { %5756 = vsyncadd (%p8002_p1), [#allocation12], 4294965248  ;;  %2665 = vmatprep.subr.bf16.mxu0 %v5788_v0  ;;  %v6154_v2 = vld [vmem:[%s6123_s23] sm:$0xff]  ;;  %1541 = vadd.xlane.f32.xlu0 %v6151_v1  ;;  %v6162_v4 = vld [vmem:[%s6123_s23 + $0x8] sm:$0xff]  ;;  %v1733_v5 = vmul.f32 %v6151_v1, %v6151_v1  ;;  %v1734_v6 = vmul.f32 %v6159_v3, %v6159_v3  ;;  %s4391_s17 = sshll.u32 %s7790_s20, 4  ;;  %s7918_s18 = scalar_lea.hbm %s7974_s7, %s4604_s29  ;;  %s7920_s17 = int_to_ptr.vmem [resolvable:$true] %s4391_s17 }
  0xea   : > { %476 = vadd.xlane.f32.xlu1 %v6154_v2  ;;  %v670_v7 = vmul.f32 %v6162_v4, %v6162_v4  ;;  %v669_v8 = vmul.f32 %v6154_v2, %v6154_v2  ;;  %v5090_v9 = vld [vmem:[#allocation8] sm:$0xff]   ;;  %v6175_v11 = vld [vmem:[%s6131_s8 + $0x18] sm:$0xff]  ;;  %v6178_v12 = vld [vmem:[%s6131_s8 + $0x10] sm:$0xff]  ;;  %s4378_s30 = scalar_lea.sflag [#allocation4], %s6116_s4  ;;  %s5693_s9 = scalar_lea.vmem %s7920_s17, 8192 }
  0xeb   : > { %2666 = vmatpush1.bf16.msra.mxu0 %v5090_v9  ;;  %v5092_v13 = vld [vmem:[#allocation8 + $0x10] sm:$0xff]   ;;  %v6187_v15 = vld [vmem:[%s6123_s23 + $0x10] sm:$0xff]  ;;  %v5093_v16 = vld [vmem:[#allocation8 + $0x18] sm:$0xff]   ;;  %v1736_v17 = vmul.f32 %v6175_v11, %v6175_v11  ;;  %v1735_v18 = vmul.f32 %v6178_v12, %v6178_v12  ;;  %p5694_p11 = scmp.ne.s32.totalorder %s7920_s17, %s5693_s9  ;;  %p8011_p3 = scmp.ne.s32.totalorder %s7991_s21, 0 }
  0xec   : > { %2667 = vmatprep.subr.bf16.mxu0 %v5788_v0  ;;  %v6184_v14 = vld [vmem:[%s6123_s23 + $0x18] sm:$0xff]  ;;  %v5094_v19 = vld [vmem:[#allocation8 + $0x20] sm:$0xff]   ;;  %v671_v21 = vmul.f32 %v6187_v15, %v6187_v15  ;;  %v6206_v23 = vld [vmem:[%s6131_s8 + $0x20] sm:$0xff]  ;;  %s5789_s2 = smov [#allocation14]  }
  0xed   : > { %1543 = vadd.xlane.f32.xlu0 %v6159_v3  ;;  %v672_v20 = vmul.f32 %v6184_v14, %v6184_v14  ;;  %v6203_v22 = vld [vmem:[%s6131_s8 + $0x28] sm:$0xff]  ;;  %v5095_v24 = vld [vmem:[#allocation8 + $0x28] sm:$0xff]   ;;  %v5096_v25 = vld [vmem:[#allocation8 + $0x30] sm:$0xff]   ;;  %v1737_v30 = vmul.f32 %v6206_v23, %v6206_v23  ;;  %p5695_p6 = pnand %p5694_p11, %p8011_p3  ;;  %s5697_s14 = sshll.u32 %s5789_s2, 4  ;;  %s5698_s14 = int_to_ptr.vmem [resolvable:$false] %s5697_s14 }
  0xee   : > { %478 = vadd.xlane.f32.xlu1 %v6162_v4  ;;  %v6212_v26 = vld [vmem:[%s6123_s23 + $0x28] sm:$0xff]  ;;  %v6215_v27 = vld [vmem:[%s6123_s23 + $0x20] sm:$0xff]  ;;  %v1738_v29 = vmul.f32 %v6203_v22, %v6203_v22  ;;  %v6231_v34 = vld [vmem:[%s6131_s8 + $0x38] sm:$0xff]  ;;  %s5699_s22 = scalar_lea.vmem %s5698_s14, 16384  ;;  %p5700_p10 = scmp.lt.s32.totalorder %s7920_s17, %s5698_s14 }
  0xef   : > { %2668 = vmatpush1.bf16.msra.mxu0 %v5091_v10  ;;  %v5097_v28 = vld [vmem:[#allocation8 + $0x38] sm:$0xff]   ;;  %v5098_v31 = vld [vmem:[#allocation8 + $0x40] sm:$0xff]   ;;  %v674_v32 = vmul.f32 %v6212_v26, %v6212_v26  ;;  %v673_v33 = vmul.f32 %v6215_v27, %v6215_v27  ;;  %v6234_v35 = vld [vmem:[%s6131_s8 + $0x30] sm:$0xff]  ;;  %v1740_v41 = vmul.f32 %v6231_v34, %v6231_v34  ;;  %p5696_p0 = pneg %p5695_p6  ;;  %p5701_p12 = scmp.lt.s32.totalorder %s5699_s22, %s5693_s9 }
  0xf0   : > { %2669 = vmatprep.subr.bf16.mxu0 %v5788_v0  ;;  %v5099_v36 = vld [vmem:[#allocation8 + $0x48] sm:$0xff]   ;;  %v5100_v37 = vld [vmem:[#allocation8 + $0x50] sm:$0xff]   ;;  %v5101_v40 = vld [vmem:[#allocation8 + $0x58] sm:$0xff]   ;;  %v1739_v42 = vmul.f32 %v6234_v35, %v6234_v35 }
  0xf1   : > { %1797 = vadd.xlane.f32.xlu0 %v1733_v5  ;;  %v6240_v38 = vld [vmem:[%s6123_s23 + $0x38] sm:$0xff]  ;;  %v6243_v39 = vld [vmem:[%s6123_s23 + $0x30] sm:$0xff]  ;;  %v5102_v43 = vld [vmem:[#allocation8 + $0x60] sm:$0xff]   ;;  %p5702_p13 = por %p5701_p12, %p5700_p10 }
  0xf2   : > { %1799 = vadd.xlane.f32.xlu1 %v1734_v6  ;;  %v676_v44 = vmul.f32 %v6240_v38, %v6240_v38  ;;  %v675_v45 = vmul.f32 %v6243_v39, %v6243_v39  ;;  %v5103_v46 = vld [vmem:[#allocation8 + $0x68] sm:$0xff]   ;;  %v6259_v47 = vld [vmem:[%s6131_s8 + $0x48] sm:$0xff]  ;;  %v6262_v48 = vld [vmem:[%s6131_s8 + $0x40] sm:$0xff] }
  0xf3   : > { %2670 = vmatpush1.bf16.msra.mxu0 %v5092_v13  ;;  %v5104_v49 = vld [vmem:[#allocation8 + $0x70] sm:$0xff]   ;;  %v6268_v50 = vld [vmem:[%s6123_s23 + $0x48] sm:$0xff]  ;;  %v6271_v51 = vld [vmem:[%s6123_s23 + $0x40] sm:$0xff]  ;;  %v1742_v53 = vmul.f32 %v6259_v47, %v6259_v47  ;;  %v1741_v54 = vmul.f32 %v6262_v48, %v6262_v48  ;;  %p5703_p8 = pnand %p5702_p13, %p5696_p0 }
  0xf4   : > { %2671 = vmatprep.subr.bf16.mxu0 %v5788_v0  ;;  %v5105_v52 = vld [vmem:[#allocation8 + $0x78] sm:$0xff]   ;;  %v678_v55 = vmul.f32 %v6268_v50, %v6268_v50  ;;  %v677_v56 = vmul.f32 %v6271_v51, %v6271_v51  ;;  %v6286_v57 = vld [vmem:[%s6131_s8 + $0x58] sm:$0xff]  ;;  %v6289_v58 = vld [vmem:[%s6131_s8 + $0x50] sm:$0xff] }
  0xf5   : > { %733 = vadd.xlane.f32.xlu0 %v669_v8  ;;  %v6294_v59 = vld [vmem:[%s6123_s23 + $0x58] sm:$0xff]  ;;  %v6297_v60 = vld [vmem:[%s6123_s23 + $0x50] sm:$0xff]  ;;  %v1744_v61 = vmul.f32 %v6286_v57, %v6286_v57  ;;  %v1743_v62 = vmul.f32 %v6289_v58, %v6289_v58  ;;  %v1490_v5 = vld [vmem:[%s6131_s8 + $0x68] sm:$0xff] }
  0xf6   : > { %735 = vadd.xlane.f32.xlu1 %v670_v7  ;;  %v680_v63 = vmul.f32 %v6294_v59, %v6294_v59  ;;  %v1489_v6 = vld [vmem:[%s6131_s8 + $0x60] sm:$0xff]  ;;  %v425_v7 = vld [vmem:[%s6123_s23 + $0x68] sm:$0xff]  ;;  %v1746_v9 = vmul.f32 %v1490_v5, %v1490_v5 }
  0xf7   : > { %2672 = vmatpush1.bf16.msra.mxu0 %v5093_v16  ;;  %v424_v8 = vld [vmem:[%s6123_s23 + $0x60] sm:$0xff]  ;;  %v1745_v10 = vmul.f32 %v1489_v6, %v1489_v6  ;;  %v682_v13 = vmul.f32 %v425_v7, %v425_v7 }
  0xf8   : > { %2673 = vmatprep.subr.bf16.mxu0 %v5788_v0  ;;  %v681_v16 = vmul.f32 %v424_v8, %v424_v8 }
  0xf9   : > { %1545 = vadd.xlane.f32.xlu0 %v6178_v12 }
  0xfa   : > { %1547 = vadd.xlane.f32.xlu1 %v6175_v11 }
  0xfb   : > { %2674 = vmatpush1.bf16.msra.mxu0 %v5094_v19  ;;  %v427_v19 = vld [vmem:[%s6123_s23 + $0x78] sm:$0xff] }
  0xfc   : > { %2675 = vmatprep.subr.bf16.mxu0 %v5788_v0 }
  0xfd   : > { %480 = vadd.xlane.f32.xlu0 %v6187_v15 }
  0xfe   : > { %482 = vadd.xlane.f32.xlu1 %v6184_v14 }
  0xff   : > { %2676 = vmatpush1.bf16.msra.mxu0 %v5095_v24 }
 0x100   : > { %2677 = vmatprep.subr.bf16.mxu0 %v5788_v0 }
 0x101   : > { %1801 = vadd.xlane.f32.xlu0 %v1735_v18  ;;  %v1491_v18 = vld [vmem:[%s6131_s8 + $0x70] sm:$0xff] }
 0x102   : > { %1803 = vadd.xlane.f32.xlu1 %v1736_v17  ;;  %v1492_v17 = vld [vmem:[%s6131_s8 + $0x78] sm:$0xff]  ;;  %v1747_v24 = vmul.f32 %v1491_v18, %v1491_v18 }
 0x103   : > { %2678 = vmatpush1.bf16.msra.mxu0 %v5096_v25  ;;  %v684_v25 = vmul.f32 %v427_v19, %v427_v19 }
 0x104   : > { %2679 = vmatprep.subr.bf16.mxu0 %v5788_v0 }
 0x105   : > { %737 = vadd.xlane.f32.xlu0 %v671_v21  ;;  %v1748_v21 = vmul.f32 %v1492_v17, %v1492_v17 }
 0x106   : > { %739 = vadd.xlane.f32.xlu1 %v672_v20  ;;  %v426_v20 = vld [vmem:[%s6123_s23 + $0x70] sm:$0xff] }
 0x107   : > { %2680 = vmatpush1.bf16.msra.mxu0 %v5097_v28  ;;  %v683_v28 = vmul.f32 %v426_v20, %v426_v20 }
 0x108   : > { %2681 = vmatprep.subr.bf16.mxu0 %v5788_v0 }
 0x109   : > { %1549 = vadd.xlane.f32.xlu0 %v6206_v23 }
 0x10a   : > { %1551 = vadd.xlane.f32.xlu1 %v6203_v22 }
 0x10b   : > { %2682 = vmatpush1.bf16.msra.mxu0 %v5098_v31  ;;  %v429_v31 = vld [vmem:[%s6123_s23 + $0x88] sm:$0xff] }
 0x10c   : > { %2683 = vmatprep.subr.bf16.mxu0 %v5788_v0 }
 0x10d   : > { %484 = vadd.xlane.f32.xlu0 %v6215_v27 }
 0x10e   : > { %486 = vadd.xlane.f32.xlu1 %v6212_v26 }
 0x10f   : > { %2684 = vmatpush1.bf16.msra.mxu0 %v5099_v36 }
 0x110   : > { %2685 = vmatprep.subr.bf16.mxu0 %v5788_v0 }
 0x111   : > { %1805 = vadd.xlane.f32.xlu0 %v1737_v30  ;;  %v1493_v30 = vld [vmem:[%s6131_s8 + $0x80] sm:$0xff] }
 0x112   : > { %1807 = vadd.xlane.f32.xlu1 %v1738_v29  ;;  %v1494_v29 = vld [vmem:[%s6131_s8 + $0x88] sm:$0xff]  ;;  %v1749_v36 = vmul.f32 %v1493_v30, %v1493_v30 }
 0x113   : > { %2686 = vmatpush1.bf16.msra.mxu0 %v5100_v37  ;;  %v686_v37 = vmul.f32 %v429_v31, %v429_v31 }
 0x114   : > { %2687 = vmatprep.subr.bf16.mxu0 %v5788_v0 }
 0x115   : > { %741 = vadd.xlane.f32.xlu0 %v673_v33  ;;  %v1750_v33 = vmul.f32 %v1494_v29, %v1494_v29 }
 0x116   : > { %743 = vadd.xlane.f32.xlu1 %v674_v32  ;;  %v428_v32 = vld [vmem:[%s6123_s23 + $0x80] sm:$0xff] }
 0x117   : > { %2688 = vmatpush1.bf16.msra.mxu0 %v5101_v40  ;;  %v685_v40 = vmul.f32 %v428_v32, %v428_v32 }
 0x118   : > { %2689 = vmatprep.subr.bf16.mxu0 %v5788_v0 }
 0x119   : > { %1553 = vadd.xlane.f32.xlu0 %v6234_v35 }
 0x11a   : > { %1555 = vadd.xlane.f32.xlu1 %v6231_v34 }
 0x11b   : > { %2690 = vmatpush1.bf16.msra.mxu0 %v5102_v43  ;;  %v1496_v43 = vld [vmem:[%s6131_s8 + $0x98] sm:$0xff] }
 0x11c   : > { %2691 = vmatprep.subr.bf16.mxu0 %v5788_v0 }
 0x11d   : > { %488 = vadd.xlane.f32.xlu0 %v6243_v39 }
 0x11e   : > { %490 = vadd.xlane.f32.xlu1 %v6240_v38 }
 0x11f   : > { %2692 = vmatpush1.bf16.msra.mxu0 %v5103_v46 }
 0x120   : > { %2693 = vmatprep.subr.bf16.mxu0 %v5788_v0 }
 0x121   : > { %1809 = vadd.xlane.f32.xlu0 %v1739_v42 }
 0x122   : > { %1811 = vadd.xlane.f32.xlu1 %v1740_v41 }
 0x123   : > { %2694 = vmatpush1.bf16.msra.mxu0 %v5104_v49  ;;  %v431_v49 = vld [vmem:[%s6123_s23 + $0x98] sm:$0xff] }
 0x124   : > { %2695 = vmatprep.subr.bf16.mxu0 %v5788_v0  ;;  %v679_v0 = vmul.f32 %v6297_v60, %v6297_v60 }
 0x125   : > { %745 = vadd.xlane.f32.xlu0 %v675_v45 }
 0x126   : > { %747 = vadd.xlane.f32.xlu1 %v676_v44  ;;  %v1495_v44 = vld [vmem:[%s6131_s8 + $0x90] sm:$0xff] }
 0x127   : > { %2696 = vmatpush1.bf16.msra.mxu0 %v5105_v52 }
 0x129   : > { %1557 = vadd.xlane.f32.xlu0 %v6262_v48 }
 0x12a   : > { %1559 = vadd.xlane.f32.xlu1 %v6259_v47 }
 0x12d   : > { %492 = vadd.xlane.f32.xlu0 %v6271_v51 }
 0x12e   : > { %494 = vadd.xlane.f32.xlu1 %v6268_v50 }
 0x131   : > { %1813 = vadd.xlane.f32.xlu0 %v1741_v54  ;;  %v430_v54 = vld [vmem:[%s6123_s23 + $0x90] sm:$0xff] }
 0x132   : > { %1815 = vadd.xlane.f32.xlu1 %v1742_v53 }
 0x135   : > { %749 = vadd.xlane.f32.xlu0 %v677_v56 }
 0x136   : > { %751 = vadd.xlane.f32.xlu1 %v678_v55  ;;  %v1752_v55 = vmul.f32 %v1496_v43, %v1496_v43 }
 0x139   : > { %1561 = vadd.xlane.f32.xlu0 %v6289_v58 }
 0x13a   : > { %1563 = vadd.xlane.f32.xlu1 %v6286_v57 }
 0x13d   : > { %496 = vadd.xlane.f32.xlu0 %v6297_v60 }
 0x13e   : > { %498 = vadd.xlane.f32.xlu1 %v6294_v59 }
 0x141   : > { %1817 = vadd.xlane.f32.xlu0 %v1743_v62 }
 0x142   : > { %1819 = vadd.xlane.f32.xlu1 %v1744_v61 }
 0x145   : > { %753 = vadd.xlane.f32.xlu0 %v679_v0  ;;  %v1751_v0 = vmul.f32 %v1495_v44, %v1495_v44 }
 0x146   : > { %755 = vadd.xlane.f32.xlu1 %v680_v63 }
 0x149   : > { %1565 = vadd.xlane.f32.xlu0 %v1489_v6 }
 0x14a   : > { %1567 = vadd.xlane.f32.xlu1 %v1490_v5 }
 0x14d   : > { %500 = vadd.xlane.f32.xlu0 %v424_v8 }
 0x14e   : > { %502 = vadd.xlane.f32.xlu1 %v425_v7 }
 0x151   : > { %1821 = vadd.xlane.f32.xlu0 %v1745_v10 }
 0x152   : > { %1823 = vadd.xlane.f32.xlu1 %v1746_v9 }
 0x155   : > { %757 = vadd.xlane.f32.xlu0 %v681_v16  ;;  %v1309_v16 = vlaneseq }
 0x156   : > { %759 = vadd.xlane.f32.xlu1 %v682_v13  ;;  %v688_v13 = vmul.f32 %v431_v49, %v431_v49 }
 0x159   : > { %1569 = vadd.xlane.f32.xlu0 %v1491_v18 }
 0x15a   : > { %1571 = vadd.xlane.f32.xlu1 %v1492_v17 }
 0x15d   : > { %504 = vadd.xlane.f32.xlu0 %v426_v20 }
 0x15e   : > { %506 = vadd.xlane.f32.xlu1 %v427_v19 }
 0x161   : > { %1825 = vadd.xlane.f32.xlu0 %v1747_v24 }
 0x162   : > { %1827 = vadd.xlane.f32.xlu1 %v1748_v21  ;;  %v687_v21 = vmul.f32 %v430_v54, %v430_v54 }
 0x165   : > { %761 = vadd.xlane.f32.xlu0 %v683_v28 }
 0x166   : > { %763 = vadd.xlane.f32.xlu1 %v684_v25 }
 0x169   : > { %1573 = vadd.xlane.f32.xlu0 %v1493_v30 }
 0x16a   : > { %1575 = vadd.xlane.f32.xlu1 %v1494_v29 }
 0x16d   : > { %508 = vadd.xlane.f32.xlu0 %v428_v32  ;;  %v6341_v32 = vshrl.u32 %v1309_v16, 7 }
 0x16e   : > { %510 = vadd.xlane.f32.xlu1 %v429_v31 }
 0x171   : > { %1829 = vadd.xlane.f32.xlu0 %v1749_v36 }
 0x172   : > { %1831 = vadd.xlane.f32.xlu1 %v1750_v33 }
 0x175   : > { %765 = vadd.xlane.f32.xlu0 %v685_v40 }
 0x176   : > { %767 = vadd.xlane.f32.xlu1 %v686_v37  ;;  %v1542_v41 = vpop.xlane.xlu0 %1541  ;;  %v1498_v37 = vld [vmem:[%s6131_s8 + $0xa8] sm:$0xff] }
 0x177   : > { %v477_v42 = vpop.xlane.xlu1 %476  ;;  %v6324_v52 = vmul.f32 0.0078125, %v1542_v41 }
 0x178   : > { %v6329_v56 = vmul.f32 0.0078125, %v477_v42  ;;  %v1497_v42 = vld [vmem:[%s6131_s8 + $0xa0] sm:$0xff] }
 0x179   : > { %1577 = vadd.xlane.f32.xlu0 %v1495_v44  ;;  %v1989_v5 = vmul.f32 %v6324_v52, %v6324_v52 }
 0x17a   : > { %1579 = vadd.xlane.f32.xlu1 %v1496_v43  ;;  %v1544_v45 = vpop.xlane.xlu0 %1543  ;;  %v925_v17 = vmul.f32 %v6329_v56, %v6329_v56  ;;  %v1311_v43 = vsub.s32 0, %v6341_v32 }
 0x17b   : > { %v479_v46 = vpop.xlane.xlu1 %478  ;;  %v6326_v53 = vmul.f32 0.0078125, %v1544_v45 }
 0x17c   : > { %v6331_v61 = vmul.f32 0.0078125, %v479_v46  ;;  %v433_v46 = vld [vmem:[%s6123_s23 + $0xa8] sm:$0xff] }
 0x17d   : > { %512 = vadd.xlane.f32.xlu0 %v430_v54  ;;  %v1990_v6 = vmul.f32 %v6326_v53, %v6326_v53 }
 0x17e   : > { %514 = vadd.xlane.f32.xlu1 %v431_v49  ;;  %v1798_v62 = vpop.xlane.xlu0 %1797  ;;  %v926_v18 = vmul.f32 %v6331_v61, %v6331_v61  ;;  %v411_v49 = vld [vmem:[#allocation7] sm:$0xff] }
 0x17f   : > { %v1800_v63 = vpop.xlane.xlu1 %1799  ;;  %v1925_v7 = vmul.f32 0.0078125, %v1798_v62  ;;  %v432_v62 = vld [vmem:[%s6123_s23 + $0xa0] sm:$0xff] }
 0x180   : > { %v1926_v8 = vmul.f32 0.0078125, %v1800_v63  ;;  %v1379_v63 = vsub.s32 1, %v6341_v32 }
 0x181   : > { %v2053_v9 = vsub.f32 %v1925_v7, %v1989_v5  ;;  %1833 = vadd.xlane.f32.xlu0 %v1751_v0  ;;  %v1754_v0 = vmul.f32 %v1498_v37, %v1498_v37  ;;  %v1753_v5 = vmul.f32 %v1497_v42, %v1497_v42  ;;  %v2245_v7 = vsub.f32 %v6151_v1, %v6324_v52 }
 0x182   : > { %v2054_v10 = vsub.f32 %v1926_v8, %v1990_v6  ;;  %1835 = vadd.xlane.f32.xlu1 %v1752_v55  ;;  %v734_v20 = vpop.xlane.xlu0 %733  ;;  %v6353_v6 = vrot.slane %v411_v49, %v1311_v43  ;;  %v2246_v8 = vsub.f32 %v6159_v3, %v6326_v53  ;;  %v690_v52 = vmul.f32 %v433_v46, %v433_v46 }
 0x183   : > { %v736_v19 = vpop.xlane.xlu1 %735  ;;  %v2117_v24 = vadd.f32 1e-06, %v2053_v9  ;;  %v861_v29 = vmul.f32 0.0078125, %v734_v20  ;;  %v6367_v3 = vrot.slane %v411_v49, %v1379_v63 }
 0x184   : > { %v2118_v25 = vadd.f32 1e-06, %v2054_v10  ;;  %v862_v28 = vmul.f32 0.0078125, %v736_v19 }
 0x185   : > { %5130 = vrsqrt.f32 %v2117_v24  ;;  %v989_v31 = vsub.f32 %v861_v29, %v925_v17  ;;  %769 = vadd.xlane.f32.xlu0 %v687_v21  ;;  %v689_v24 = vmul.f32 %v432_v62, %v432_v62 }
 0x186   : > { %v990_v30 = vsub.f32 %v862_v28, %v926_v18  ;;  %771 = vadd.xlane.f32.xlu1 %v688_v13  ;;  %5132 = vrsqrt.f32 %v2118_v25  ;;  %v1546_v36 = vpop.xlane.xlu0 %1545  ;;  %v1181_v25 = vsub.f32 %v6154_v2, %v6329_v56 }
 0x187   : > { %v1548_v33 = vpop.xlane.xlu1 %1547  ;;  %v1053_v41 = vadd.f32 1e-06, %v989_v31  ;;  %v6349_v55 = vmul.f32 0.0078125, %v1546_v36  ;;  %v1182_v31 = vsub.f32 %v6162_v4, %v6331_v61 }
 0x188   : > { %v1054_v40 = vadd.f32 1e-06, %v990_v30  ;;  %v6347_v54 = vmul.f32 0.0078125, %v1548_v33 }
 0x189   : > { %1581 = vadd.xlane.f32.xlu0 %v1497_v42  ;;  %v1991_v19 = vmul.f32 %v6349_v55, %v6349_v55 }
 0x18a   : > { %5134 = vrsqrt.f32 %v1054_v40  ;;  %1583 = vadd.xlane.f32.xlu1 %v1498_v37  ;;  %v481_v45 = vpop.xlane.xlu0 %480  ;;  %v1992_v18 = vmul.f32 %v6347_v54, %v6347_v54 }
 0x18b   : > { %5136 = vrsqrt.f32 %v1053_v41  ;;  %v483_v44 = vpop.xlane.xlu1 %482  ;;  %v6361_v10 = vmul.f32 0.0078125, %v481_v45 }
 0x18c   : > { %v6359_v9 = vmul.f32 0.0078125, %v483_v44 }
 0x18d   : > { %516 = vadd.xlane.f32.xlu0 %v432_v62  ;;  %v927_v36 = vmul.f32 %v6361_v10, %v6361_v10 }
 0x18e   : > { %518 = vadd.xlane.f32.xlu1 %v433_v46  ;;  %v1802_v16 = vpop.xlane.xlu0 %1801  ;;  %v928_v33 = vmul.f32 %v6359_v9, %v6359_v9 }
 0x18f   : > { %v1804_v13 = vpop.xlane.xlu1 %1803  ;;  %v5131_v17 = vpop.eup %5130  ;;  %v1927_v21 = vmul.f32 0.0078125, %v1802_v16 }
 0x190   : > { %v1928_v20 = vmul.f32 0.0078125, %v1804_v13  ;;  %v5133_v1 = vpop.eup %5132  ;;  %v2309_v53 = vmul.f32 %v5131_v17, %v2245_v7 }
 0x191   : > { %v2055_v29 = vsub.f32 %v1927_v21, %v1991_v19  ;;  %v2310_v30 = vmul.f32 %v5133_v1, %v2246_v8  ;;  %1837 = vadd.xlane.f32.xlu0 %v1753_v5  ;;  %v1500_v8 = vld [vmem:[%s6131_s8 + $0xb8] sm:$0xff] }
 0x192   : > { %v2056_v28 = vsub.f32 %v1928_v20, %v1992_v18  ;;  %1839 = vadd.xlane.f32.xlu1 %v1754_v0  ;;  %v738_v40 = vpop.xlane.xlu0 %737  ;;  %v2373_v41 = vmul.f32 %v2309_v53, %v6353_v6  ;;  %v1499_v18 = vld [vmem:[%s6131_s8 + $0xb0] sm:$0xff]  ;;  %v435_v53 = vld [vmem:[%s6123_s23 + $0xb8] sm:$0xff] }
 0x193   : > { %v740_v37 = vpop.xlane.xlu1 %739  ;;  %v2119_v56 = vadd.f32 1e-06, %v2055_v29  ;;  %v863_v44 = vmul.f32 0.0078125, %v738_v40  ;;  %v2374_v4 = vmul.f32 %v2310_v30, %v6353_v6  ;;  %v434_v29 = vld [vmem:[%s6123_s23 + $0xb0] sm:$0xff] }
 0x194   : > { %v5135_v42 = vpop.eup %5134  ;;  %v2120_v2 = vadd.f32 1e-06, %v2056_v28  ;;  %v864_v43 = vmul.f32 0.0078125, %v740_v37  ;;  %v2437_v61 = vadd.f32 %v2373_v41, %v6367_v3  ;;  %v2247_v37 = vsub.f32 %v6178_v12, %v6349_v55 }
 0x195   : > { %v5137_v45 = vpop.eup %5136  ;;  %v1246_v46 = vmul.f32 %v5135_v42, %v1182_v31  ;;  %v991_v62 = vsub.f32 %v863_v44, %v927_v36  ;;  %773 = vadd.xlane.f32.xlu0 %v689_v24  ;;  %v2438_v7 = vadd.f32 %v2374_v4, %v6367_v3  ;;  %v1756_v31 = vmul.f32 %v1500_v8, %v1500_v8 }
 0x196   : > { %5138 = vrsqrt.f32 %v2120_v2  ;;  %v992_v49 = vsub.f32 %v864_v43, %v928_v33  ;;  %775 = vadd.xlane.f32.xlu1 %v690_v52  ;;  %v1245_v63 = vmul.f32 %v5137_v45, %v1181_v25  ;;  %v1550_v5 = vpop.xlane.xlu0 %1549  ;;  %v1755_v33 = vmul.f32 %v1499_v18, %v1499_v18 }
 0x197   : > { %5140 = vrsqrt.f32 %v2119_v56  ;;  %v1552_v0 = vpop.xlane.xlu1 %1551  ;;  %v1314_v13 = vmul.f32 %v6353_v6, %v1246_v46  ;;  %v1055_v17 = vadd.f32 1e-06, %v991_v62  ;;  %v2501_v19 = vpack.c.bf16 %v2438_v7, %v2437_v61 }
 0x198   : > { %v1056_v16 = vadd.f32 1e-06, %v992_v49  ;;  %v1313_v20 = vmul.f32 %v6353_v6, %v1245_v63  ;;  %v6388_v25 = vmul.f32 0.0078125, %v1552_v0  ;;  %v6390_v28 = vmul.f32 0.0078125, %v1550_v5 }
 0x199   : > { %v1382_v21 = vadd.f32 %v6367_v3, %v1314_v13  ;;  %2697 = vmatprep.mubr.bf16.mxu0 %v2501_v19  ;;  %1585 = vadd.xlane.f32.xlu0 %v1499_v18  ;;  %v2248_v36 = vsub.f32 %v6175_v11, %v6347_v54  ;;  %v692_v4 = vmul.f32 %v435_v53, %v435_v53 }
 0x19a   : > { %5142 = vrsqrt.f32 %v1056_v16  ;;  %1587 = vadd.xlane.f32.xlu1 %v1500_v8  ;;  %v485_v52 = vpop.xlane.xlu0 %484  ;;  %v1381_v24 = vadd.f32 %v6367_v3, %v1313_v20  ;;  %v1994_v43 = vmul.f32 %v6388_v25, %v6388_v25  ;;  %v1993_v44 = vmul.f32 %v6390_v28, %v6390_v28 }
 0x19b   : > { %5144 = vrsqrt.f32 %v1055_v17  ;;  %v487_v1 = vpop.xlane.xlu1 %486  ;;  %v6399_v41 = vmul.f32 0.0078125, %v485_v52  ;;  %v691_v12 = vmul.f32 %v434_v29, %v434_v29  ;;  %v1184_v61 = vsub.f32 %v6184_v14, %v6359_v9 }
 0x19c   : > { %v1445_v30 = vpack.c.bf16 %v1382_v21, %v1381_v24  ;;  %v6397_v40 = vmul.f32 0.0078125, %v487_v1  ;;  %v1183_v63 = vsub.f32 %v6187_v15, %v6361_v10 }
 0x19d   : > { %520 = vadd.xlane.f32.xlu0 %v434_v29  ;;  %v929_v5 = vmul.f32 %v6399_v41, %v6399_v41 }
 0x19e   : > { %522 = vadd.xlane.f32.xlu1 %v435_v53  ;;  %2698 = vmatmul.mubr.bf16.vlgmr.msra.gmra.mrb[0].mxu0 %v1445_v30  ;;  %v1806_v2 = vpop.xlane.xlu0 %1805  ;;  %v930_v0 = vmul.f32 %v6397_v40, %v6397_v40  ;;  %v1502_v30 = vld [vmem:[%s6131_s8 + $0xc8] sm:$0xff] }
 0x19f   : > { %v1808_v42 = vpop.xlane.xlu1 %1807  ;;  %v1929_v11 = vmul.f32 0.0078125, %v1806_v2 }
 0x1a0   : > { %v5139_v56 = vpop.eup %5138  ;;  %v1930_v45 = vmul.f32 0.0078125, %v1808_v42 }
 0x1a1   : > { %v5141_v54 = vpop.eup %5140  ;;  %v2312_v55 = vmul.f32 %v5139_v56, %v2248_v36  ;;  %v2057_v49 = vsub.f32 %v1929_v11, %v1993_v44  ;;  %1841 = vadd.xlane.f32.xlu0 %v1755_v33  ;;  %v437_v11 = vld [vmem:[%s6123_s23 + $0xc8] sm:$0xff] }
 0x1a2   : > { %v2058_v46 = vsub.f32 %v1930_v45, %v1994_v43  ;;  %1843 = vadd.xlane.f32.xlu1 %v1756_v31  ;;  %v2311_v62 = vmul.f32 %v5141_v54, %v2247_v37  ;;  %v742_v8 = vpop.xlane.xlu0 %741  ;;  %v1501_v37 = vld [vmem:[%s6131_s8 + $0xc0] sm:$0xff] }
 0x1a3   : > { %v744_v7 = vpop.xlane.xlu1 %743  ;;  %v2376_v13 = vmul.f32 %v2312_v55, %v6353_v6  ;;  %v2121_v9 = vadd.f32 1e-06, %v2057_v49  ;;  %v865_v18 = vmul.f32 0.0078125, %v742_v8  ;;  %v2250_v49 = vsub.f32 %v6203_v22, %v6388_v25 }
 0x1a4   : > { %v5143_v16 = vpop.eup %5142  ;;  %v2122_v14 = vadd.f32 1e-06, %v2058_v46  ;;  %v866_v17 = vmul.f32 0.0078125, %v744_v7  ;;  %v2375_v15 = vmul.f32 %v2311_v62, %v6353_v6  ;;  %v1757_v46 = vmul.f32 %v1501_v37, %v1501_v37 }
 0x1a5   : > { %v5145_v19 = vpop.eup %5144  ;;  %v2440_v10 = vadd.f32 %v2376_v13, %v6367_v3  ;;  %v1248_v20 = vmul.f32 %v5143_v16, %v1184_v61  ;;  %v993_v1 = vsub.f32 %v865_v18, %v929_v5  ;;  %777 = vadd.xlane.f32.xlu0 %v691_v12  ;;  %v436_v12 = vld [vmem:[%s6123_s23 + $0xc0] sm:$0xff]  ;;  %v1758_v61 = vmul.f32 %v1502_v30, %v1502_v30 }
 0x1a6   : > { %5146 = vrsqrt.f32 %v2122_v14  ;;  %v994_v21 = vsub.f32 %v866_v17, %v930_v0  ;;  %779 = vadd.xlane.f32.xlu1 %v692_v4  ;;  %v1247_v52 = vmul.f32 %v5145_v19, %v1183_v63  ;;  %v1554_v53 = vpop.xlane.xlu0 %1553  ;;  %v2439_v29 = vadd.f32 %v2375_v15, %v6367_v3 }
 0x1a7   : > { %5148 = vrsqrt.f32 %v2121_v9  ;;  %v1556_v24 = vpop.xlane.xlu1 %1555  ;;  %v1316_v31 = vmul.f32 %v6353_v6, %v1248_v20  ;;  %v1057_v36 = vadd.f32 1e-06, %v993_v1  ;;  %v6426_v4 = vmul.f32 0.0078125, %v1554_v53 }
 0x1a8   : > { %v1058_v33 = vadd.f32 1e-06, %v994_v21  ;;  %v2502_v42 = vpack.c.bf16 %v2440_v10, %v2439_v29  ;;  %v1315_v2 = vmul.f32 %v6353_v6, %v1247_v52  ;;  %v6424_v54 = vmul.f32 0.0078125, %v1556_v24 }
 0x1a9   : > { %v1384_v56 = vadd.f32 %v6367_v3, %v1316_v31  ;;  %1589 = vadd.xlane.f32.xlu0 %v1501_v37  ;;  %v2249_v62 = vsub.f32 %v6206_v23, %v6390_v28  ;;  %v1995_v16 = vmul.f32 %v6426_v4, %v6426_v4  ;;  %v694_v9 = vmul.f32 %v437_v11, %v437_v11 }
 0x1aa   : > { %5150 = vrsqrt.f32 %v1058_v33  ;;  %1591 = vadd.xlane.f32.xlu1 %v1502_v30  ;;  %2705 = vmatprep.mubr.bf16.mxu0 %v2502_v42  ;;  %v489_v44 = vpop.xlane.xlu0 %488  ;;  %v1383_v45 = vadd.f32 %v6367_v3, %v1315_v2  ;;  %v1996_v13 = vmul.f32 %v6424_v54, %v6424_v54  ;;  %v693_v23 = vmul.f32 %v436_v12, %v436_v12 }
 0x1ab   : > { %5152 = vrsqrt.f32 %v1057_v36  ;;  %v491_v43 = vpop.xlane.xlu1 %490  ;;  %v6435_v0 = vmul.f32 0.0078125, %v489_v44  ;;  %v1186_v17 = vsub.f32 %v6212_v26, %v6397_v40  ;;  %v1185_v10 = vsub.f32 %v6215_v27, %v6399_v41  ;;  %v1504_v44 = vld [vmem:[%s6131_s8 + $0xd8] sm:$0xff] }
 0x1ac   : > { %v1446_v55 = vpack.c.bf16 %v1384_v56, %v1383_v45  ;;  %v6433_v63 = vmul.f32 0.0078125, %v491_v43 }
 0x1ad   : > { %524 = vadd.xlane.f32.xlu0 %v436_v12  ;;  %v931_v21 = vmul.f32 %v6435_v0, %v6435_v0 }
 0x1ae   : > { %526 = vadd.xlane.f32.xlu1 %v437_v11  ;;  %2706 = vmatmul.mubr.bf16.gmra.mrb[4].mxu0 %v1446_v55  ;;  %v1810_v7 = vpop.xlane.xlu0 %1809  ;;  %v932_v20 = vmul.f32 %v6433_v63, %v6433_v63  ;;  %v1503_v55 = vld [vmem:[%s6131_s8 + $0xd0] sm:$0xff] }
 0x1af   : > { %v1812_v5 = vpop.xlane.xlu1 %1811  ;;  %v1931_v22 = vmul.f32 0.0078125, %v1810_v7 }
 0x1b0   : > { %v5147_v8 = vpop.eup %5146  ;;  %v1932_v14 = vmul.f32 0.0078125, %v1812_v5 }
 0x1b1   : > { %v5149_v25 = vpop.eup %5148  ;;  %v2314_v28 = vmul.f32 %v5147_v8, %v2250_v49  ;;  %v2059_v19 = vsub.f32 %v1931_v22, %v1995_v16  ;;  %1845 = vadd.xlane.f32.xlu0 %v1757_v46  ;;  %v439_v8 = vld [vmem:[%s6123_s23 + $0xd8] sm:$0xff] }
 0x1b2   : > { %v2060_v18 = vsub.f32 %v1932_v14, %v1996_v13  ;;  %1847 = vadd.xlane.f32.xlu1 %v1758_v61  ;;  %v2313_v15 = vmul.f32 %v5149_v25, %v2249_v62  ;;  %v746_v52 = vpop.xlane.xlu0 %745  ;;  %v438_v14 = vld [vmem:[%s6123_s23 + $0xd0] sm:$0xff]  ;;  %v1760_v25 = vmul.f32 %v1504_v44, %v1504_v44 }
 0x1b3   : > { %v748_v1 = vpop.xlane.xlu1 %747  ;;  %v2378_v24 = vmul.f32 %v2314_v28, %v6353_v6  ;;  %v2123_v40 = vadd.f32 1e-06, %v2059_v19  ;;  %v867_v30 = vmul.f32 0.0078125, %v746_v52  ;;  %v2251_v28 = vsub.f32 %v6234_v35, %v6426_v4 }
 0x1b4   : > { %v5151_v53 = vpop.eup %5150  ;;  %v2124_v26 = vadd.f32 1e-06, %v2060_v18  ;;  %v868_v29 = vmul.f32 0.0078125, %v748_v1  ;;  %v2377_v27 = vmul.f32 %v2313_v15, %v6353_v6  ;;  %v696_v52 = vmul.f32 %v439_v8, %v439_v8 }
 0x1b5   : > { %v5153_v31 = vpop.eup %5152  ;;  %v2442_v41 = vadd.f32 %v2378_v24, %v6367_v3  ;;  %v1250_v33 = vmul.f32 %v5151_v53, %v1186_v17  ;;  %v995_v37 = vsub.f32 %v867_v30, %v931_v21  ;;  %781 = vadd.xlane.f32.xlu0 %v693_v23  ;;  %v2252_v23 = vsub.f32 %v6231_v34, %v6424_v54 }
 0x1b6   : > { %5154 = vrsqrt.f32 %v2124_v26  ;;  %v996_v36 = vsub.f32 %v868_v29, %v932_v20  ;;  %783 = vadd.xlane.f32.xlu1 %v694_v9  ;;  %v1249_v42 = vmul.f32 %v5153_v31, %v1185_v10  ;;  %v1558_v56 = vpop.xlane.xlu0 %1557  ;;  %v2441_v43 = vadd.f32 %v2377_v27, %v6367_v3 }
 0x1b7   : > { %5156 = vrsqrt.f32 %v2123_v40  ;;  %v1560_v2 = vpop.xlane.xlu1 %1559  ;;  %v1318_v45 = vmul.f32 %v6353_v6, %v1250_v33  ;;  %v1059_v12 = vadd.f32 1e-06, %v995_v37  ;;  %v6462_v16 = vmul.f32 0.0078125, %v1558_v56 }
 0x1b8   : > { %v1060_v11 = vadd.f32 1e-06, %v996_v36  ;;  %v2503_v61 = vpack.c.bf16 %v2442_v41, %v2441_v43  ;;  %v1317_v46 = vmul.f32 %v6353_v6, %v1249_v42  ;;  %v6460_v13 = vmul.f32 0.0078125, %v1560_v2 }
 0x1b9   : > { %v1386_v49 = vadd.f32 %v6367_v3, %v1318_v45  ;;  %1593 = vadd.xlane.f32.xlu0 %v1503_v55  ;;  %v1759_v9 = vmul.f32 %v1503_v55, %v1503_v55  ;;  %v1997_v21 = vmul.f32 %v6462_v16, %v6462_v16  ;;  %v695_v35 = vmul.f32 %v438_v14, %v438_v14 }
 0x1ba   : > { %5158 = vrsqrt.f32 %v1060_v11  ;;  %1595 = vadd.xlane.f32.xlu1 %v1504_v44  ;;  %2713 = vmatprep.mubr.bf16.mxu0 %v2503_v61  ;;  %v493_v5 = vpop.xlane.xlu0 %492  ;;  %v1385_v7 = vadd.f32 %v6367_v3, %v1317_v46  ;;  %v1998_v20 = vmul.f32 %v6460_v13, %v6460_v13  ;;  %v1188_v24 = vsub.f32 %v6240_v38, %v6433_v63  ;;  %v1506_v61 = vld [vmem:[%s6131_s8 + $0xe8] sm:$0xff] }
 0x1bb   : > { %5160 = vrsqrt.f32 %v1059_v12  ;;  %v495_v62 = vpop.xlane.xlu1 %494  ;;  %v6471_v18 = vmul.f32 0.0078125, %v493_v5  ;;  %v1187_v29 = vsub.f32 %v6243_v39, %v6435_v0  ;;  %v1505_v5 = vld [vmem:[%s6131_s8 + $0xe0] sm:$0xff] }
 0x1bc   : > { %v1447_v22 = vpack.c.bf16 %v1386_v49, %v1385_v7  ;;  %v6469_v17 = vmul.f32 0.0078125, %v495_v62 }
 0x1bd   : > { %528 = vadd.xlane.f32.xlu0 %v438_v14  ;;  %v933_v31 = vmul.f32 %v6471_v18, %v6471_v18 }
 0x1be   : > { %530 = vadd.xlane.f32.xlu1 %v439_v8  ;;  %2714 = vmatmul.mubr.bf16.gmra.mrb[8].mxu0 %v1447_v22  ;;  %v1814_v15 = vpop.xlane.xlu0 %1813  ;;  %v934_v30 = vmul.f32 %v6469_v17, %v6469_v17 }
 0x1bf   : > { %v1816_v19 = vpop.xlane.xlu1 %1815  ;;  %v1933_v34 = vmul.f32 0.0078125, %v1814_v15  ;;  %v440_v15 = vld [vmem:[%s6123_s23 + $0xe0] sm:$0xff] }
 0x1c0   : > { %v5155_v10 = vpop.eup %5154  ;;  %v1934_v1 = vmul.f32 0.0078125, %v1816_v19 }
 0x1c1   : > { %v5157_v54 = vpop.eup %5156  ;;  %v2316_v4 = vmul.f32 %v5155_v10, %v2252_v23  ;;  %v2061_v26 = vsub.f32 %v1933_v34, %v1997_v21  ;;  %1849 = vadd.xlane.f32.xlu0 %v1759_v9  ;;  %v441_v23 = vld [vmem:[%s6123_s23 + $0xe8] sm:$0xff]  ;;  %v1761_v21 = vmul.f32 %v1505_v5, %v1505_v5  ;;  %v2253_v34 = vsub.f32 %v6262_v48, %v6462_v16 }
 0x1c2   : > { %v2062_v53 = vsub.f32 %v1934_v1, %v1998_v20  ;;  %1851 = vadd.xlane.f32.xlu1 %v1760_v25  ;;  %v2315_v40 = vmul.f32 %v5157_v54, %v2251_v28  ;;  %v750_v41 = vpop.xlane.xlu0 %749  ;;  %v1762_v20 = vmul.f32 %v1506_v61, %v1506_v61  ;;  %v2254_v1 = vsub.f32 %v6259_v47, %v6460_v13 }
 0x1c3   : > { %v752_v27 = vpop.xlane.xlu1 %751  ;;  %v2380_v33 = vmul.f32 %v2316_v4, %v6353_v6  ;;  %v2125_v63 = vadd.f32 1e-06, %v2061_v26  ;;  %v869_v42 = vmul.f32 0.0078125, %v750_v41  ;;  %v697_v48 = vmul.f32 %v440_v15, %v440_v15 }
 0x1c4   : > { %v5159_v36 = vpop.eup %5158  ;;  %v2126_v38 = vadd.f32 1e-06, %v2062_v53  ;;  %v870_v37 = vmul.f32 0.0078125, %v752_v27  ;;  %v2379_v39 = vmul.f32 %v2315_v40, %v6353_v6 }
 0x1c5   : > { %v5161_v2 = vpop.eup %5160  ;;  %v2444_v0 = vadd.f32 %v2380_v33, %v6367_v3  ;;  %v1252_v56 = vmul.f32 %v5159_v36, %v1188_v24  ;;  %v997_v44 = vsub.f32 %v869_v42, %v933_v31  ;;  %785 = vadd.xlane.f32.xlu0 %v695_v35  ;;  %v1189_v33 = vsub.f32 %v6271_v51, %v6471_v18 }
 0x1c6   : > { %5162 = vrsqrt.f32 %v2126_v38  ;;  %v998_v43 = vsub.f32 %v870_v37, %v934_v30  ;;  %787 = vadd.xlane.f32.xlu1 %v696_v52  ;;  %v1251_v45 = vmul.f32 %v5161_v2, %v1187_v29  ;;  %v1562_v12 = vpop.xlane.xlu0 %1561  ;;  %v2443_v55 = vadd.f32 %v2379_v39, %v6367_v3 }
 0x1c7   : > { %5164 = vrsqrt.f32 %v2125_v63  ;;  %v1564_v11 = vpop.xlane.xlu1 %1563  ;;  %v1320_v46 = vmul.f32 %v6353_v6, %v1252_v56  ;;  %v1061_v62 = vadd.f32 1e-06, %v997_v44  ;;  %v6498_v19 = vmul.f32 0.0078125, %v1562_v12 }
 0x1c8   : > { %v1062_v49 = vadd.f32 1e-06, %v998_v43  ;;  %v2504_v7 = vpack.c.bf16 %v2444_v0, %v2443_v55  ;;  %v1319_v8 = vmul.f32 %v6353_v6, %v1251_v45  ;;  %v6496_v28 = vmul.f32 0.0078125, %v1564_v11 }
 0x1c9   : > { %v1388_v14 = vadd.f32 %v6367_v3, %v1320_v46  ;;  %1597 = vadd.xlane.f32.xlu0 %v1505_v5  ;;  %v1999_v26 = vmul.f32 %v6498_v19, %v6498_v19  ;;  %v698_v29 = vmul.f32 %v441_v23, %v441_v23  ;;  %v1190_v30 = vsub.f32 %v6268_v50, %v6469_v17  ;;  %v1508_v46 = vld [vmem:[%s6131_s8 + $0xf8] sm:$0xff] }
 0x1ca   : > { %5166 = vrsqrt.f32 %v1062_v49  ;;  %1599 = vadd.xlane.f32.xlu1 %v1506_v61  ;;  %2721 = vmatprep.mubr.bf16.mxu0 %v2504_v7  ;;  %v497_v25 = vpop.xlane.xlu0 %496  ;;  %v1387_v9 = vadd.f32 %v6367_v3, %v1319_v8  ;;  %v2000_v53 = vmul.f32 %v6496_v28, %v6496_v28  ;;  %v1507_v7 = vld [vmem:[%s6131_s8 + $0xf0] sm:$0xff] }
 0x1cb   : > { %5168 = vrsqrt.f32 %v1061_v62  ;;  %v499_v22 = vpop.xlane.xlu1 %498  ;;  %v6507_v52 = vmul.f32 0.0078125, %v497_v25 }
 0x1cc   : > { %v1448_v10 = vpack.c.bf16 %v1388_v14, %v1387_v9  ;;  %v6505_v54 = vmul.f32 0.0078125, %v499_v22 }
 0x1cd   : > { %532 = vadd.xlane.f32.xlu0 %v440_v15  ;;  %v935_v38 = vmul.f32 %v6507_v52, %v6507_v52  ;;  %v443_v15 = vld [vmem:[%s6123_s23 + $0xf8] sm:$0xff] }
 0x1ce   : > { %534 = vadd.xlane.f32.xlu1 %v441_v23  ;;  %2722 = vmatmul.mubr.bf16.gmra.mrb[12].mxu0 %v1448_v10  ;;  %v1818_v4 = vpop.xlane.xlu0 %1817  ;;  %v936_v36 = vmul.f32 %v6505_v54, %v6505_v54 }
 0x1cf   : > { %v1820_v35 = vpop.xlane.xlu1 %1819  ;;  %v1935_v47 = vmul.f32 0.0078125, %v1818_v4  ;;  %v2256_v4 = vsub.f32 %v6286_v57, %v6496_v28 }
 0x1d0   : > { %v5163_v24 = vpop.eup %5162  ;;  %v1936_v40 = vmul.f32 0.0078125, %v1820_v35  ;;  %v1763_v35 = vmul.f32 %v1507_v7, %v1507_v7 }
 0x1d1   : > { %v5165_v13 = vpop.eup %5164  ;;  %v2318_v16 = vmul.f32 %v5163_v24, %v2254_v1  ;;  %v2063_v27 = vsub.f32 %v1935_v47, %v1999_v26  ;;  %1853 = vadd.xlane.f32.xlu0 %v1761_v21  ;;  %v442_v21 = vld [vmem:[%s6123_s23 + $0xf0] sm:$0xff]  ;;  %v2255_v24 = vsub.f32 %v6289_v58, %v6498_v19 }
 0x1d2   : > { %v2064_v31 = vsub.f32 %v1936_v40, %v2000_v53  ;;  %1855 = vadd.xlane.f32.xlu1 %v1762_v20  ;;  %v2317_v41 = vmul.f32 %v5165_v13, %v2253_v34  ;;  %v754_v37 = vpop.xlane.xlu0 %753  ;;  %v1764_v34 = vmul.f32 %v1508_v46, %v1508_v46  ;;  %v699_v58 = vmul.f32 %v442_v21, %v442_v21 }
 0x1d3   : > { %v756_v63 = vpop.xlane.xlu1 %755  ;;  %v2382_v42 = vmul.f32 %v2318_v16, %v6353_v6  ;;  %v2127_v17 = vadd.f32 1e-06, %v2063_v27  ;;  %v871_v0 = vmul.f32 0.0078125, %v754_v37 }
 0x1d4   : > { %v5167_v2 = vpop.eup %5166  ;;  %v2128_v50 = vadd.f32 1e-06, %v2064_v31  ;;  %v872_v39 = vmul.f32 0.0078125, %v756_v63  ;;  %v2381_v51 = vmul.f32 %v2317_v41, %v6353_v6  ;;  %v1192_v31 = vsub.f32 %v6294_v59, %v6505_v54 }
 0x1d5   : > { %v5169_v56 = vpop.eup %5168  ;;  %v2446_v18 = vadd.f32 %v2382_v42, %v6367_v3  ;;  %v1254_v43 = vmul.f32 %v5167_v2, %v1190_v30  ;;  %v999_v45 = vsub.f32 %v871_v0, %v935_v38  ;;  %789 = vadd.xlane.f32.xlu0 %v697_v48  ;;  %v700_v30 = vmul.f32 %v443_v15, %v443_v15 }
 0x1d6   : > { %5170 = vrsqrt.f32 %v2128_v50  ;;  %v1000_v44 = vsub.f32 %v872_v39, %v936_v36  ;;  %791 = vadd.xlane.f32.xlu1 %v698_v29  ;;  %v1253_v11 = vmul.f32 %v5169_v56, %v1189_v33  ;;  %v1566_v55 = vpop.xlane.xlu0 %1565  ;;  %v2445_v61 = vadd.f32 %v2381_v51, %v6367_v3 }
 0x1d7   : > { %5172 = vrsqrt.f32 %v2127_v17  ;;  %v1568_v12 = vpop.xlane.xlu1 %1567  ;;  %v1322_v49 = vmul.f32 %v6353_v6, %v1254_v43  ;;  %v1063_v5 = vadd.f32 1e-06, %v999_v45  ;;  %v6534_v20 = vmul.f32 0.0078125, %v1566_v55 }
 0x1d8   : > { %v1064_v62 = vadd.f32 1e-06, %v1000_v44  ;;  %v2505_v8 = vpack.c.bf16 %v2446_v18, %v2445_v61  ;;  %v1321_v14 = vmul.f32 %v6353_v6, %v1253_v11  ;;  %v6532_v10 = vmul.f32 0.0078125, %v1568_v12  ;;  %v1510_v12 = vld [vmem:[%s6131_s8 + $0x108] sm:$0xff] }
 0x1d9   : > { %v1390_v22 = vadd.f32 %v6367_v3, %v1322_v49  ;;  %1601 = vadd.xlane.f32.xlu0 %v1507_v7  ;;  %v2001_v48 = vmul.f32 %v6534_v20, %v6534_v20  ;;  %v1191_v36 = vsub.f32 %v6297_v60, %v6507_v52  ;;  %v1509_v49 = vld [vmem:[%s6131_s8 + $0x100] sm:$0xff] }
 0x1da   : > { %5174 = vrsqrt.f32 %v1064_v62  ;;  %1603 = vadd.xlane.f32.xlu1 %v1508_v46  ;;  %2729 = vmatprep.mubr.bf16.mxu0 %v2505_v8  ;;  %v501_v9 = vpop.xlane.xlu0 %500  ;;  %v1389_v23 = vadd.f32 %v6367_v3, %v1321_v14  ;;  %v2002_v29 = vmul.f32 %v6532_v10, %v6532_v10 }
 0x1db   : > { %5176 = vrsqrt.f32 %v1063_v5  ;;  %v503_v25 = vpop.xlane.xlu1 %502  ;;  %v6543_v26 = vmul.f32 0.0078125, %v501_v9 }
 0x1dc   : > { %v1449_v1 = vpack.c.bf16 %v1390_v22, %v1389_v23  ;;  %v6541_v53 = vmul.f32 0.0078125, %v503_v25  ;;  %v445_v25 = vld [vmem:[%s6123_s23 + $0x108] sm:$0xff] }
 0x1dd   : > { %536 = vadd.xlane.f32.xlu0 %v442_v21  ;;  %v937_v63 = vmul.f32 %v6543_v26, %v6543_v26 }
 0x1de   : > { %538 = vadd.xlane.f32.xlu1 %v443_v15  ;;  %2730 = vmatmul.mubr.bf16.gmra.mrb[16].mxu0 %v1449_v1  ;;  %v1822_v47 = vpop.xlane.xlu0 %1821  ;;  %v938_v38 = vmul.f32 %v6541_v53, %v6541_v53  ;;  %v444_v15 = vld [vmem:[%s6123_s23 + $0x100] sm:$0xff]  ;;  %v1766_v1 = vmul.f32 %v1510_v12, %v1510_v12 }
 0x1df   : > { %v1824_v40 = vpop.xlane.xlu1 %1823  ;;  %v1937_v57 = vmul.f32 0.0078125, %v1822_v47 }
 0x1e0   : > { %v5171_v13 = vpop.eup %5170  ;;  %v1938_v16 = vmul.f32 0.0078125, %v1824_v40 }
 0x1e1   : > { %v5173_v28 = vpop.eup %5172  ;;  %v2320_v19 = vmul.f32 %v5171_v13, %v2256_v4  ;;  %v2065_v41 = vsub.f32 %v1937_v57, %v2001_v48  ;;  %1857 = vadd.xlane.f32.xlu0 %v1763_v35  ;;  %v5386_v35 = vld [vmem:[%s6131_s8 + $0x68] sm:$0xff] }
 0x1e2   : > { %v2066_v27 = vsub.f32 %v1938_v16, %v2002_v29  ;;  %1859 = vadd.xlane.f32.xlu1 %v1764_v34  ;;  %v2319_v33 = vmul.f32 %v5173_v28, %v2255_v24  ;;  %v758_v42 = vpop.xlane.xlu0 %757  ;;  %v1765_v34 = vmul.f32 %v1509_v49, %v1509_v49  ;;  %v2258_v4 = vsub.f32 %v5386_v35, %v6532_v10  ;;  %v5387_v24 = vld [vmem:[%s6131_s8 + $0x60] sm:$0xff] }
 0x1e3   : > { %v760_v37 = vpop.xlane.xlu1 %759  ;;  %v2384_v2 = vmul.f32 %v2320_v19, %v6353_v6  ;;  %v2129_v54 = vadd.f32 1e-06, %v2065_v41  ;;  %v873_v39 = vmul.f32 0.0078125, %v758_v42  ;;  %v2257_v40 = vsub.f32 %v5387_v24, %v6534_v20 }
 0x1e4   : > { %v5175_v50 = vpop.eup %5174  ;;  %v2130_v59 = vadd.f32 1e-06, %v2066_v27  ;;  %v874_v17 = vmul.f32 0.0078125, %v760_v37  ;;  %v2383_v60 = vmul.f32 %v2319_v33, %v6353_v6  ;;  %v701_v19 = vmul.f32 %v444_v15, %v444_v15  ;;  %v5388_v27 = vld [vmem:[%s6123_s23 + $0x68] sm:$0xff] }
 0x1e5   : > { %v5177_v0 = vpop.eup %5176  ;;  %v2448_v52 = vadd.f32 %v2384_v2, %v6367_v3  ;;  %v1256_v56 = vmul.f32 %v5175_v50, %v1192_v31  ;;  %v1001_v18 = vsub.f32 %v873_v39, %v937_v63  ;;  %793 = vadd.xlane.f32.xlu0 %v699_v58  ;;  %v702_v58 = vmul.f32 %v445_v25, %v445_v25  ;;  %v5389_v63 = vld [vmem:[%s6123_s23 + $0x60] sm:$0xff] }
 0x1e6   : > { %5178 = vrsqrt.f32 %v2130_v59  ;;  %v1002_v51 = vsub.f32 %v874_v17, %v938_v38  ;;  %795 = vadd.xlane.f32.xlu1 %v700_v30  ;;  %v1255_v43 = vmul.f32 %v5177_v0, %v1191_v36  ;;  %v1570_v45 = vpop.xlane.xlu0 %1569  ;;  %v2447_v11 = vadd.f32 %v2383_v60, %v6367_v3 }
 0x1e7   : > { %5180 = vrsqrt.f32 %v2129_v54  ;;  %v1572_v44 = vpop.xlane.xlu1 %1571  ;;  %v1324_v55 = vmul.f32 %v6353_v6, %v1256_v56  ;;  %v1065_v46 = vadd.f32 1e-06, %v1001_v18  ;;  %v6570_v23 = vmul.f32 0.0078125, %v1570_v45 }
 0x1e8   : > { %v1066_v61 = vadd.f32 1e-06, %v1002_v51  ;;  %v2506_v62 = vpack.c.bf16 %v2448_v52, %v2447_v11  ;;  %v1323_v5 = vmul.f32 %v6353_v6, %v1255_v43  ;;  %v6568_v9 = vmul.f32 0.0078125, %v1572_v44 }
 0x1e9   : > { %v1392_v7 = vadd.f32 %v6367_v3, %v1324_v55  ;;  %1605 = vadd.xlane.f32.xlu0 %v1509_v49  ;;  %v2003_v10 = vmul.f32 %v6570_v23, %v6570_v23  ;;  %v1194_v41 = vsub.f32 %v5388_v27, %v6541_v53  ;;  %v1193_v37 = vsub.f32 %v5389_v63, %v6543_v26  ;;  %v1512_v55 = vld [vmem:[%s6131_s8 + $0x118] sm:$0xff] }
 0x1ea   : > { %5182 = vrsqrt.f32 %v1066_v61  ;;  %1607 = vadd.xlane.f32.xlu1 %v1510_v12  ;;  %2737 = vmatprep.mubr.bf16.mxu0 %v2506_v62  ;;  %v505_v14 = vpop.xlane.xlu0 %504  ;;  %v1391_v22 = vadd.f32 %v6367_v3, %v1323_v5  ;;  %v2004_v57 = vmul.f32 %v6568_v9, %v6568_v9  ;;  %v1511_v62 = vld [vmem:[%s6131_s8 + $0x110] sm:$0xff] }
 0x1eb   : > { %5184 = vrsqrt.f32 %v1065_v46  ;;  %v507_v8 = vpop.xlane.xlu1 %506  ;;  %v6579_v13 = vmul.f32 0.0078125, %v505_v14  ;;  %v1767_v24 = vmul.f32 %v1511_v62, %v1511_v62 }
 0x1ec   : > { %v1450_v21 = vpack.c.bf16 %v1392_v7, %v1391_v22  ;;  %v6577_v47 = vmul.f32 0.0078125, %v507_v8 }
 0x1ed   : > { %540 = vadd.xlane.f32.xlu0 %v444_v15  ;;  %v939_v2 = vmul.f32 %v6579_v13, %v6579_v13  ;;  %v447_v15 = vld [vmem:[%s6123_s23 + $0x118] sm:$0xff] }
 0x1ee   : > { %542 = vadd.xlane.f32.xlu1 %v445_v25  ;;  %2738 = vmatmul.mubr.bf16.gmra.mrb[20].mxu0 %v1450_v21  ;;  %v1826_v48 = vpop.xlane.xlu0 %1825  ;;  %v940_v42 = vmul.f32 %v6577_v47, %v6577_v47  ;;  %v704_v27 = vmul.f32 %v447_v15, %v447_v15 }
 0x1ef   : > { %v1828_v29 = vpop.xlane.xlu1 %1827  ;;  %v1939_v30 = vmul.f32 0.0078125, %v1826_v48  ;;  %v5391_v48 = vld [vmem:[%s6131_s8 + $0x70] sm:$0xff] }
 0x1f0   : > { %v5179_v16 = vpop.eup %5178  ;;  %v1940_v28 = vmul.f32 0.0078125, %v1828_v29 }
 0x1f1   : > { %v5181_v20 = vpop.eup %5180  ;;  %v2322_v31 = vmul.f32 %v5179_v16, %v2258_v4  ;;  %v2067_v36 = vsub.f32 %v1939_v30, %v2003_v10  ;;  %1861 = vadd.xlane.f32.xlu0 %v1765_v34  ;;  %v446_v34 = vld [vmem:[%s6123_s23 + $0x110] sm:$0xff]  ;;  %v1768_v4 = vmul.f32 %v1512_v55, %v1512_v55  ;;  %v2259_v16 = vsub.f32 %v5391_v48, %v6570_v23  ;;  %v5394_v48 = vld [vmem:[%s6131_s8 + $0x88] sm:$0xff] }
 0x1f2   : > { %v2068_v33 = vsub.f32 %v1940_v28, %v2004_v57  ;;  %1863 = vadd.xlane.f32.xlu1 %v1766_v1  ;;  %v2321_v38 = vmul.f32 %v5181_v20, %v2257_v40  ;;  %v762_v59 = vpop.xlane.xlu0 %761  ;;  %v5390_v40 = vld [vmem:[%s6131_s8 + $0x78] sm:$0xff] }
 0x1f3   : > { %v764_v50 = vpop.xlane.xlu1 %763  ;;  %v2386_v54 = vmul.f32 %v2322_v31, %v6353_v6  ;;  %v2131_v39 = vadd.f32 1e-06, %v2067_v36  ;;  %v875_v60 = vmul.f32 0.0078125, %v762_v59  ;;  %v2260_v29 = vsub.f32 %v5390_v40, %v6568_v9  ;;  %v5392_v36 = vld [vmem:[%s6123_s23 + $0x78] sm:$0xff] }
 0x1f4   : > { %v5183_v17 = vpop.eup %5182  ;;  %v2132_v53 = vadd.f32 1e-06, %v2068_v33  ;;  %v876_v0 = vmul.f32 0.0078125, %v764_v50  ;;  %v2385_v26 = vmul.f32 %v2321_v38, %v6353_v6  ;;  %v1196_v38 = vsub.f32 %v5392_v36, %v6577_v47 }
 0x1f5   : > { %v5185_v52 = vpop.eup %5184  ;;  %v2450_v56 = vadd.f32 %v2386_v54, %v6367_v3  ;;  %v1258_v51 = vmul.f32 %v5183_v17, %v1194_v41  ;;  %v1003_v43 = vsub.f32 %v875_v60, %v939_v2  ;;  %797 = vadd.xlane.f32.xlu0 %v701_v19  ;;  %v703_v41 = vmul.f32 %v446_v34, %v446_v34  ;;  %v5393_v2 = vld [vmem:[%s6123_s23 + $0x70] sm:$0xff] }
 0x1f6   : > { %5186 = vrsqrt.f32 %v2132_v53  ;;  %v1004_v18 = vsub.f32 %v876_v0, %v940_v42  ;;  %799 = vadd.xlane.f32.xlu1 %v702_v58  ;;  %v1257_v44 = vmul.f32 %v5185_v52, %v1193_v37  ;;  %v1574_v11 = vpop.xlane.xlu0 %1573  ;;  %v2449_v12 = vadd.f32 %v2385_v26, %v6367_v3 }
 0x1f7   : > { %5188 = vrsqrt.f32 %v2131_v39  ;;  %v1576_v45 = vpop.xlane.xlu1 %1575  ;;  %v1326_v61 = vmul.f32 %v6353_v6, %v1258_v51  ;;  %v1067_v49 = vadd.f32 1e-06, %v1003_v43  ;;  %v6606_v1 = vmul.f32 0.0078125, %v1574_v11 }
 0x1f8   : > { %v1068_v46 = vadd.f32 1e-06, %v1004_v18  ;;  %v2507_v5 = vpack.c.bf16 %v2450_v56, %v2449_v12  ;;  %v1325_v7 = vmul.f32 %v6353_v6, %v1257_v44  ;;  %v6604_v21 = vmul.f32 0.0078125, %v1576_v45 }
 0x1f9   : > { %v1394_v8 = vadd.f32 %v6367_v3, %v1326_v61  ;;  %1609 = vadd.xlane.f32.xlu0 %v1511_v62  ;;  %v2005_v9 = vmul.f32 %v6606_v1, %v6606_v1  ;;  %v1195_v50 = vsub.f32 %v5393_v2, %v6579_v13 }
 0x1fa   : > { %5190 = vrsqrt.f32 %v1068_v46  ;;  %1611 = vadd.xlane.f32.xlu1 %v1512_v55  ;;  %2745 = vmatprep.mubr.bf16.mxu0 %v2507_v5  ;;  %v509_v22 = vpop.xlane.xlu0 %508  ;;  %v1393_v25 = vadd.f32 %v6367_v3, %v1325_v7  ;;  %v2006_v58 = vmul.f32 %v6604_v21, %v6604_v21  ;;  %v1514_v55 = vld [vmem:[%s6131_s8 + $0x128] sm:$0xff]  ;;  %v1513_v5 = vld [vmem:[%s6131_s8 + $0x120] sm:$0xff] }
 0x1fb   : > { %5192 = vrsqrt.f32 %v1067_v49  ;;  %v511_v14 = vpop.xlane.xlu1 %510  ;;  %v6615_v10 = vmul.f32 0.0078125, %v509_v22 }
 0x1fc   : > { %v1451_v35 = vpack.c.bf16 %v1394_v8, %v1393_v25  ;;  %v6613_v57 = vmul.f32 0.0078125, %v511_v14 }
 0x1fd   : > { %544 = vadd.xlane.f32.xlu0 %v446_v34  ;;  %v941_v54 = vmul.f32 %v6615_v10, %v6615_v10 }
 0x1fe   : > { %546 = vadd.xlane.f32.xlu1 %v447_v15  ;;  %2746 = vmatmul.mubr.bf16.gmra.mrb[24].mxu0 %v1451_v35  ;;  %v1830_v30 = vpop.xlane.xlu0 %1829  ;;  %v942_v59 = vmul.f32 %v6613_v57, %v6613_v57  ;;  %v449_v15 = vld [vmem:[%s6123_s23 + $0x128] sm:$0xff] }
 0x1ff   : > { %v1832_v28 = vpop.xlane.xlu1 %1831  ;;  %v1941_v31 = vmul.f32 0.0078125, %v1830_v30 }
 0x200   : > { %v5187_v20 = vpop.eup %5186  ;;  %v1942_v19 = vmul.f32 0.0078125, %v1832_v28 }
 0x201   : > { %v5189_v23 = vpop.eup %5188  ;;  %v2324_v33 = vmul.f32 %v5187_v20, %v2260_v29  ;;  %v2069_v37 = vsub.f32 %v1941_v31, %v2005_v9  ;;  %1865 = vadd.xlane.f32.xlu0 %v1767_v24  ;;  %v448_v24 = vld [vmem:[%s6123_s23 + $0x120] sm:$0xff]  ;;  %v1770_v29 = vmul.f32 %v1514_v55, %v1514_v55  ;;  %v1769_v20 = vmul.f32 %v1513_v5, %v1513_v5 }
 0x202   : > { %v2070_v63 = vsub.f32 %v1942_v19, %v2006_v58  ;;  %1867 = vadd.xlane.f32.xlu1 %v1768_v4  ;;  %v2323_v42 = vmul.f32 %v5189_v23, %v2259_v16  ;;  %v766_v53 = vpop.xlane.xlu0 %765  ;;  %v2262_v16 = vsub.f32 %v5394_v48, %v6604_v21  ;;  %v5395_v9 = vld [vmem:[%s6131_s8 + $0x80] sm:$0xff]  ;;  %v450_v48 = vld [vmem:[%s6123_s23 + $0x130] sm:$0xff] }
 0x203   : > { %v768_v17 = vpop.xlane.xlu1 %767  ;;  %v2388_v39 = vmul.f32 %v2324_v33, %v6353_v6  ;;  %v2133_v60 = vadd.f32 1e-06, %v2069_v37  ;;  %v877_v26 = vmul.f32 0.0078125, %v766_v53  ;;  %v2261_v19 = vsub.f32 %v5395_v9, %v6606_v1  ;;  %v5396_v37 = vld [vmem:[%s6123_s23 + $0x88] sm:$0xff] }
 0x204   : > { %v5191_v0 = vpop.eup %5190  ;;  %v2134_v47 = vadd.f32 1e-06, %v2070_v63  ;;  %v878_v52 = vmul.f32 0.0078125, %v768_v17  ;;  %v2387_v13 = vmul.f32 %v2323_v42, %v6353_v6  ;;  %v1198_v42 = vsub.f32 %v5396_v37, %v6613_v57 }
 0x205   : > { %v5193_v56 = vpop.eup %5192  ;;  %v2452_v51 = vadd.f32 %v2388_v39, %v6367_v3  ;;  %v1260_v18 = vmul.f32 %v5191_v0, %v1196_v38  ;;  %v1005_v44 = vsub.f32 %v877_v26, %v941_v54  ;;  %801 = vadd.xlane.f32.xlu0 %v703_v41  ;;  %v706_v38 = vmul.f32 %v449_v15, %v449_v15 }
 0x206   : > { %5194 = vrsqrt.f32 %v2134_v47  ;;  %v1006_v43 = vsub.f32 %v878_v52, %v942_v59  ;;  %803 = vadd.xlane.f32.xlu1 %v704_v27  ;;  %v1259_v45 = vmul.f32 %v5193_v56, %v1195_v50  ;;  %v2451_v12 = vadd.f32 %v2387_v13, %v6367_v3  ;;  %v1578_v62 = vpop.xlane.xlu0 %1577  ;;  %v5397_v59 = vld [vmem:[%s6123_s23 + $0x80] sm:$0xff] }
 0x207   : > { %5196 = vrsqrt.f32 %v2133_v60  ;;  %v1580_v11 = vpop.xlane.xlu1 %1579  ;;  %v1328_v61 = vmul.f32 %v6353_v6, %v1260_v18  ;;  %v1069_v49 = vadd.f32 1e-06, %v1005_v44  ;;  %v6643_v40 = vmul.f32 0.0078125, %v1578_v62 }
 0x208   : > { %v1070_v46 = vadd.f32 1e-06, %v1006_v43  ;;  %v1327_v7 = vmul.f32 %v6353_v6, %v1259_v45  ;;  %v2508_v8 = vpack.c.bf16 %v2452_v51, %v2451_v12  ;;  %v6640_v34 = vmul.f32 0.0078125, %v1580_v11 }
 0x209   : > { %v1396_v14 = vadd.f32 %v6367_v3, %v1328_v61  ;;  %1613 = vadd.xlane.f32.xlu0 %v1513_v5  ;;  %v2007_v21 = vmul.f32 %v6643_v40, %v6643_v40  ;;  %v705_v1 = vmul.f32 %v448_v24, %v448_v24  ;;  %v1197_v54 = vsub.f32 %v5397_v59, %v6615_v10  ;;  %v1516_v61 = vld [vmem:[%s6131_s8 + $0x138] sm:$0xff] }
 0x20a   : > { %5198 = vrsqrt.f32 %v1070_v46  ;;  %1615 = vadd.xlane.f32.xlu1 %v1514_v55  ;;  %v1395_v22 = vadd.f32 %v6367_v3, %v1327_v7  ;;  %2753 = vmatprep.mubr.bf16.mxu0 %v2508_v8  ;;  %v513_v35 = vpop.xlane.xlu0 %512  ;;  %v2008_v31 = vmul.f32 %v6640_v34, %v6640_v34  ;;  %v1515_v7 = vld [vmem:[%s6131_s8 + $0x130] sm:$0xff] }
 0x20b   : > { %5200 = vrsqrt.f32 %v1069_v49  ;;  %v515_v25 = vpop.xlane.xlu1 %514  ;;  %v6653_v23 = vmul.f32 0.0078125, %v513_v35  ;;  %v451_v35 = vld [vmem:[%s6123_s23 + $0x138] sm:$0xff] }
 0x20c   : > { %v1452_v4 = vpack.c.bf16 %v1396_v14, %v1395_v22  ;;  %v6647_v28 = vmul.f32 0.0078125, %v515_v25 }
 0x20d   : > { %548 = vadd.xlane.f32.xlu0 %v448_v24  ;;  %v943_v60 = vmul.f32 %v6653_v23, %v6653_v23 }
 0x20e   : > { %2754 = vmatmul.mubr.bf16.gmra.mrb[28].mxu0 %v1452_v4  ;;  %550 = vadd.xlane.f32.xlu1 %v449_v15  ;;  %v1834_v41 = vpop.xlane.xlu0 %1833  ;;  %v944_v17 = vmul.f32 %v6647_v28, %v6647_v28 }
 0x20f   : > { %v1836_v30 = vpop.xlane.xlu1 %1835  ;;  %v1943_v36 = vmul.f32 0.0078125, %v1834_v41  ;;  %v5399_v41 = vld [vmem:[%s6131_s8 + $0x90] sm:$0xff] }
 0x210   : > { %v5195_v58 = vpop.eup %5194  ;;  %v1944_v27 = vmul.f32 0.0078125, %v1836_v30  ;;  %v1772_v30 = vmul.f32 %v1516_v61, %v1516_v61 }
 0x211   : > { %v5197_v33 = vpop.eup %5196  ;;  %v2326_v63 = vmul.f32 %v5195_v58, %v2262_v16  ;;  %v2071_v53 = vsub.f32 %v1943_v36, %v2007_v21  ;;  %1869 = vadd.xlane.f32.xlu0 %v1769_v20  ;;  %v5398_v20 = vld [vmem:[%s6131_s8 + $0x98] sm:$0xff] }
 0x212   : > { %v2072_v2 = vsub.f32 %v1944_v27, %v2008_v31  ;;  %1871 = vadd.xlane.f32.xlu1 %v1770_v29  ;;  %v2325_v50 = vmul.f32 %v5197_v33, %v2261_v19  ;;  %v770_v26 = vpop.xlane.xlu0 %769  ;;  %v2264_v58 = vsub.f32 %v5398_v20, %v6640_v34  ;;  %v1771_v31 = vmul.f32 %v1515_v7, %v1515_v7  ;;  %v452_v20 = vld [vmem:[%s6123_s23 + $0x140] sm:$0xff] }
 0x213   : > { %v772_v39 = vpop.xlane.xlu1 %771  ;;  %v2390_v0 = vmul.f32 %v2326_v63, %v6353_v6  ;;  %v2135_v10 = vadd.f32 1e-06, %v2071_v53  ;;  %v879_v51 = vmul.f32 0.0078125, %v770_v26  ;;  %v2263_v33 = vsub.f32 %v5399_v41, %v6643_v40  ;;  %v5401_v53 = vld [vmem:[%s6123_s23 + $0x90] sm:$0xff] }
 0x214   : > { %v5199_v47 = vpop.eup %5198  ;;  %v2136_v57 = vadd.f32 1e-06, %v2072_v2  ;;  %v880_v52 = vmul.f32 0.0078125, %v772_v39  ;;  %v2389_v56 = vmul.f32 %v2325_v50, %v6353_v6  ;;  %v708_v2 = vmul.f32 %v451_v35, %v451_v35  ;;  %v5400_v50 = vld [vmem:[%s6123_s23 + $0x98] sm:$0xff] }
 0x215   : > { %v5201_v13 = vpop.eup %5200  ;;  %v2454_v18 = vadd.f32 %v2390_v0, %v6367_v3  ;;  %v1262_v43 = vmul.f32 %v5199_v47, %v1198_v42  ;;  %v1007_v12 = vsub.f32 %v879_v51, %v943_v60  ;;  %805 = vadd.xlane.f32.xlu0 %v705_v1  ;;  %v1200_v59 = vsub.f32 %v5400_v50, %v6647_v28 }
 0x216   : > { %5202 = vrsqrt.f32 %v2136_v57  ;;  %v1008_v44 = vsub.f32 %v880_v52, %v944_v17  ;;  %807 = vadd.xlane.f32.xlu1 %v706_v38  ;;  %v2453_v45 = vadd.f32 %v2389_v56, %v6367_v3  ;;  %v1261_v11 = vmul.f32 %v5201_v13, %v1197_v54  ;;  %v1582_v62 = vpop.xlane.xlu0 %1581 }
 0x217   : > { %5204 = vrsqrt.f32 %v2135_v10  ;;  %v1584_v55 = vpop.xlane.xlu1 %1583  ;;  %v1330_v46 = vmul.f32 %v6353_v6, %v1262_v43  ;;  %v1071_v14 = vadd.f32 1e-06, %v1007_v12  ;;  %v6679_v16 = vmul.f32 0.0078125, %v1582_v62 }
 0x218   : > { %v1072_v49 = vadd.f32 1e-06, %v1008_v44  ;;  %v2509_v5 = vpack.c.bf16 %v2454_v18, %v2453_v45  ;;  %v1329_v8 = vmul.f32 %v6353_v6, %v1261_v11  ;;  %v6676_v4 = vmul.f32 0.0078125, %v1584_v55 }
 0x219   : > { %v1398_v22 = vadd.f32 %v6367_v3, %v1330_v46  ;;  %1617 = vadd.xlane.f32.xlu0 %v1515_v7  ;;  %v2009_v34 = vmul.f32 %v6679_v16, %v6679_v16  ;;  %v707_v40 = vmul.f32 %v450_v48, %v450_v48  ;;  %v1199_v39 = vsub.f32 %v5401_v53, %v6653_v23  ;;  %v1518_v46 = vld [vmem:[%s6131_s8 + $0x148] sm:$0xff] }
 0x21a   : > { %5206 = vrsqrt.f32 %v1072_v49  ;;  %2761 = vmatprep.mubr.bf16.mxu0 %v2509_v5  ;;  %1619 = vadd.xlane.f32.xlu1 %v1516_v61  ;;  %v1397_v25 = vadd.f32 %v6367_v3, %v1329_v8  ;;  %v517_v24 = vpop.xlane.xlu0 %516  ;;  %v2010_v21 = vmul.f32 %v6676_v4, %v6676_v4  ;;  %v1517_v8 = vld [vmem:[%s6131_s8 + $0x140] sm:$0xff] }
 0x21b   : > { %5208 = vrsqrt.f32 %v1071_v14  ;;  %v519_v15 = vpop.xlane.xlu1 %518  ;;  %v6689_v36 = vmul.f32 0.0078125, %v517_v24  ;;  %v453_v24 = vld [vmem:[%s6123_s23 + $0x148] sm:$0xff] }
 0x21c   : > { %v1453_v29 = vpack.c.bf16 %v1398_v22, %v1397_v25  ;;  %v6683_v9 = vmul.f32 0.0078125, %v519_v15 }
 0x21d   : > { %552 = vadd.xlane.f32.xlu0 %v450_v48  ;;  %v945_v26 = vmul.f32 %v6689_v36, %v6689_v36 }
 0x21e   : > { %2762 = vmatmul.mubr.bf16.gmra.mrb[32].mxu0 %v1453_v29  ;;  %554 = vadd.xlane.f32.xlu1 %v451_v35  ;;  %v1838_v63 = vpop.xlane.xlu0 %1837  ;;  %v946_v0 = vmul.f32 %v6683_v9, %v6683_v9 }
 0x21f   : > { %v1840_v19 = vpop.xlane.xlu1 %1839  ;;  %v1945_v42 = vmul.f32 0.0078125, %v1838_v63  ;;  %v5403_v63 = vld [vmem:[%s6131_s8 + $0xa0] sm:$0xff] }
 0x220   : > { %v5203_v27 = vpop.eup %5202  ;;  %v1946_v38 = vmul.f32 0.0078125, %v1840_v19  ;;  %v1774_v19 = vmul.f32 %v1518_v46, %v1518_v46 }
 0x221   : > { %v5205_v37 = vpop.eup %5204  ;;  %v2328_v1 = vmul.f32 %v5203_v27, %v2264_v58  ;;  %v2073_v47 = vsub.f32 %v1945_v42, %v2009_v34  ;;  %1873 = vadd.xlane.f32.xlu0 %v1771_v31  ;;  %v5402_v31 = vld [vmem:[%s6131_s8 + $0xa8] sm:$0xff] }
 0x222   : > { %v2074_v54 = vsub.f32 %v1946_v38, %v2010_v21  ;;  %1875 = vadd.xlane.f32.xlu1 %v1772_v30  ;;  %v2327_v17 = vmul.f32 %v5205_v37, %v2263_v33  ;;  %v774_v13 = vpop.xlane.xlu0 %773  ;;  %v2266_v27 = vsub.f32 %v5402_v31, %v6676_v4  ;;  %v1773_v21 = vmul.f32 %v1517_v8, %v1517_v8  ;;  %v454_v31 = vld [vmem:[%s6123_s23 + $0x150] sm:$0xff] }
 0x223   : > { %v776_v60 = vpop.xlane.xlu1 %775  ;;  %v2392_v57 = vmul.f32 %v2328_v1, %v6353_v6  ;;  %v2137_v23 = vadd.f32 1e-06, %v2073_v47  ;;  %v881_v18 = vmul.f32 0.0078125, %v774_v13  ;;  %v2265_v37 = vsub.f32 %v5403_v63, %v6679_v16  ;;  %v5405_v47 = vld [vmem:[%s6123_s23 + $0xa0] sm:$0xff] }
 0x224   : > { %v5207_v52 = vpop.eup %5206  ;;  %v2138_v28 = vadd.f32 1e-06, %v2074_v54  ;;  %v882_v56 = vmul.f32 0.0078125, %v776_v60  ;;  %v2391_v10 = vmul.f32 %v2327_v17, %v6353_v6  ;;  %v710_v54 = vmul.f32 %v453_v24, %v453_v24  ;;  %v5404_v17 = vld [vmem:[%s6123_s23 + $0xa8] sm:$0xff] }
 0x225   : > { %v5209_v51 = vpop.eup %5208  ;;  %v2456_v43 = vadd.f32 %v2392_v57, %v6367_v3  ;;  %v1264_v44 = vmul.f32 %v5207_v52, %v1200_v59  ;;  %v1009_v55 = vsub.f32 %v881_v18, %v945_v26  ;;  %809 = vadd.xlane.f32.xlu0 %v707_v40  ;;  %v1202_v53 = vsub.f32 %v5404_v17, %v6683_v9 }
 0x226   : > { %5210 = vrsqrt.f32 %v2138_v28  ;;  %v1010_v45 = vsub.f32 %v882_v56, %v946_v0  ;;  %811 = vadd.xlane.f32.xlu1 %v708_v2  ;;  %v2455_v11 = vadd.f32 %v2391_v10, %v6367_v3  ;;  %v1263_v12 = vmul.f32 %v5209_v51, %v1199_v39  ;;  %v1586_v5 = vpop.xlane.xlu0 %1585 }
 0x227   : > { %5212 = vrsqrt.f32 %v2137_v23  ;;  %v1588_v61 = vpop.xlane.xlu1 %1587  ;;  %v1332_v49 = vmul.f32 %v6353_v6, %v1264_v44  ;;  %v1073_v22 = vadd.f32 1e-06, %v1009_v55  ;;  %v6715_v58 = vmul.f32 0.0078125, %v1586_v5 }
 0x228   : > { %v1074_v62 = vadd.f32 1e-06, %v1010_v45  ;;  %v2510_v7 = vpack.c.bf16 %v2456_v43, %v2455_v11  ;;  %v1331_v14 = vmul.f32 %v6353_v6, %v1263_v12  ;;  %v6712_v29 = vmul.f32 0.0078125, %v1588_v61 }
 0x229   : > { %v1400_v25 = vadd.f32 %v6367_v3, %v1332_v49  ;;  %1621 = vadd.xlane.f32.xlu0 %v1517_v8  ;;  %v2011_v4 = vmul.f32 %v6715_v58, %v6715_v58  ;;  %v709_v16 = vmul.f32 %v452_v20, %v452_v20  ;;  %v1201_v60 = vsub.f32 %v5405_v47, %v6689_v36  ;;  %v1520_v49 = vld [vmem:[%s6131_s8 + $0x158] sm:$0xff] }
 0x22a   : > { %5214 = vrsqrt.f32 %v1074_v62  ;;  %2769 = vmatprep.mubr.bf16.mxu0 %v2510_v7  ;;  %1623 = vadd.xlane.f32.xlu1 %v1518_v46  ;;  %v1399_v15 = vadd.f32 %v6367_v3, %v1331_v14  ;;  %v521_v48 = vpop.xlane.xlu0 %520  ;;  %v2012_v34 = vmul.f32 %v6712_v29, %v6712_v29  ;;  %v1519_v14 = vld [vmem:[%s6131_s8 + $0x150] sm:$0xff] }
 0x22b   : > { %5216 = vrsqrt.f32 %v1073_v22  ;;  %v523_v35 = vpop.xlane.xlu1 %522  ;;  %v6725_v42 = vmul.f32 0.0078125, %v521_v48  ;;  %v455_v48 = vld [vmem:[%s6123_s23 + $0x158] sm:$0xff] }
 0x22c   : > { %v1454_v30 = vpack.c.bf16 %v1400_v25, %v1399_v15  ;;  %v6719_v41 = vmul.f32 0.0078125, %v523_v35 }
 0x22d   : > { %556 = vadd.xlane.f32.xlu0 %v452_v20  ;;  %v947_v13 = vmul.f32 %v6725_v42, %v6725_v42 }
 0x22e   : > { %2770 = vmatmul.mubr.bf16.gmra.mrb[36].mxu0 %v1454_v30  ;;  %558 = vadd.xlane.f32.xlu1 %v453_v24  ;;  %v1842_v1 = vpop.xlane.xlu0 %1841  ;;  %v948_v57 = vmul.f32 %v6719_v41, %v6719_v41 }
 0x22f   : > { %v1844_v33 = vpop.xlane.xlu1 %1843  ;;  %v1947_v59 = vmul.f32 0.0078125, %v1842_v1  ;;  %v5407_v1 = vld [vmem:[%s6131_s8 + $0xb0] sm:$0xff] }
 0x230   : > { %v5211_v38 = vpop.eup %5210  ;;  %v1948_v2 = vmul.f32 0.0078125, %v1844_v33  ;;  %v1776_v33 = vmul.f32 %v1520_v49, %v1520_v49 }
 0x231   : > { %v5213_v50 = vpop.eup %5212  ;;  %v2330_v40 = vmul.f32 %v5211_v38, %v2266_v27  ;;  %v2075_v52 = vsub.f32 %v1947_v59, %v2011_v4  ;;  %1877 = vadd.xlane.f32.xlu0 %v1773_v21  ;;  %v5406_v21 = vld [vmem:[%s6131_s8 + $0xb8] sm:$0xff] }
 0x232   : > { %v2076_v39 = vsub.f32 %v1948_v2, %v2012_v34  ;;  %1879 = vadd.xlane.f32.xlu1 %v1774_v19  ;;  %v2329_v0 = vmul.f32 %v5213_v50, %v2265_v37  ;;  %v778_v51 = vpop.xlane.xlu0 %777  ;;  %v2268_v38 = vsub.f32 %v5406_v21, %v6712_v29  ;;  %v1775_v34 = vmul.f32 %v1519_v14, %v1519_v14  ;;  %v456_v21 = vld [vmem:[%s6123_s23 + $0x160] sm:$0xff] }
 0x233   : > { %v780_v26 = vpop.xlane.xlu1 %779  ;;  %v2394_v28 = vmul.f32 %v2330_v40, %v6353_v6  ;;  %v2139_v36 = vadd.f32 1e-06, %v2075_v52  ;;  %v883_v43 = vmul.f32 0.0078125, %v778_v51  ;;  %v2267_v50 = vsub.f32 %v5407_v1, %v6715_v58  ;;  %v5409_v52 = vld [vmem:[%s6123_s23 + $0xb0] sm:$0xff] }
 0x234   : > { %v5215_v56 = vpop.eup %5214  ;;  %v2140_v9 = vadd.f32 1e-06, %v2076_v39  ;;  %v884_v10 = vmul.f32 0.0078125, %v780_v26  ;;  %v2393_v23 = vmul.f32 %v2329_v0, %v6353_v6  ;;  %v712_v39 = vmul.f32 %v455_v48, %v455_v48  ;;  %v5408_v0 = vld [vmem:[%s6123_s23 + $0xb8] sm:$0xff] }
 0x235   : > { %v5217_v18 = vpop.eup %5216  ;;  %v2458_v44 = vadd.f32 %v2394_v28, %v6367_v3  ;;  %v1266_v45 = vmul.f32 %v5215_v56, %v1202_v53  ;;  %v1011_v61 = vsub.f32 %v883_v43, %v947_v13  ;;  %813 = vadd.xlane.f32.xlu0 %v709_v16  ;;  %v1204_v47 = vsub.f32 %v5408_v0, %v6719_v41 }
 0x236   : > { %5218 = vrsqrt.f32 %v2140_v9  ;;  %v1012_v11 = vsub.f32 %v884_v10, %v948_v57  ;;  %815 = vadd.xlane.f32.xlu1 %v710_v54  ;;  %v2457_v12 = vadd.f32 %v2393_v23, %v6367_v3  ;;  %v1265_v55 = vmul.f32 %v5217_v18, %v1201_v60  ;;  %v1590_v7 = vpop.xlane.xlu0 %1589 }
 0x237   : > { %5220 = vrsqrt.f32 %v2139_v36  ;;  %v1592_v46 = vpop.xlane.xlu1 %1591  ;;  %v1334_v62 = vmul.f32 %v6353_v6, %v1266_v45  ;;  %v1075_v25 = vadd.f32 1e-06, %v1011_v61  ;;  %v6751_v27 = vmul.f32 0.0078125, %v1590_v7 }
 0x238   : > { %v1076_v5 = vadd.f32 1e-06, %v1012_v11  ;;  %v2511_v8 = vpack.c.bf16 %v2458_v44, %v2457_v12  ;;  %v1333_v22 = vmul.f32 %v6353_v6, %v1265_v55  ;;  %v6748_v30 = vmul.f32 0.0078125, %v1592_v46 }
 0x239   : > { %v1402_v15 = vadd.f32 %v6367_v3, %v1334_v62  ;;  %1625 = vadd.xlane.f32.xlu0 %v1519_v14  ;;  %v2013_v29 = vmul.f32 %v6751_v27, %v6751_v27  ;;  %v711_v58 = vmul.f32 %v454_v31, %v454_v31  ;;  %v1203_v26 = vsub.f32 %v5409_v52, %v6725_v42  ;;  %v1522_v62 = vld [vmem:[%s6131_s8 + $0x168] sm:$0xff] }
 0x23a   : > { %5222 = vrsqrt.f32 %v1076_v5  ;;  %2777 = vmatprep.mubr.bf16.mxu0 %v2511_v8  ;;  %1627 = vadd.xlane.f32.xlu1 %v1520_v49  ;;  %v1401_v35 = vadd.f32 %v6367_v3, %v1333_v22  ;;  %v525_v20 = vpop.xlane.xlu0 %524  ;;  %v2014_v4 = vmul.f32 %v6748_v30, %v6748_v30  ;;  %v1521_v22 = vld [vmem:[%s6131_s8 + $0x160] sm:$0xff] }
 0x23b   : > { %5224 = vrsqrt.f32 %v1075_v25  ;;  %v527_v24 = vpop.xlane.xlu1 %526  ;;  %v6761_v59 = vmul.f32 0.0078125, %v525_v20  ;;  %v457_v20 = vld [vmem:[%s6123_s23 + $0x168] sm:$0xff] }
 0x23c   : > { %v1455_v19 = vpack.c.bf16 %v1402_v15, %v1401_v35  ;;  %v6755_v63 = vmul.f32 0.0078125, %v527_v24 }
 0x23d   : > { %560 = vadd.xlane.f32.xlu0 %v454_v31  ;;  %v949_v51 = vmul.f32 %v6761_v59, %v6761_v59 }
 0x23e   : > { %2778 = vmatmul.mubr.bf16.gmra.mrb[40].mxu0 %v1455_v19  ;;  %562 = vadd.xlane.f32.xlu1 %v455_v48  ;;  %v1846_v40 = vpop.xlane.xlu0 %1845  ;;  %v950_v28 = vmul.f32 %v6755_v63, %v6755_v63 }
 0x23f   : > { %v1848_v37 = vpop.xlane.xlu1 %1847  ;;  %v1949_v53 = vmul.f32 0.0078125, %v1846_v40  ;;  %v5411_v40 = vld [vmem:[%s6131_s8 + $0xc0] sm:$0xff] }
 0x240   : > { %v5219_v2 = vpop.eup %5218  ;;  %v1950_v54 = vmul.f32 0.0078125, %v1848_v37  ;;  %v1778_v37 = vmul.f32 %v1522_v62, %v1522_v62 }
 0x241   : > { %v5221_v17 = vpop.eup %5220  ;;  %v2332_v16 = vmul.f32 %v5219_v2, %v2268_v38  ;;  %v2077_v56 = vsub.f32 %v1949_v53, %v2013_v29  ;;  %1881 = vadd.xlane.f32.xlu0 %v1775_v34  ;;  %v5410_v34 = vld [vmem:[%s6131_s8 + $0xc8] sm:$0xff] }
 0x242   : > { %v2078_v60 = vsub.f32 %v1950_v54, %v2014_v4  ;;  %1883 = vadd.xlane.f32.xlu1 %v1776_v33  ;;  %v2331_v57 = vmul.f32 %v5221_v17, %v2267_v50  ;;  %v782_v18 = vpop.xlane.xlu0 %781  ;;  %v2270_v2 = vsub.f32 %v5410_v34, %v6748_v30  ;;  %v1777_v4 = vmul.f32 %v1521_v22, %v1521_v22  ;;  %v458_v34 = vld [vmem:[%s6123_s23 + $0x170] sm:$0xff] }
 0x243   : > { %v784_v13 = vpop.xlane.xlu1 %783  ;;  %v2396_v9 = vmul.f32 %v2332_v16, %v6353_v6  ;;  %v2141_v42 = vadd.f32 1e-06, %v2077_v56  ;;  %v885_v44 = vmul.f32 0.0078125, %v782_v18  ;;  %v2269_v17 = vsub.f32 %v5411_v40, %v6751_v27  ;;  %v5413_v56 = vld [vmem:[%s6123_s23 + $0xc0] sm:$0xff] }
 0x244   : > { %v5223_v10 = vpop.eup %5222  ;;  %v2142_v41 = vadd.f32 1e-06, %v2078_v60  ;;  %v886_v23 = vmul.f32 0.0078125, %v784_v13  ;;  %v2395_v36 = vmul.f32 %v2331_v57, %v6353_v6  ;;  %v714_v60 = vmul.f32 %v457_v20, %v457_v20  ;;  %v5412_v57 = vld [vmem:[%s6123_s23 + $0xc8] sm:$0xff] }
 0x245   : > { %v5225_v43 = vpop.eup %5224  ;;  %v2460_v45 = vadd.f32 %v2396_v9, %v6367_v3  ;;  %v1268_v11 = vmul.f32 %v5223_v10, %v1204_v47  ;;  %v1013_v46 = vsub.f32 %v885_v44, %v949_v51  ;;  %817 = vadd.xlane.f32.xlu0 %v711_v58  ;;  %v1206_v52 = vsub.f32 %v5412_v57, %v6755_v63 }
 0x246   : > { %5226 = vrsqrt.f32 %v2142_v41  ;;  %v1014_v12 = vsub.f32 %v886_v23, %v950_v28  ;;  %819 = vadd.xlane.f32.xlu1 %v712_v39  ;;  %v2459_v55 = vadd.f32 %v2395_v36, %v6367_v3  ;;  %v1267_v61 = vmul.f32 %v5225_v43, %v1203_v26  ;;  %v1594_v8 = vpop.xlane.xlu0 %1593 }
 0x247   : > { %5228 = vrsqrt.f32 %v2141_v42  ;;  %v1596_v49 = vpop.xlane.xlu1 %1595  ;;  %v1336_v5 = vmul.f32 %v6353_v6, %v1268_v11  ;;  %v1077_v15 = vadd.f32 1e-06, %v1013_v46  ;;  %v6787_v38 = vmul.f32 0.0078125, %v1594_v8 }
 0x248   : > { %v1078_v7 = vadd.f32 1e-06, %v1014_v12  ;;  %v2512_v14 = vpack.c.bf16 %v2460_v45, %v2459_v55  ;;  %v1335_v25 = vmul.f32 %v6353_v6, %v1267_v61  ;;  %v6784_v19 = vmul.f32 0.0078125, %v1596_v49 }
 0x249   : > { %v1404_v35 = vadd.f32 %v6367_v3, %v1336_v5  ;;  %1629 = vadd.xlane.f32.xlu0 %v1521_v22  ;;  %v2015_v30 = vmul.f32 %v6787_v38, %v6787_v38  ;;  %v713_v27 = vmul.f32 %v456_v21, %v456_v21  ;;  %v1205_v13 = vsub.f32 %v5413_v56, %v6761_v59  ;;  %v1524_v5 = vld [vmem:[%s6131_s8 + $0x178] sm:$0xff] }
 0x24a   : > { %5230 = vrsqrt.f32 %v1078_v7  ;;  %2785 = vmatprep.mubr.bf16.mxu0 %v2512_v14  ;;  %1631 = vadd.xlane.f32.xlu1 %v1522_v62  ;;  %v1403_v24 = vadd.f32 %v6367_v3, %v1335_v25  ;;  %v529_v31 = vpop.xlane.xlu0 %528  ;;  %v2016_v29 = vmul.f32 %v6784_v19, %v6784_v19  ;;  %v1523_v25 = vld [vmem:[%s6131_s8 + $0x170] sm:$0xff] }
 0x24b   : > { %5232 = vrsqrt.f32 %v1077_v15  ;;  %v531_v48 = vpop.xlane.xlu1 %530  ;;  %v6797_v53 = vmul.f32 0.0078125, %v529_v31  ;;  %v459_v31 = vld [vmem:[%s6123_s23 + $0x178] sm:$0xff] }
 0x24c   : > { %v1456_v33 = vpack.c.bf16 %v1404_v35, %v1403_v24  ;;  %v6791_v1 = vmul.f32 0.0078125, %v531_v48 }
 0x24d   : > { %564 = vadd.xlane.f32.xlu0 %v456_v21  ;;  %v951_v18 = vmul.f32 %v6797_v53, %v6797_v53 }
 0x24e   : > { %2786 = vmatmul.mubr.bf16.gmra.mrb[44].mxu0 %v1456_v33  ;;  %566 = vadd.xlane.f32.xlu1 %v457_v20  ;;  %v1850_v16 = vpop.xlane.xlu0 %1849  ;;  %v952_v9 = vmul.f32 %v6791_v1, %v6791_v1 }
 0x24f   : > { %v1852_v50 = vpop.xlane.xlu1 %1851  ;;  %v1951_v47 = vmul.f32 0.0078125, %v1850_v16  ;;  %v5415_v16 = vld [vmem:[%s6131_s8 + $0xd0] sm:$0xff] }
 0x250   : > { %v5227_v54 = vpop.eup %5226  ;;  %v1952_v39 = vmul.f32 0.0078125, %v1852_v50  ;;  %v1780_v50 = vmul.f32 %v1524_v5, %v1524_v5 }
 0x251   : > { %v5229_v0 = vpop.eup %5228  ;;  %v2334_v58 = vmul.f32 %v5227_v54, %v2270_v2  ;;  %v2079_v10 = vsub.f32 %v1951_v47, %v2015_v30  ;;  %1885 = vadd.xlane.f32.xlu0 %v1777_v4  ;;  %v5414_v4 = vld [vmem:[%s6131_s8 + $0xd8] sm:$0xff] }
 0x252   : > { %v2080_v26 = vsub.f32 %v1952_v39, %v2016_v29  ;;  %1887 = vadd.xlane.f32.xlu1 %v1778_v37  ;;  %v2333_v28 = vmul.f32 %v5229_v0, %v2269_v17  ;;  %v786_v43 = vpop.xlane.xlu0 %785  ;;  %v2272_v54 = vsub.f32 %v5414_v4, %v6784_v19  ;;  %v1779_v29 = vmul.f32 %v1523_v25, %v1523_v25 }
 0x253   : > { %v788_v51 = vpop.xlane.xlu1 %787  ;;  %v2398_v41 = vmul.f32 %v2334_v58, %v6353_v6  ;;  %v2143_v59 = vadd.f32 1e-06, %v2079_v10  ;;  %v887_v45 = vmul.f32 0.0078125, %v786_v43  ;;  %v2271_v0 = vsub.f32 %v5415_v16, %v6787_v38  ;;  %v5417_v10 = vld [vmem:[%s6123_s23 + $0xd0] sm:$0xff] }
 0x254   : > { %v5231_v23 = vpop.eup %5230  ;;  %v2144_v63 = vadd.f32 1e-06, %v2080_v26  ;;  %v888_v36 = vmul.f32 0.0078125, %v788_v51  ;;  %v2397_v42 = vmul.f32 %v2333_v28, %v6353_v6  ;;  %v716_v26 = vmul.f32 %v459_v31, %v459_v31  ;;  %v5416_v28 = vld [vmem:[%s6123_s23 + $0xd8] sm:$0xff] }
 0x255   : > { %v5233_v44 = vpop.eup %5232  ;;  %v2462_v11 = vadd.f32 %v2398_v41, %v6367_v3  ;;  %v1270_v12 = vmul.f32 %v5231_v23, %v1206_v52  ;;  %v1015_v49 = vsub.f32 %v887_v45, %v951_v18  ;;  %821 = vadd.xlane.f32.xlu0 %v713_v27  ;;  %v1208_v56 = vsub.f32 %v5416_v28, %v6791_v1 }
 0x256   : > { %5234 = vrsqrt.f32 %v2144_v63  ;;  %v1016_v55 = vsub.f32 %v888_v36, %v952_v9  ;;  %823 = vadd.xlane.f32.xlu1 %v714_v60  ;;  %v2461_v61 = vadd.f32 %v2397_v42, %v6367_v3  ;;  %v1269_v46 = vmul.f32 %v5233_v44, %v1205_v13  ;;  %v1598_v14 = vpop.xlane.xlu0 %1597 }
 0x257   : > { %5236 = vrsqrt.f32 %v2143_v59  ;;  %v1600_v62 = vpop.xlane.xlu1 %1599  ;;  %v1338_v7 = vmul.f32 %v6353_v6, %v1270_v12  ;;  %v1079_v35 = vadd.f32 1e-06, %v1015_v49  ;;  %v6823_v2 = vmul.f32 0.0078125, %v1598_v14 }
 0x258   : > { %v1080_v8 = vadd.f32 1e-06, %v1016_v55  ;;  %v2513_v22 = vpack.c.bf16 %v2462_v11, %v2461_v61  ;;  %v1337_v15 = vmul.f32 %v6353_v6, %v1269_v46  ;;  %v6820_v33 = vmul.f32 0.0078125, %v1600_v62 }
 0x259   : > { %v1406_v24 = vadd.f32 %v6367_v3, %v1338_v7  ;;  %1633 = vadd.xlane.f32.xlu0 %v1523_v25  ;;  %v2017_v19 = vmul.f32 %v6823_v2, %v6823_v2  ;;  %v715_v38 = vmul.f32 %v458_v34, %v458_v34  ;;  %v1207_v51 = vsub.f32 %v5417_v10, %v6797_v53  ;;  %v1526_v7 = vld [vmem:[%s6131_s8 + $0x188] sm:$0xff] }
 0x25a   : > { %5238 = vrsqrt.f32 %v1080_v8  ;;  %2793 = vmatprep.mubr.bf16.mxu0 %v2513_v22  ;;  %1635 = vadd.xlane.f32.xlu1 %v1524_v5  ;;  %v1405_v48 = vadd.f32 %v6367_v3, %v1337_v15  ;;  %v533_v21 = vpop.xlane.xlu0 %532  ;;  %v2018_v30 = vmul.f32 %v6820_v33, %v6820_v33  ;;  %v1525_v15 = vld [vmem:[%s6131_s8 + $0x180] sm:$0xff] }
 0x25b   : > { %5240 = vrsqrt.f32 %v1079_v35  ;;  %v535_v20 = vpop.xlane.xlu1 %534  ;;  %v6833_v47 = vmul.f32 0.0078125, %v533_v21 }
 0x25c   : > { %v1457_v37 = vpack.c.bf16 %v1406_v24, %v1405_v48  ;;  %v6827_v40 = vmul.f32 0.0078125, %v535_v20 }
 0x25d   : > { %568 = vadd.xlane.f32.xlu0 %v458_v34  ;;  %v953_v43 = vmul.f32 %v6833_v47, %v6833_v47 }
 0x25e   : > { %2794 = vmatmul.mubr.bf16.gmra.mrb[48].mxu0 %v1457_v37  ;;  %570 = vadd.xlane.f32.xlu1 %v459_v31  ;;  %v1854_v58 = vpop.xlane.xlu0 %1853  ;;  %v954_v41 = vmul.f32 %v6827_v40, %v6827_v40  ;;  %v2567_v31 = vsub.s32 2, %v6341_v32  ;;  %v461_v37 = vld [vmem:[%s6123_s23 + $0x188] sm:$0xff] }
 0x25f   : > { %v1856_v17 = vpop.xlane.xlu1 %1855  ;;  %v1953_v52 = vmul.f32 0.0078125, %v1854_v58 }
 0x260   : > { %v5235_v39 = vpop.eup %5234  ;;  %v1954_v60 = vmul.f32 0.0078125, %v1856_v17 }
 0x261   : > { %v5237_v57 = vpop.eup %5236  ;;  %v2336_v27 = vmul.f32 %v5235_v39, %v2272_v54  ;;  %v2081_v23 = vsub.f32 %v1953_v52, %v2017_v19  ;;  %1889 = vadd.xlane.f32.xlu0 %v1779_v29  ;;  %v460_v54 = vld [vmem:[%s6123_s23 + $0x180] sm:$0xff]  ;;  %v718_v52 = vmul.f32 %v461_v37, %v461_v37 }
 0x262   : > { %v2082_v13 = vsub.f32 %v1954_v60, %v2018_v30  ;;  %1891 = vadd.xlane.f32.xlu1 %v1780_v50  ;;  %v2335_v9 = vmul.f32 %v5237_v57, %v2271_v0  ;;  %v790_v44 = vpop.xlane.xlu0 %789  ;;  %v5418_v39 = vld [vmem:[#allocation7] sm:$0xff]  ;;  %v1782_v0 = vmul.f32 %v1526_v7, %v1526_v7  ;;  %v1781_v30 = vmul.f32 %v1525_v15, %v1525_v15  ;;  %v5419_v60 = vld [vmem:[%s6131_s8 + $0xe8] sm:$0xff] }
 0x263   : > { %v792_v18 = vpop.xlane.xlu1 %791  ;;  %v2400_v63 = vmul.f32 %v2336_v27, %v6353_v6  ;;  %v2145_v53 = vadd.f32 1e-06, %v2081_v23  ;;  %v889_v11 = vmul.f32 0.0078125, %v790_v44  ;;  %v6864_v16 = vrot.slane %v5418_v39, %v2567_v31  ;;  %v5106_v27 = vld [vmem:[#allocation10] sm:$0xff]   ;;  %v5422_v23 = vld [vmem:[%s6123_s23 + $0xe0] sm:$0xff]  ;;  %v1527_v39 = vld [vmem:[%s6131_s8 + $0x190] sm:$0xff] }
 0x264   : > { %v5239_v36 = vpop.eup %5238  ;;  %v2146_v1 = vadd.f32 1e-06, %v2082_v13  ;;  %v890_v42 = vmul.f32 0.0078125, %v792_v18  ;;  %v2399_v59 = vmul.f32 %v2335_v9, %v6353_v6  ;;  %v2274_v58 = vsub.f32 %v5419_v60, %v6820_v33  ;;  %4725 = vmatprep.subr.bf16.mxu0 %v5106_v27  ;;  %4965 = vmatprep.subr.bf16.mxu1 %v5106_v27 }
 0x265   : > { %v5241_v45 = vpop.eup %5240  ;;  %v2464_v12 = vadd.f32 %v2400_v63, %v6367_v3  ;;  %v1272_v55 = vmul.f32 %v5239_v36, %v1208_v56  ;;  %v1017_v62 = vsub.f32 %v889_v11, %v953_v43  ;;  %825 = vadd.xlane.f32.xlu0 %v715_v38  ;;  %v5420_v56 = vld [vmem:[%s6131_s8 + $0xe0] sm:$0xff]  ;;  %v5421_v38 = vld [vmem:[%s6123_s23 + $0xe8] sm:$0xff]  ;;  %v1209_v18 = vsub.f32 %v5422_v23, %v6833_v47 }
 0x266   : > { %5242 = vrsqrt.f32 %v2146_v1  ;;  %v1018_v61 = vsub.f32 %v890_v42, %v954_v41  ;;  %827 = vadd.xlane.f32.xlu1 %v716_v26  ;;  %v2463_v46 = vadd.f32 %v2399_v59, %v6367_v3  ;;  %v1271_v49 = vmul.f32 %v5241_v45, %v1207_v51  ;;  %v1602_v22 = vpop.xlane.xlu0 %1601  ;;  %4726 = vmatpush3.bf16.msra.mxu0 %v5106_v27 }
 0x267   : > { %5244 = vrsqrt.f32 %v2145_v53  ;;  %v1604_v5 = vpop.xlane.xlu1 %1603  ;;  %v1340_v8 = vmul.f32 %v6353_v6, %v1272_v55  ;;  %v1081_v24 = vadd.f32 1e-06, %v1017_v62  ;;  %v6860_v17 = vmul.f32 0.0078125, %v1602_v22  ;;  %4973 = vmatpush3.bf16.msra.mxu1 %v5106_v27 }
 0x268   : > { %v1082_v14 = vadd.f32 1e-06, %v1018_v61  ;;  %v2514_v25 = vpack.c.bf16 %v2464_v12, %v2463_v46  ;;  %v1339_v35 = vmul.f32 %v6353_v6, %v1271_v49  ;;  %v6857_v34 = vmul.f32 0.0078125, %v1604_v5 }
 0x269   : > { %v1408_v48 = vadd.f32 %v6367_v3, %v1340_v8  ;;  %1637 = vadd.xlane.f32.xlu0 %v1525_v15  ;;  %v717_v26 = vmul.f32 %v460_v54, %v460_v54  ;;  %v2273_v13 = vsub.f32 %v5420_v56, %v6823_v2  ;;  %v1210_v9 = vsub.f32 %v5421_v38, %v6827_v40  ;;  %v462_v56 = vld [vmem:[%s6123_s23 + $0x190] sm:$0xff] }
 0x26a   : > { %5246 = vrsqrt.f32 %v1082_v14  ;;  %2801 = vmatprep.mubr.bf16.mxu0 %v2514_v25  ;;  %1639 = vadd.xlane.f32.xlu1 %v1526_v7  ;;  %v1407_v20 = vadd.f32 %v6367_v3, %v1339_v35  ;;  %v537_v50 = vpop.xlane.xlu0 %536  ;;  %v2020_v10 = vmul.f32 %v6857_v34, %v6857_v34  ;;  %v2019_v63 = vmul.f32 %v6860_v17, %v6860_v17 }
 0x26b   : > { %5248 = vrsqrt.f32 %v1081_v24  ;;  %v539_v21 = vpop.xlane.xlu1 %538  ;;  %v6868_v57 = vmul.f32 0.0078125, %v537_v50 }
 0x26c   : > { %v1458_v4 = vpack.c.bf16 %v1408_v48, %v1407_v20  ;;  %v6862_v29 = vmul.f32 0.0078125, %v539_v21  ;;  %v1528_v21 = vld [vmem:[%s6131_s8 + $0x198] sm:$0xff] }
 0x26d   : > { %572 = vadd.xlane.f32.xlu0 %v460_v54  ;;  %v955_v44 = vmul.f32 %v6868_v57, %v6868_v57 }
 0x26e   : > { %2802 = vmatmul.mubr.bf16.gmra.mrb[52].mxu0 %v1458_v4  ;;  %574 = vadd.xlane.f32.xlu1 %v461_v37  ;;  %v1858_v33 = vpop.xlane.xlu0 %1857  ;;  %v956_v2 = vmul.f32 %v6862_v29, %v6862_v29 }
 0x26f   : > { %v1860_v19 = vpop.xlane.xlu1 %1859  ;;  %v1955_v36 = vmul.f32 0.0078125, %v1858_v33 }
 0x270   : > { %v5243_v28 = vpop.eup %5242  ;;  %v1956_v51 = vmul.f32 0.0078125, %v1860_v19 }
 0x271   : > { %v5245_v41 = vpop.eup %5244  ;;  %v2338_v43 = vmul.f32 %v5243_v28, %v2274_v58  ;;  %v2699_v1 = vpop.f32.mrb[0].mxu0  ;;  %v2083_v59 = vsub.f32 %v1955_v36, %v2019_v63  ;;  %1893 = vadd.xlane.f32.xlu0 %v1781_v30  ;;  %v5424_v36 = vld [vmem:[%s6131_s8 + $0xf0] sm:$0xff] }
 0x272   : > { %v2084_v40 = vsub.f32 %v1956_v51, %v2020_v10  ;;  %1895 = vadd.xlane.f32.xlu1 %v1782_v0  ;;  %v2337_v42 = vmul.f32 %v5245_v41, %v2273_v13  ;;  %v2701_v47 = vpop.f32.mrb[1].mxu0  ;;  %v6886_v55 = vadd.f32 %v2699_v1, %v6864_v16  ;;  %v794_v49 = vpop.xlane.xlu0 %793  ;;  %v5423_v10 = vld [vmem:[%s6131_s8 + $0xf8] sm:$0xff] }
 0x273   : > { %v796_v45 = vpop.xlane.xlu1 %795  ;;  %v2402_v53 = vmul.f32 %v2338_v43, %v6353_v6  ;;  %v2702_v61 = vpop.f32.mrb[2].mxu0  ;;  %v2147_v7 = vadd.f32 1e-06, %v2083_v59  ;;  %v891_v14 = vmul.f32 0.0078125, %v794_v49  ;;  %v2276_v51 = vsub.f32 %v5423_v10, %v6857_v34  ;;  %v1529_v10 = vld [vmem:[%s6131_s8 + $0x1a0] sm:$0xff] }
 0x274   : > { %v5247_v11 = vpop.eup %5246  ;;  %v2148_v12 = vadd.f32 1e-06, %v2084_v40  ;;  %v892_v46 = vmul.f32 0.0078125, %v796_v45  ;;  %v2401_v62 = vmul.f32 %v2337_v42, %v6353_v6  ;;  %v6890_v8 = vadd.f32 %v2702_v61, %v6864_v16  ;;  %v2704_v22 = vpop.f32.mrb[3].mxu0 }
 0x275   : > { %v5249_v5 = vpop.eup %5248  ;;  %v2466_v25 = vadd.f32 %v2402_v53, %v6367_v3  ;;  %v1019_v20 = vsub.f32 %v891_v14, %v955_v44  ;;  %829 = vadd.xlane.f32.xlu0 %v717_v26  ;;  %v1274_v37 = vmul.f32 %v5247_v11, %v1210_v9  ;;  %v463_v26 = vld [vmem:[%s6123_s23 + $0x198] sm:$0xff]  ;;  %v1784_v9 = vmul.f32 %v1528_v21, %v1528_v21 }
 0x276   : > { %5250 = vrsqrt.f32 %v2148_v12  ;;  %v1020_v15 = vsub.f32 %v892_v46, %v956_v2  ;;  %831 = vadd.xlane.f32.xlu1 %v718_v52  ;;  %v2465_v35 = vadd.f32 %v2401_v62, %v6367_v3  ;;  %v1273_v24 = vmul.f32 %v5249_v5, %v1209_v18  ;;  %v1606_v4 = vpop.xlane.xlu0 %1605  ;;  %v5425_v53 = vld [vmem:[%s6123_s23 + $0xf8] sm:$0xff]  ;;  %v5426_v12 = vld [vmem:[%s6123_s23 + $0xf0] sm:$0xff] }
 0x277   : > { %5252 = vrsqrt.f32 %v2147_v7  ;;  %v2954_v48 = vpack.c.bf16 %v6890_v8, %v6886_v55  ;;  %v1608_v31 = vpop.xlane.xlu1 %1607  ;;  %v1083_v30 = vadd.f32 1e-06, %v1019_v20  ;;  %v1342_v60 = vmul.f32 %v6353_v6, %v1274_v37 }
 0x278   : > { %v1084_v50 = vadd.f32 1e-06, %v1020_v15  ;;  %v2515_v54 = vpack.c.bf16 %v2466_v25, %v2465_v35  ;;  %v1341_v0 = vmul.f32 %v6353_v6, %v1273_v24  ;;  %v6903_v27 = vmul.f32 0.0078125, %v1608_v31 }
 0x279   : > { %1641 = vadd.xlane.f32.xlu0 %v1527_v39  ;;  %v1410_v52 = vadd.f32 %v6367_v3, %v1342_v60  ;;  %v6906_v13 = vmul.f32 0.0078125, %v1606_v4  ;;  %v1783_v18 = vmul.f32 %v1527_v39, %v1527_v39  ;;  %v2275_v43 = vsub.f32 %v5424_v36, %v6860_v17 }
 0x27a   : > { %5254 = vrsqrt.f32 %v1084_v50  ;;  %2809 = vmatprep.mubr.bf16.mxu0 %v2515_v54  ;;  %1643 = vadd.xlane.f32.xlu1 %v1528_v21  ;;  %v1409_v58 = vadd.f32 %v6367_v3, %v1341_v0  ;;  %v541_v28 = vpop.xlane.xlu0 %540  ;;  %v2022_v2 = vmul.f32 %v6903_v27, %v6903_v27  ;;  %v720_v34 = vmul.f32 %v463_v26, %v463_v26 }
 0x27b   : > { %5256 = vrsqrt.f32 %v1083_v30  ;;  %v543_v19 = vpop.xlane.xlu1 %542  ;;  %v6912_v41 = vmul.f32 0.0078125, %v541_v28  ;;  %v2021_v44 = vmul.f32 %v6906_v13, %v6906_v13  ;;  %v719_v47 = vmul.f32 %v462_v56, %v462_v56 }
 0x27c   : > { %v1459_v38 = vpack.c.bf16 %v1410_v52, %v1409_v58  ;;  %v6910_v33 = vmul.f32 0.0078125, %v543_v19  ;;  %v1212_v11 = vsub.f32 %v5425_v53, %v6862_v29  ;;  %v1211_v61 = vsub.f32 %v5426_v12, %v6868_v57  ;;  %v5427_v53 = vld [vmem:[%s6131_s8 + $0x108] sm:$0xff] }
 0x27d   : > { %576 = vadd.xlane.f32.xlu0 %v462_v56  ;;  %v957_v5 = vmul.f32 %v6912_v41, %v6912_v41 }
 0x27e   : > { %578 = vadd.xlane.f32.xlu1 %v463_v26  ;;  %2810 = vmatmul.mubr.bf16.gmra.mrb[56].mxu0 %v1459_v38  ;;  %v1862_v1 = vpop.xlane.xlu0 %1861  ;;  %v958_v62 = vmul.f32 %v6910_v33, %v6910_v33  ;;  %v1530_v26 = vld [vmem:[%s6131_s8 + $0x1a8] sm:$0xff] }
 0x27f   : > { %v1864_v23 = vpop.xlane.xlu1 %1863  ;;  %v1957_v59 = vmul.f32 0.0078125, %v1862_v1 }
 0x280   : > { %v5251_v63 = vpop.eup %5250  ;;  %v1958_v40 = vmul.f32 0.0078125, %v1864_v23 }
 0x281   : > { %v5253_v42 = vpop.eup %5252  ;;  %v2340_v45 = vmul.f32 %v5251_v63, %v2276_v51  ;;  %v2707_v46 = vpop.f32.mrb[4].mxu0  ;;  %v2085_v7 = vsub.f32 %v1957_v59, %v2021_v44  ;;  %1897 = vadd.xlane.f32.xlu0 %v1783_v18 }
 0x282   : > { %v2086_v17 = vsub.f32 %v1958_v40, %v2022_v2  ;;  %1899 = vadd.xlane.f32.xlu1 %v1784_v9  ;;  %v2339_v49 = vmul.f32 %v5253_v42, %v2275_v43  ;;  %v2709_v14 = vpop.f32.mrb[5].mxu0  ;;  %v6930_v57 = vadd.f32 %v2707_v46, %v6864_v16  ;;  %v798_v20 = vpop.xlane.xlu0 %797  ;;  %v465_v2 = vld [vmem:[%s6123_s23 + $0x1a8] sm:$0xff] }
 0x283   : > { %v800_v22 = vpop.xlane.xlu1 %799  ;;  %v2404_v25 = vmul.f32 %v2340_v45, %v6353_v6  ;;  %v2710_v35 = vpop.f32.mrb[6].mxu0  ;;  %v2149_v37 = vadd.f32 1e-06, %v2085_v7  ;;  %v893_v4 = vmul.f32 0.0078125, %v798_v20  ;;  %v1785_v45 = vmul.f32 %v1529_v10, %v1529_v10  ;;  %v5429_v14 = vld [vmem:[%s6123_s23 + $0x108] sm:$0xff] }
 0x284   : > { %v5255_v29 = vpop.eup %5254  ;;  %v2150_v15 = vadd.f32 1e-06, %v2086_v17  ;;  %v894_v24 = vmul.f32 0.0078125, %v800_v22  ;;  %v2403_v31 = vmul.f32 %v2339_v49, %v6353_v6  ;;  %v6934_v50 = vadd.f32 %v2710_v35, %v6864_v16  ;;  %v2712_v54 = vpop.f32.mrb[7].mxu0  ;;  %v5107_v49 = vld [vmem:[#allocation10 + $0x8] sm:$0xff]   ;;  %v5430_v35 = vld [vmem:[%s6123_s23 + $0x100] sm:$0xff] }
 0x285   : > { %v5257_v21 = vpop.eup %5256  ;;  %v2468_v39 = vadd.f32 %v2404_v25, %v6367_v3  ;;  %v1021_v19 = vsub.f32 %v893_v4, %v957_v5  ;;  %833 = vadd.xlane.f32.xlu0 %v719_v47  ;;  %v1276_v28 = vmul.f32 %v5255_v29, %v1212_v11  ;;  %v1786_v47 = vmul.f32 %v1530_v26, %v1530_v26  ;;  %v5428_v5 = vld [vmem:[%s6131_s8 + $0x100] sm:$0xff] }
 0x286   : > { %5258 = vrsqrt.f32 %v2150_v15  ;;  %v1022_v0 = vsub.f32 %v894_v24, %v958_v62  ;;  %835 = vadd.xlane.f32.xlu1 %v720_v34  ;;  %v2467_v30 = vadd.f32 %v2403_v31, %v6367_v3  ;;  %v1275_v60 = vmul.f32 %v5257_v21, %v1211_v61  ;;  %v1610_v38 = vpop.xlane.xlu0 %1609  ;;  %v464_v34 = vld [vmem:[%s6123_s23 + $0x1a0] sm:$0xff]  ;;  %4727 = vmatprep.subr.bf16.mxu0 %v5107_v49 }
 0x287   : > { %5260 = vrsqrt.f32 %v2149_v37  ;;  %v2955_v58 = vpack.c.bf16 %v6934_v50, %v6930_v57  ;;  %v1612_v52 = vpop.xlane.xlu1 %1611  ;;  %v1085_v23 = vadd.f32 1e-06, %v1021_v19  ;;  %v1344_v18 = vmul.f32 %v6353_v6, %v1276_v28  ;;  %4966 = vmatprep.subr.bf16.mxu1 %v5107_v49  ;;  %4728 = vmatpush3.bf16.msra.mxu0 %v5107_v49 }
 0x288   : > { %v1086_v56 = vadd.f32 1e-06, %v1022_v0  ;;  %v2516_v9 = vpack.c.bf16 %v2468_v39, %v2467_v30  ;;  %v1343_v51 = vmul.f32 %v6353_v6, %v1275_v60  ;;  %v6947_v40 = vmul.f32 0.0078125, %v1612_v52  ;;  %4974 = vmatpush3.bf16.msra.mxu1 %v5107_v49  ;;  %v1531_v49 = vld [vmem:[%s6131_s8 + $0x1b0] sm:$0xff] }
 0x289   : > { %1645 = vadd.xlane.f32.xlu0 %v1529_v10  ;;  %v1412_v43 = vadd.f32 %v6367_v3, %v1344_v18  ;;  %v6950_v42 = vmul.f32 0.0078125, %v1610_v38  ;;  %v2278_v11 = vsub.f32 %v5427_v53, %v6903_v27  ;;  %v722_v17 = vmul.f32 %v465_v2, %v465_v2 }
 0x28a   : > { %5262 = vrsqrt.f32 %v1086_v56  ;;  %2817 = vmatprep.mubr.bf16.mxu0 %v2516_v9  ;;  %1647 = vadd.xlane.f32.xlu1 %v1530_v26  ;;  %v1411_v63 = vadd.f32 %v6367_v3, %v1343_v51  ;;  %v545_v1 = vpop.xlane.xlu0 %544  ;;  %v721_v46 = vmul.f32 %v464_v34, %v464_v34  ;;  %v2277_v7 = vsub.f32 %v5428_v5, %v6906_v13 }
 0x28b   : > { %5264 = vrsqrt.f32 %v1085_v23  ;;  %v547_v36 = vpop.xlane.xlu1 %546  ;;  %v6956_v12 = vmul.f32 0.0078125, %v545_v1  ;;  %v1214_v22 = vsub.f32 %v5429_v14, %v6910_v33  ;;  %v2024_v25 = vmul.f32 %v6947_v40, %v6947_v40 }
 0x28c   : > { %v1460_v44 = vpack.c.bf16 %v1412_v43, %v1411_v63  ;;  %v6952_v59 = vmul.f32 0.0078125, %v547_v36  ;;  %v1213_v24 = vsub.f32 %v5430_v35, %v6912_v41  ;;  %v2023_v20 = vmul.f32 %v6950_v42, %v6950_v42 }
 0x28d   : > { %580 = vadd.xlane.f32.xlu0 %v464_v34  ;;  %v959_v54 = vmul.f32 %v6956_v12, %v6956_v12 }
 0x28e   : > { %582 = vadd.xlane.f32.xlu1 %v465_v2  ;;  %2818 = vmatmul.mubr.bf16.gmra.mrb[60].mxu0 %v1460_v44  ;;  %v1866_v29 = vpop.xlane.xlu0 %1865  ;;  %v960_v13 = vmul.f32 %v6952_v59, %v6952_v59 }
 0x28f   : > { %v1868_v61 = vpop.xlane.xlu1 %1867  ;;  %v1959_v31 = vmul.f32 0.0078125, %v1866_v29  ;;  %v466_v29 = vld [vmem:[%s6123_s23 + $0x1b0] sm:$0xff] }
 0x290   : > { %v5259_v62 = vpop.eup %5258  ;;  %v1960_v27 = vmul.f32 0.0078125, %v1868_v61 }
 0x291   : > { %v5261_v15 = vpop.eup %5260  ;;  %v2342_v21 = vmul.f32 %v5259_v62, %v2278_v11  ;;  %v2715_v37 = vpop.f32.mrb[8].mxu0  ;;  %v2087_v39 = vsub.f32 %v1959_v31, %v2023_v20  ;;  %1901 = vadd.xlane.f32.xlu0 %v1785_v45  ;;  %v5431_v20 = vld [vmem:[%s6131_s8 + $0x118] sm:$0xff] }
 0x292   : > { %v2088_v33 = vsub.f32 %v1960_v27, %v2024_v25  ;;  %1903 = vadd.xlane.f32.xlu1 %v1786_v47  ;;  %v2341_v4 = vmul.f32 %v5261_v15, %v2277_v7  ;;  %v2717_v41 = vpop.f32.mrb[9].mxu0  ;;  %v6974_v52 = vadd.f32 %v2715_v37, %v6864_v16  ;;  %v802_v56 = vpop.xlane.xlu0 %801  ;;  %v1532_v47 = vld [vmem:[%s6131_s8 + $0x1b8] sm:$0xff]  ;;  %v2280_v31 = vsub.f32 %v5431_v20, %v6947_v40 }
 0x293   : > { %v804_v0 = vpop.xlane.xlu1 %803  ;;  %v2406_v30 = vmul.f32 %v2342_v21, %v6353_v6  ;;  %v2718_v26 = vpop.f32.mrb[10].mxu0  ;;  %v2151_v10 = vadd.f32 1e-06, %v2087_v39  ;;  %v895_v23 = vmul.f32 0.0078125, %v802_v56  ;;  %v1787_v37 = vmul.f32 %v1531_v49, %v1531_v49 }
 0x294   : > { %v5263_v60 = vpop.eup %5262  ;;  %v2152_v19 = vadd.f32 1e-06, %v2088_v33  ;;  %v896_v28 = vmul.f32 0.0078125, %v804_v0  ;;  %v2405_v38 = vmul.f32 %v2341_v4, %v6353_v6  ;;  %v6978_v51 = vadd.f32 %v2718_v26, %v6864_v16  ;;  %v2720_v18 = vpop.f32.mrb[11].mxu0 }
 0x295   : > { %v5265_v9 = vpop.eup %5264  ;;  %v2470_v63 = vadd.f32 %v2406_v30, %v6367_v3  ;;  %v1023_v34 = vsub.f32 %v895_v23, %v959_v54  ;;  %837 = vadd.xlane.f32.xlu0 %v721_v46  ;;  %v1278_v45 = vmul.f32 %v5263_v60, %v1214_v22  ;;  %v467_v22 = vld [vmem:[%s6123_s23 + $0x1b8] sm:$0xff]  ;;  %v5432_v54 = vld [vmem:[%s6131_s8 + $0x110] sm:$0xff] }
 0x296   : > { %5266 = vrsqrt.f32 %v2152_v19  ;;  %v1024_v36 = vsub.f32 %v896_v28, %v960_v13  ;;  %839 = vadd.xlane.f32.xlu1 %v722_v17  ;;  %v2469_v43 = vadd.f32 %v2405_v38, %v6367_v3  ;;  %v1277_v2 = vmul.f32 %v5265_v9, %v1213_v24  ;;  %v1614_v11 = vpop.xlane.xlu0 %1613  ;;  %v5433_v38 = vld [vmem:[%s6123_s23 + $0x118] sm:$0xff] }
 0x297   : > { %5268 = vrsqrt.f32 %v2151_v10  ;;  %v2956_v1 = vpack.c.bf16 %v6978_v51, %v6974_v52  ;;  %v1616_v44 = vpop.xlane.xlu1 %1615  ;;  %v1087_v62 = vadd.f32 1e-06, %v1023_v34  ;;  %v1346_v5 = vmul.f32 %v6353_v6, %v1278_v45  ;;  %v5434_v10 = vld [vmem:[%s6123_s23 + $0x110] sm:$0xff] }
 0x298   : > { %v1088_v53 = vadd.f32 1e-06, %v1024_v36  ;;  %v2517_v61 = vpack.c.bf16 %v2470_v63, %v2469_v43  ;;  %v1345_v17 = vmul.f32 %v6353_v6, %v1277_v2  ;;  %v6991_v25 = vmul.f32 0.0078125, %v1616_v44 }
 0x299   : > { %1649 = vadd.xlane.f32.xlu0 %v1531_v49  ;;  %v1414_v14 = vadd.f32 %v6367_v3, %v1346_v5  ;;  %v6994_v15 = vmul.f32 0.0078125, %v1614_v11  ;;  %v1788_v24 = vmul.f32 %v1532_v47, %v1532_v47  ;;  %v2279_v39 = vsub.f32 %v5432_v54, %v6950_v42 }
 0x29a   : > { %5270 = vrsqrt.f32 %v1088_v53  ;;  %2825 = vmatprep.mubr.bf16.mxu0 %v2517_v61  ;;  %1651 = vadd.xlane.f32.xlu1 %v1532_v47  ;;  %v1413_v46 = vadd.f32 %v6367_v3, %v1345_v17  ;;  %v549_v27 = vpop.xlane.xlu0 %548  ;;  %v2026_v41 = vmul.f32 %v6991_v25, %v6991_v25  ;;  %v724_v40 = vmul.f32 %v467_v22, %v467_v22 }
 0x29b   : > { %5272 = vrsqrt.f32 %v1087_v62  ;;  %v551_v7 = vpop.xlane.xlu1 %550  ;;  %v7000_v13 = vmul.f32 0.0078125, %v549_v27  ;;  %v2025_v19 = vmul.f32 %v6994_v15, %v6994_v15  ;;  %v723_v28 = vmul.f32 %v466_v29, %v466_v29 }
 0x29c   : > { %v1461_v35 = vpack.c.bf16 %v1414_v14, %v1413_v46  ;;  %v6998_v21 = vmul.f32 0.0078125, %v551_v7  ;;  %v1216_v9 = vsub.f32 %v5433_v38, %v6952_v59  ;;  %v1215_v23 = vsub.f32 %v5434_v10, %v6956_v12  ;;  %v468_v38 = vld [vmem:[%s6123_s23 + $0x1c0] sm:$0xff] }
 0x29d   : > { %584 = vadd.xlane.f32.xlu0 %v466_v29  ;;  %v961_v43 = vmul.f32 %v7000_v13, %v7000_v13 }
 0x29e   : > { %586 = vadd.xlane.f32.xlu1 %v467_v22  ;;  %2826 = vmatmul.mubr.bf16.gmra.mrb[64].mxu0 %v1461_v35  ;;  %v1870_v30 = vpop.xlane.xlu0 %1869  ;;  %v962_v36 = vmul.f32 %v6998_v21, %v6998_v21 }
 0x29f   : > { %v1872_v33 = vpop.xlane.xlu1 %1871  ;;  %v1961_v26 = vmul.f32 0.0078125, %v1870_v30 }
 0x2a0   : > { %v5267_v4 = vpop.eup %5266  ;;  %v1962_v0 = vmul.f32 0.0078125, %v1872_v33 }
 0x2a1   : > { %v5269_v60 = vpop.eup %5268  ;;  %v2344_v56 = vmul.f32 %v5267_v4, %v2280_v31  ;;  %v2723_v18 = vpop.f32.mrb[12].mxu0  ;;  %v2089_v2 = vsub.f32 %v1961_v26, %v2025_v19  ;;  %1905 = vadd.xlane.f32.xlu0 %v1787_v37  ;;  %v1534_v31 = vld [vmem:[%s6131_s8 + $0x1c8] sm:$0xff] }
 0x2a2   : > { %v2090_v42 = vsub.f32 %v1962_v0, %v2026_v41  ;;  %1907 = vadd.xlane.f32.xlu1 %v1788_v24  ;;  %v2343_v63 = vmul.f32 %v5269_v60, %v2279_v39  ;;  %v2725_v34 = vpop.f32.mrb[13].mxu0  ;;  %v7018_v12 = vadd.f32 %v2723_v18, %v6864_v16  ;;  %v806_v61 = vpop.xlane.xlu0 %805  ;;  %v1533_v39 = vld [vmem:[%s6131_s8 + $0x1c0] sm:$0xff]  ;;  %v469_v26 = vld [vmem:[%s6123_s23 + $0x1c8] sm:$0xff] }
 0x2a3   : > { %v808_v44 = vpop.xlane.xlu1 %807  ;;  %v2408_v47 = vmul.f32 %v2344_v56, %v6353_v6  ;;  %v2726_v53 = vpop.f32.mrb[14].mxu0  ;;  %v2153_v62 = vadd.f32 1e-06, %v2089_v2  ;;  %v897_v46 = vmul.f32 0.0078125, %v806_v61  ;;  %v1789_v18 = vmul.f32 %v1533_v39, %v1533_v39 }
 0x2a4   : > { %v5271_v59 = vpop.eup %5270  ;;  %v2154_v45 = vadd.f32 1e-06, %v2090_v42  ;;  %v898_v11 = vmul.f32 0.0078125, %v808_v44  ;;  %v2407_v49 = vmul.f32 %v2343_v63, %v6353_v6  ;;  %v7022_v5 = vadd.f32 %v2726_v53, %v6864_v16  ;;  %v2728_v7 = vpop.f32.mrb[15].mxu0  ;;  %v5435_v63 = vld [vmem:[%s6131_s8 + $0x128] sm:$0xff] }
 0x2a5   : > { %v5273_v17 = vpop.eup %5272  ;;  %v2472_v14 = vadd.f32 %v2408_v47, %v6367_v3  ;;  %v1025_v24 = vsub.f32 %v897_v46, %v961_v43  ;;  %841 = vadd.xlane.f32.xlu0 %v723_v28  ;;  %v1280_v33 = vmul.f32 %v5271_v59, %v1216_v9  ;;  %v1790_v42 = vmul.f32 %v1534_v31, %v1534_v31  ;;  %v5108_v47 = vld [vmem:[#allocation10 + $0x10] sm:$0xff]   ;;  %v5438_v46 = vld [vmem:[%s6123_s23 + $0x120] sm:$0xff] }
 0x2a6   : > { %5274 = vrsqrt.f32 %v2154_v45  ;;  %v1026_v22 = vsub.f32 %v898_v11, %v962_v36  ;;  %843 = vadd.xlane.f32.xlu1 %v724_v40  ;;  %v2471_v27 = vadd.f32 %v2407_v49, %v6367_v3  ;;  %v1279_v29 = vmul.f32 %v5273_v17, %v1215_v23  ;;  %v1618_v4 = vpop.xlane.xlu0 %1617  ;;  %v5436_v45 = vld [vmem:[%s6131_s8 + $0x120] sm:$0xff]  ;;  %v5437_v11 = vld [vmem:[%s6123_s23 + $0x128] sm:$0xff]  ;;  %4729 = vmatprep.subr.bf16.mxu0 %v5108_v47 }
 0x2a7   : > { %5276 = vrsqrt.f32 %v2153_v62  ;;  %v2957_v35 = vpack.c.bf16 %v7022_v5, %v7018_v12  ;;  %v1620_v20 = vpop.xlane.xlu1 %1619  ;;  %v1089_v0 = vadd.f32 1e-06, %v1025_v24  ;;  %v1348_v30 = vmul.f32 %v6353_v6, %v1280_v33  ;;  %4967 = vmatprep.subr.bf16.mxu1 %v5108_v47  ;;  %4730 = vmatpush3.bf16.msra.mxu0 %v5108_v47 }
 0x2a8   : > { %v1090_v37 = vadd.f32 1e-06, %v1026_v22  ;;  %v2518_v54 = vpack.c.bf16 %v2472_v14, %v2471_v27  ;;  %v1347_v41 = vmul.f32 %v6353_v6, %v1279_v29  ;;  %v7035_v28 = vmul.f32 0.0078125, %v1620_v20  ;;  %4975 = vmatpush3.bf16.msra.mxu1 %v5108_v47 }
 0x2a9   : > { %1653 = vadd.xlane.f32.xlu0 %v1533_v39  ;;  %v1416_v19 = vadd.f32 %v6367_v3, %v1348_v30  ;;  %v7038_v9 = vmul.f32 0.0078125, %v1618_v4  ;;  %v2282_v36 = vsub.f32 %v5435_v63, %v6991_v25  ;;  %v726_v34 = vmul.f32 %v469_v26, %v469_v26  ;;  %v5109_v4 = vld [vmem:[#allocation10 + $0x18] sm:$0xff]  }
 0x2aa   : > { %5278 = vrsqrt.f32 %v1090_v37  ;;  %2833 = vmatprep.mubr.bf16.mxu0 %v2518_v54  ;;  %1655 = vadd.xlane.f32.xlu1 %v1534_v31  ;;  %v1415_v40 = vadd.f32 %v6367_v3, %v1347_v41  ;;  %v553_v56 = vpop.xlane.xlu0 %552  ;;  %v725_v44 = vmul.f32 %v468_v38, %v468_v38  ;;  %v2281_v53 = vsub.f32 %v5436_v45, %v6994_v15  ;;  %v1536_v45 = vld [vmem:[%s6131_s8 + $0x1d8] sm:$0xff] }
 0x2ab   : > { %5280 = vrsqrt.f32 %v1089_v0  ;;  %v555_v60 = vpop.xlane.xlu1 %554  ;;  %v7044_v43 = vmul.f32 0.0078125, %v553_v56  ;;  %v1218_v61 = vsub.f32 %v5437_v11, %v6998_v21  ;;  %v2028_v49 = vmul.f32 %v7035_v28, %v7035_v28  ;;  %4968 = vmatprep.subr.bf16.mxu1 %v5109_v4  ;;  %4731 = vmatprep.subr.bf16.mxu0 %v5109_v4  ;;  %v5110_v11 = vld [vmem:[#allocation10 + $0x20] sm:$0xff]  }
 0x2ac   : > { %v1462_v10 = vpack.c.bf16 %v1416_v19, %v1415_v40  ;;  %v7040_v23 = vmul.f32 0.0078125, %v555_v60  ;;  %v1217_v7 = vsub.f32 %v5438_v46, %v7000_v13  ;;  %v2027_v14 = vmul.f32 %v7038_v9, %v7038_v9  ;;  %4732 = vmatpush3.bf16.msra.mxu0 %v5109_v4  ;;  %4976 = vmatpush3.bf16.msra.mxu1 %v5109_v4 }
 0x2ad   : > { %588 = vadd.xlane.f32.xlu0 %v468_v38  ;;  %v963_v20 = vmul.f32 %v7044_v43, %v7044_v43  ;;  %4969 = vmatprep.subr.bf16.mxu1 %v5110_v11 }
 0x2ae   : > { %590 = vadd.xlane.f32.xlu1 %v469_v26  ;;  %2834 = vmatmul.mubr.bf16.gmra.mrb[68].mxu0 %v1462_v10  ;;  %v1874_v17 = vpop.xlane.xlu0 %1873  ;;  %v964_v15 = vmul.f32 %v7040_v23, %v7040_v23 }
 0x2af   : > { %v1876_v2 = vpop.xlane.xlu1 %1875  ;;  %v1963_v22 = vmul.f32 0.0078125, %v1874_v17  ;;  %v1535_v17 = vld [vmem:[%s6131_s8 + $0x1d0] sm:$0xff]  ;;  %4733 = vmatprep.subr.bf16.mxu0 %v5110_v11 }
 0x2b0   : > { %v5275_v59 = vpop.eup %5274  ;;  %v1964_v25 = vmul.f32 0.0078125, %v1876_v2  ;;  %4977 = vmatpush3.bf16.msra.mxu1 %v5110_v11  ;;  %4734 = vmatpush3.bf16.msra.mxu0 %v5110_v11 }
 0x2b1   : > { %v5277_v62 = vpop.eup %5276  ;;  %v2346_v27 = vmul.f32 %v5275_v59, %v2282_v36  ;;  %v2731_v29 = vpop.f32.mrb[16].mxu0  ;;  %v2091_v31 = vsub.f32 %v1963_v22, %v2027_v14  ;;  %1909 = vadd.xlane.f32.xlu0 %v1789_v18  ;;  %v471_v22 = vld [vmem:[%s6123_s23 + $0x1d8] sm:$0xff] }
 0x2b2   : > { %v2092_v21 = vsub.f32 %v1964_v25, %v2028_v49  ;;  %1911 = vadd.xlane.f32.xlu1 %v1790_v42  ;;  %v2345_v24 = vmul.f32 %v5277_v62, %v2281_v53  ;;  %v2733_v13 = vpop.f32.mrb[17].mxu0  ;;  %v7062_v41 = vadd.f32 %v2731_v29, %v6864_v16  ;;  %v810_v40 = vpop.xlane.xlu0 %809  ;;  %v470_v29 = vld [vmem:[%s6123_s23 + $0x1d0] sm:$0xff] }
 0x2b3   : > { %v812_v33 = vpop.xlane.xlu1 %811  ;;  %v2410_v37 = vmul.f32 %v2346_v27, %v6353_v6  ;;  %v2734_v0 = vpop.f32.mrb[18].mxu0  ;;  %v2155_v26 = vadd.f32 1e-06, %v2091_v31  ;;  %v899_v38 = vmul.f32 0.0078125, %v810_v40  ;;  %v5111_v27 = vld [vmem:[#allocation10 + $0x28] sm:$0xff]   ;;  %v1792_v31 = vmul.f32 %v1536_v45, %v1536_v45  ;;  %v5439_v13 = vld [vmem:[%s6131_s8 + $0x138] sm:$0xff] }
 0x2b4   : > { %v5279_v54 = vpop.eup %5278  ;;  %v2156_v39 = vadd.f32 1e-06, %v2092_v21  ;;  %v900_v30 = vmul.f32 0.0078125, %v812_v33  ;;  %v2409_v60 = vmul.f32 %v2345_v24, %v6353_v6  ;;  %v7066_v56 = vadd.f32 %v2734_v0, %v6864_v16  ;;  %v2736_v10 = vpop.f32.mrb[19].mxu0  ;;  %4970 = vmatprep.subr.bf16.mxu1 %v5111_v27  ;;  %4735 = vmatprep.subr.bf16.mxu0 %v5111_v27  ;;  %v5112_v0 = vld [vmem:[#allocation10 + $0x30] sm:$0xff]   ;;  %v5440_v40 = vld [vmem:[%s6131_s8 + $0x130] sm:$0xff] }
 0x2b5   : > { %v5281_v19 = vpop.eup %5280  ;;  %v2474_v42 = vadd.f32 %v2410_v37, %v6367_v3  ;;  %v1027_v47 = vsub.f32 %v899_v38, %v963_v20  ;;  %845 = vadd.xlane.f32.xlu0 %v725_v44  ;;  %v1282_v53 = vmul.f32 %v5279_v54, %v1218_v61  ;;  %v2284_v33 = vsub.f32 %v5439_v13, %v7035_v28 }
 0x2b6   : > { %5282 = vrsqrt.f32 %v2156_v39  ;;  %v1028_v18 = vsub.f32 %v900_v30, %v964_v15  ;;  %847 = vadd.xlane.f32.xlu1 %v726_v34  ;;  %v2473_v63 = vadd.f32 %v2409_v60, %v6367_v3  ;;  %v1281_v36 = vmul.f32 %v5281_v19, %v1217_v7  ;;  %v1622_v25 = vpop.xlane.xlu0 %1621  ;;  %4978 = vmatpush3.bf16.msra.mxu1 %v5111_v27 }
 0x2b7   : > { %5284 = vrsqrt.f32 %v2155_v26  ;;  %v1624_v59 = vpop.xlane.xlu1 %1623  ;;  %v1091_v46 = vadd.f32 1e-06, %v1027_v47  ;;  %v1350_v7 = vmul.f32 %v6353_v6, %v1282_v53  ;;  %v7082_v24 = vmul.f32 0.0078125, %v1622_v25  ;;  %4736 = vmatpush3.bf16.msra.mxu0 %v5111_v27  ;;  %4971 = vmatprep.subr.bf16.mxu1 %v5112_v0  ;;  %v5441_v47 = vld [vmem:[%s6123_s23 + $0x138] sm:$0xff] }
 0x2b8   : > { %v1092_v49 = vadd.f32 1e-06, %v1028_v18  ;;  %v2519_v34 = vpack.c.bf16 %v2474_v42, %v2473_v63  ;;  %v1349_v62 = vmul.f32 %v6353_v6, %v1281_v36  ;;  %v7079_v15 = vmul.f32 0.0078125, %v1624_v59  ;;  %4737 = vmatprep.subr.bf16.mxu0 %v5112_v0  ;;  %v5442_v59 = vld [vmem:[%s6123_s23 + $0x130] sm:$0xff] }
 0x2b9   : > { %1657 = vadd.xlane.f32.xlu0 %v1535_v17  ;;  %v1418_v14 = vadd.f32 %v6367_v3, %v1350_v7  ;;  %v1791_v39 = vmul.f32 %v1535_v17, %v1535_v17  ;;  %v2283_v60 = vsub.f32 %v5440_v40, %v7038_v9  ;;  %v728_v38 = vmul.f32 %v471_v22, %v471_v22 }
 0x2ba   : > { %5286 = vrsqrt.f32 %v1092_v49  ;;  %2841 = vmatprep.mubr.bf16.mxu0 %v2519_v34  ;;  %1659 = vadd.xlane.f32.xlu1 %v1536_v45  ;;  %v1417_v44 = vadd.f32 %v6367_v3, %v1349_v62  ;;  %v557_v21 = vpop.xlane.xlu0 %556  ;;  %v2030_v19 = vmul.f32 %v7079_v15, %v7079_v15  ;;  %v2029_v42 = vmul.f32 %v7082_v24, %v7082_v24 }
 0x2bb   : > { %5288 = vrsqrt.f32 %v1091_v46  ;;  %v559_v61 = vpop.xlane.xlu1 %558  ;;  %v7088_v4 = vmul.f32 0.0078125, %v557_v21  ;;  %v727_v63 = vmul.f32 %v470_v29, %v470_v29  ;;  %v1220_v9 = vsub.f32 %v5441_v47, %v7040_v23  ;;  %v5113_v23 = vld [vmem:[#allocation10 + $0x38] sm:$0xff]   ;;  %4979 = vmatpush3.bf16.msra.mxu1 %v5112_v0  ;;  %4738 = vmatpush3.bf16.msra.mxu0 %v5112_v0 }
 0x2bc   : > { %v1463_v20 = vpack.c.bf16 %v1418_v14, %v1417_v44  ;;  %v7086_v37 = vmul.f32 0.0078125, %v559_v61  ;;  %v1219_v45 = vsub.f32 %v5442_v59, %v7044_v43  ;;  %4972 = vmatprep.subr.bf16.mxu1 %v5113_v23  ;;  %4739 = vmatprep.subr.bf16.mxu0 %v5113_v23 }
 0x2bd   : > { %592 = vadd.xlane.f32.xlu0 %v470_v29  ;;  %v965_v34 = vmul.f32 %v7088_v4, %v7088_v4 }
 0x2be   : > { %594 = vadd.xlane.f32.xlu1 %v471_v22  ;;  %2842 = vmatmul.mubr.bf16.gmra.mrb[72].mxu0 %v1463_v20  ;;  %v1878_v28 = vpop.xlane.xlu0 %1877  ;;  %v966_v25 = vmul.f32 %v7086_v37, %v7086_v37 }
 0x2bf   : > { %v1880_v54 = vpop.xlane.xlu1 %1879  ;;  %v1965_v18 = vmul.f32 0.0078125, %v1878_v28  ;;  %4980 = vmatpush3.bf16.msra.mxu1 %v5113_v23  ;;  %4740 = vmatpush3.bf16.msra.mxu0 %v5113_v23 }
 0x2c0   : > { %v5283_v30 = vpop.eup %5282  ;;  %v1966_v26 = vmul.f32 0.0078125, %v1880_v54 }
 0x2c1   : > { %v5285_v10 = vpop.eup %5284  ;;  %v2348_v36 = vmul.f32 %v5283_v30, %v2284_v33  ;;  %v2739_v11 = vpop.f32.mrb[20].mxu0  ;;  %v2093_v17 = vsub.f32 %v1965_v18, %v2029_v42  ;;  %1913 = vadd.xlane.f32.xlu0 %v1791_v39 }
 0x2c2   : > { %v2094_v53 = vsub.f32 %v1966_v26, %v2030_v19  ;;  %1915 = vadd.xlane.f32.xlu1 %v1792_v31  ;;  %v2347_v49 = vmul.f32 %v5285_v10, %v2283_v60  ;;  %v2741_v62 = vpop.f32.mrb[21].mxu0  ;;  %v7106_v43 = vadd.f32 %v2739_v11, %v6864_v16  ;;  %v814_v27 = vpop.xlane.xlu0 %813  ;;  %v1538_v26 = vld [vmem:[%s6131_s8 + $0x1e8] sm:$0xff] }
 0x2c3   : > { %v816_v46 = vpop.xlane.xlu1 %815  ;;  %v2412_v7 = vmul.f32 %v2348_v36, %v6353_v6  ;;  %v2742_v14 = vpop.f32.mrb[22].mxu0  ;;  %v2157_v20 = vadd.f32 1e-06, %v2093_v17  ;;  %v901_v13 = vmul.f32 0.0078125, %v814_v27  ;;  %v1537_v36 = vld [vmem:[%s6131_s8 + $0x1e0] sm:$0xff]  ;;  %v1794_v62 = vmul.f32 %v1538_v26, %v1538_v26 }
 0x2c4   : > { %v5287_v44 = vpop.eup %5286  ;;  %v2158_v61 = vadd.f32 1e-06, %v2094_v53  ;;  %v902_v22 = vmul.f32 0.0078125, %v816_v46  ;;  %v2411_v21 = vmul.f32 %v2347_v49, %v6353_v6  ;;  %v7110_v31 = vadd.f32 %v2742_v14, %v6864_v16  ;;  %v2744_v33 = vpop.f32.mrb[23].mxu0  ;;  %v473_v53 = vld [vmem:[%s6123_s23 + $0x1e8] sm:$0xff]  ;;  %v5444_v27 = vld [vmem:[%s6131_s8 + $0x140] sm:$0xff] }
 0x2c5   : > { %v5289_v29 = vpop.eup %5288  ;;  %v2476_v54 = vadd.f32 %v2412_v7, %v6367_v3  ;;  %v1029_v60 = vsub.f32 %v901_v13, %v965_v34  ;;  %849 = vadd.xlane.f32.xlu0 %v727_v63  ;;  %v1284_v28 = vmul.f32 %v5287_v44, %v1220_v9  ;;  %v5443_v46 = vld [vmem:[%s6131_s8 + $0x148] sm:$0xff]  ;;  %v1793_v14 = vmul.f32 %v1537_v36, %v1537_v36 }
 0x2c6   : > { %5290 = vrsqrt.f32 %v2158_v61  ;;  %v1030_v39 = vsub.f32 %v902_v22, %v966_v25  ;;  %851 = vadd.xlane.f32.xlu1 %v728_v38  ;;  %v2475_v30 = vadd.f32 %v2411_v21, %v6367_v3  ;;  %v1283_v40 = vmul.f32 %v5289_v29, %v1219_v45  ;;  %v1626_v42 = vpop.xlane.xlu0 %1625  ;;  %v472_v25 = vld [vmem:[%s6123_s23 + $0x1e0] sm:$0xff] }
 0x2c7   : > { %5292 = vrsqrt.f32 %v2157_v20  ;;  %v1628_v19 = vpop.xlane.xlu1 %1627  ;;  %v1093_v38 = vadd.f32 1e-06, %v1029_v60  ;;  %v1352_v59 = vmul.f32 %v6353_v6, %v1284_v28  ;;  %v7126_v34 = vmul.f32 0.0078125, %v1626_v42  ;;  %v5445_v60 = vld [vmem:[%s6123_s23 + $0x148] sm:$0xff] }
 0x2c8   : > { %v1094_v10 = vadd.f32 1e-06, %v1030_v39  ;;  %v2520_v18 = vpack.c.bf16 %v2476_v54, %v2475_v30  ;;  %v1351_v47 = vmul.f32 %v6353_v6, %v1283_v40  ;;  %v7123_v11 = vmul.f32 0.0078125, %v1628_v19 }
 0x2c9   : > { %1661 = vadd.xlane.f32.xlu0 %v1537_v36  ;;  %v1420_v45 = vadd.f32 %v6367_v3, %v1352_v59  ;;  %v2286_v7 = vsub.f32 %v5443_v46, %v7079_v15  ;;  %v2285_v21 = vsub.f32 %v5444_v27, %v7082_v24  ;;  %v730_v15 = vmul.f32 %v473_v53, %v473_v53 }
 0x2ca   : > { %5294 = vrsqrt.f32 %v1094_v10  ;;  %2849 = vmatprep.mubr.bf16.mxu0 %v2520_v18  ;;  %1663 = vadd.xlane.f32.xlu1 %v1538_v26  ;;  %v1419_v63 = vadd.f32 %v6367_v3, %v1351_v47  ;;  %v561_v49 = vpop.xlane.xlu0 %560  ;;  %v2032_v29 = vmul.f32 %v7123_v11, %v7123_v11  ;;  %v2031_v54 = vmul.f32 %v7126_v34, %v7126_v34  ;;  %v5446_v26 = vld [vmem:[%s6123_s23 + $0x140] sm:$0xff] }
 0x2cb   : > { %5296 = vrsqrt.f32 %v1093_v38  ;;  %v563_v9 = vpop.xlane.xlu1 %562  ;;  %v7132_v44 = vmul.f32 0.0078125, %v561_v49  ;;  %v729_v30 = vmul.f32 %v472_v25, %v472_v25  ;;  %v1222_v19 = vsub.f32 %v5445_v60, %v7086_v37 }
 0x2cc   : > { %v1464_v17 = vpack.c.bf16 %v1420_v45, %v1419_v63  ;;  %v7130_v23 = vmul.f32 0.0078125, %v563_v9  ;;  %v1221_v28 = vsub.f32 %v5446_v26, %v7088_v4  ;;  %v1539_v26 = vld [vmem:[%s6131_s8 + $0x1f0] sm:$0xff]  ;;  %v8004_v52 = vpack.c.bf16 %v7110_v31, %v7106_v43 }
 0x2cd   : > { %596 = vadd.xlane.f32.xlu0 %v472_v25  ;;  %v967_v36 = vmul.f32 %v7132_v44, %v7132_v44 }
 0x2ce   : > { %598 = vadd.xlane.f32.xlu1 %v473_v53  ;;  %2850 = vmatmul.mubr.bf16.gmra.mrb[76].mxu0 %v1464_v17  ;;  %v1882_v13 = vpop.xlane.xlu0 %1881  ;;  %v968_v18 = vmul.f32 %v7130_v23, %v7130_v23 }
 0x2cf   : > { %v1884_v61 = vpop.xlane.xlu1 %1883  ;;  %v1967_v39 = vmul.f32 0.0078125, %v1882_v13 }
 0x2d0   : > { %v5291_v22 = vpop.eup %5290  ;;  %v1968_v20 = vmul.f32 0.0078125, %v1884_v61 }
 0x2d1   : > { %v5293_v33 = vpop.eup %5292  ;;  %v2350_v40 = vmul.f32 %v5291_v22, %v2286_v7  ;;  %v2747_v10 = vpop.f32.mrb[24].mxu0  ;;  %v2095_v47 = vsub.f32 %v1967_v39, %v2031_v54  ;;  %1917 = vadd.xlane.f32.xlu0 %v1793_v14 }
 0x2d2   : > { %v2096_v24 = vsub.f32 %v1968_v20, %v2032_v29  ;;  %1919 = vadd.xlane.f32.xlu1 %v1794_v62  ;;  %v2349_v42 = vmul.f32 %v5293_v33, %v2285_v21  ;;  %v2749_v38 = vpop.f32.mrb[25].mxu0  ;;  %v7150_v4 = vadd.f32 %v2747_v10, %v6864_v16  ;;  %v818_v49 = vpop.xlane.xlu0 %817  ;;  %v1540_v33 = vld [vmem:[%s6131_s8 + $0x1f8] sm:$0xff] }
 0x2d3   : > { %v820_v59 = vpop.xlane.xlu1 %819  ;;  %v2414_v63 = vmul.f32 %v2350_v40, %v6353_v6  ;;  %v2750_v45 = vpop.f32.mrb[26].mxu0  ;;  %v2159_v62 = vadd.f32 1e-06, %v2095_v47  ;;  %v903_v7 = vmul.f32 0.0078125, %v818_v49  ;;  %v474_v47 = vld [vmem:[%s6123_s23 + $0x1f0] sm:$0xff] }
 0x2d4   : > { %v5295_v37 = vpop.eup %5294  ;;  %v2160_v9 = vadd.f32 1e-06, %v2096_v24  ;;  %v904_v53 = vmul.f32 0.0078125, %v820_v59  ;;  %v2413_v25 = vmul.f32 %v2349_v42, %v6353_v6  ;;  %v7154_v46 = vadd.f32 %v2750_v45, %v6864_v16  ;;  %v2752_v61 = vpop.f32.mrb[27].mxu0  ;;  %v475_v42 = vld [vmem:[%s6123_s23 + $0x1f8] sm:$0xff] }
 0x2d5   : > { %v5297_v17 = vpop.eup %5296  ;;  %v2478_v14 = vadd.f32 %v2414_v63, %v6367_v3  ;;  %v1031_v20 = vsub.f32 %v903_v7, %v967_v36  ;;  %853 = vadd.xlane.f32.xlu0 %v729_v30  ;;  %v1286_v54 = vmul.f32 %v5295_v37, %v1222_v19  ;;  %v1796_v37 = vmul.f32 %v1540_v33, %v1540_v33  ;;  %v5448_v7 = vld [vmem:[%s6131_s8 + $0x150] sm:$0xff] }
 0x2d6   : > { %5298 = vrsqrt.f32 %v2160_v9  ;;  %v1032_v22 = vsub.f32 %v904_v53, %v968_v18  ;;  %855 = vadd.xlane.f32.xlu1 %v730_v15  ;;  %v2477_v27 = vadd.f32 %v2413_v25, %v6367_v3  ;;  %v1285_v21 = vmul.f32 %v5297_v17, %v1221_v28  ;;  %v1630_v40 = vpop.xlane.xlu0 %1629  ;;  %v5447_v9 = vld [vmem:[%s6131_s8 + $0x158] sm:$0xff] }
 0x2d7   : > { %5300 = vrsqrt.f32 %v2159_v62  ;;  %v1632_v13 = vpop.xlane.xlu1 %1631  ;;  %v1095_v24 = vadd.f32 1e-06, %v1031_v20  ;;  %v1354_v28 = vmul.f32 %v6353_v6, %v1286_v54  ;;  %v7170_v38 = vmul.f32 0.0078125, %v1630_v40 }
 0x2d8   : > { %v1096_v39 = vadd.f32 1e-06, %v1032_v22  ;;  %v2521_v60 = vpack.c.bf16 %v2478_v14, %v2477_v27  ;;  %v1353_v15 = vmul.f32 %v6353_v6, %v1285_v21  ;;  %v7167_v18 = vmul.f32 0.0078125, %v1632_v13 }
 0x2d9   : > { %1665 = vadd.xlane.f32.xlu0 %v1539_v26  ;;  %v1422_v10 = vadd.f32 %v6367_v3, %v1354_v28  ;;  %v2288_v45 = vsub.f32 %v5447_v9, %v7123_v11  ;;  %v1795_v25 = vmul.f32 %v1539_v26, %v1539_v26  ;;  %v732_v17 = vmul.f32 %v475_v42, %v475_v42  ;;  %v5449_v11 = vld [vmem:[%s6123_s23 + $0x158] sm:$0xff] }
 0x2da   : > { %5302 = vrsqrt.f32 %v1096_v39  ;;  %2857 = vmatprep.mubr.bf16.mxu0 %v2521_v60  ;;  %1667 = vadd.xlane.f32.xlu1 %v1540_v33  ;;  %v1421_v30 = vadd.f32 %v6367_v3, %v1353_v15  ;;  %v565_v36 = vpop.xlane.xlu0 %564  ;;  %v2287_v61 = vsub.f32 %v5448_v7, %v7126_v34  ;;  %v2034_v14 = vmul.f32 %v7167_v18, %v7167_v18  ;;  %v5450_v60 = vld [vmem:[%s6123_s23 + $0x150] sm:$0xff] }
 0x2db   : > { %5304 = vrsqrt.f32 %v1095_v24  ;;  %v567_v19 = vpop.xlane.xlu1 %566  ;;  %v7176_v53 = vmul.f32 0.0078125, %v565_v36  ;;  %v731_v21 = vmul.f32 %v474_v47, %v474_v47  ;;  %v1224_v13 = vsub.f32 %v5449_v11, %v7130_v23 }
 0x2dc   : > { %v1465_v59 = vpack.c.bf16 %v1422_v10, %v1421_v30  ;;  %v7172_v63 = vmul.f32 0.0078125, %v567_v19  ;;  %v2033_v33 = vmul.f32 %v7170_v38, %v7170_v38  ;;  %v1223_v26 = vsub.f32 %v5450_v60, %v7132_v44 }
 0x2dd   : > { %600 = vadd.xlane.f32.xlu0 %v474_v47  ;;  %v969_v30 = vmul.f32 %v7176_v53, %v7176_v53 }
 0x2de   : > { %602 = vadd.xlane.f32.xlu1 %v475_v42  ;;  %2858 = vmatmul.mubr.bf16.gmra.mrb[80].mxu0 %v1465_v59  ;;  %v1886_v27 = vpop.xlane.xlu0 %1885  ;;  %v970_v34 = vmul.f32 %v7172_v63, %v7172_v63 }
 0x2df   : > { %v1888_v49 = vpop.xlane.xlu1 %1887  ;;  %v1969_v54 = vmul.f32 0.0078125, %v1886_v27 }
 0x2e0   : > { %v5299_v62 = vpop.eup %5298  ;;  %v1970_v22 = vmul.f32 0.0078125, %v1888_v49 }
 0x2e1   : > { %v5301_v20 = vpop.eup %5300  ;;  %v2755_v39 = vpop.f32.mrb[28].mxu0  ;;  %v2352_v40 = vmul.f32 %v5299_v62, %v2288_v45  ;;  %v2097_v23 = vsub.f32 %v1969_v54, %v2033_v33  ;;  %1921 = vadd.xlane.f32.xlu0 %v1795_v25 }
 0x2e2   : > { %v2098_v15 = vsub.f32 %v1970_v22, %v2034_v14  ;;  %v2757_v24 = vpop.f32.mrb[29].mxu0  ;;  %1923 = vadd.xlane.f32.xlu1 %v1796_v37  ;;  %v2351_v28 = vmul.f32 %v5301_v20, %v2287_v61  ;;  %v7193_v19 = vadd.f32 %v2755_v39, %v6864_v16  ;;  %v822_v37 = vpop.xlane.xlu0 %821 }
 0x2e3   : > { %v2758_v10 = vpop.f32.mrb[30].mxu0  ;;  %v824_v42 = vpop.xlane.xlu1 %823  ;;  %v2416_v36 = vmul.f32 %v2352_v40, %v6353_v6  ;;  %v2161_v7 = vadd.f32 1e-06, %v2097_v23  ;;  %v905_v61 = vmul.f32 0.0078125, %v822_v37  ;;  %v5452_v37 = vld [vmem:[%s6131_s8 + $0x160] sm:$0xff] }
 0x2e4   : > { %v5303_v44 = vpop.eup %5302  ;;  %v2162_v47 = vadd.f32 1e-06, %v2098_v15  ;;  %v7197_v59 = vadd.f32 %v2758_v10, %v6864_v16  ;;  %v906_v9 = vmul.f32 0.0078125, %v824_v42  ;;  %v2760_v45 = vpop.f32.mrb[31].mxu0  ;;  %v2415_v49 = vmul.f32 %v2351_v28, %v6353_v6  ;;  %v5451_v42 = vld [vmem:[%s6131_s8 + $0x168] sm:$0xff] }
 0x2e5   : > { %v5305_v62 = vpop.eup %5304  ;;  %v2480_v14 = vadd.f32 %v2416_v36, %v6367_v3  ;;  %v1288_v25 = vmul.f32 %v5303_v44, %v1224_v13  ;;  %v1033_v11 = vsub.f32 %v905_v61, %v969_v30  ;;  %857 = vadd.xlane.f32.xlu0 %v731_v21  ;;  %v2290_v36 = vsub.f32 %v5451_v42, %v7167_v18 }
 0x2e6   : > { %5306 = vrsqrt.f32 %v2162_v47  ;;  %v1034_v27 = vsub.f32 %v906_v9, %v970_v34  ;;  %859 = vadd.xlane.f32.xlu1 %v732_v17  ;;  %v2479_v20 = vadd.f32 %v2415_v49, %v6367_v3  ;;  %v1287_v54 = vmul.f32 %v5305_v62, %v1223_v26  ;;  %v1634_v60 = vpop.xlane.xlu0 %1633 }
 0x2e7   : > { %5308 = vrsqrt.f32 %v2161_v7  ;;  %v1636_v33 = vpop.xlane.xlu1 %1635  ;;  %v1356_v39 = vmul.f32 %v6353_v6, %v1288_v25  ;;  %v1097_v13 = vadd.f32 1e-06, %v1033_v11  ;;  %v7210_v30 = vmul.f32 0.0078125, %v1634_v60 }
 0x2e8   : > { %v1098_v40 = vadd.f32 1e-06, %v1034_v27  ;;  %v2522_v15 = vpack.c.bf16 %v2480_v14, %v2479_v20  ;;  %v1355_v24 = vmul.f32 %v6353_v6, %v1287_v54  ;;  %v7208_v34 = vmul.f32 0.0078125, %v1636_v33  ;;  %v5453_v14 = vld [vmem:[%s6123_s23 + $0x168] sm:$0xff]  ;;  %v5454_v33 = vld [vmem:[%s6123_s23 + $0x160] sm:$0xff] }
 0x2e9   : > { %v1424_v28 = vadd.f32 %v6367_v3, %v1356_v39  ;;  %v2289_v45 = vsub.f32 %v5452_v37, %v7170_v38  ;;  %v1226_v25 = vsub.f32 %v5453_v14, %v7172_v63  ;;  %v2035_v18 = vmul.f32 %v7210_v30, %v7210_v30 }
 0x2ea   : > { %5310 = vrsqrt.f32 %v1098_v40  ;;  %2865 = vmatprep.mubr.bf16.mxu0 %v2522_v15  ;;  %v1423_v21 = vadd.f32 %v6367_v3, %v1355_v24  ;;  %v569_v26 = vpop.xlane.xlu0 %568  ;;  %v2036_v49 = vmul.f32 %v7208_v34, %v7208_v34  ;;  %v1225_v54 = vsub.f32 %v5454_v33, %v7176_v53 }
 0x2eb   : > { %5312 = vrsqrt.f32 %v1097_v13  ;;  %v571_v17 = vpop.xlane.xlu1 %570  ;;  %v7216_v44 = vmul.f32 0.0078125, %v569_v26  ;;  %v8006_v12 = vpack.c.bf16 %v7197_v59, %v7193_v19 }
 0x2ec   : > { %v1466_v23 = vpack.c.bf16 %v1424_v28, %v1423_v21  ;;  %v7212_v10 = vmul.f32 0.0078125, %v571_v17 }
 0x2ed   : > { %v971_v15 = vmul.f32 %v7216_v44, %v7216_v44 }
 0x2ee   : > { %2866 = vmatmul.mubr.bf16.gmra.mrb[84].mxu0 %v1466_v23  ;;  %v1890_v7 = vpop.xlane.xlu0 %1889  ;;  %v972_v38 = vmul.f32 %v7212_v10, %v7212_v10 }
 0x2ef   : > { %v1892_v47 = vpop.xlane.xlu1 %1891  ;;  %v1971_v27 = vmul.f32 0.0078125, %v1890_v7 }
 0x2f0   : > { %v5307_v9 = vpop.eup %5306  ;;  %v1972_v62 = vmul.f32 0.0078125, %v1892_v47 }
 0x2f1   : > { %v5309_v61 = vpop.eup %5308  ;;  %v2763_v20 = vpop.f32.mrb[32].mxu0  ;;  %v2354_v11 = vmul.f32 %v5307_v9, %v2290_v36  ;;  %v2099_v13 = vsub.f32 %v1971_v27, %v2035_v18 }
 0x2f2   : > { %v2100_v39 = vsub.f32 %v1972_v62, %v2036_v49  ;;  %v2765_v40 = vpop.f32.mrb[33].mxu0  ;;  %v2353_v60 = vmul.f32 %v5309_v61, %v2289_v45  ;;  %v7233_v63 = vadd.f32 %v2763_v20, %v6864_v16  ;;  %v826_v42 = vpop.xlane.xlu0 %825 }
 0x2f3   : > { %v2766_v24 = vpop.f32.mrb[34].mxu0  ;;  %v828_v28 = vpop.xlane.xlu1 %827  ;;  %v2418_v17 = vmul.f32 %v2354_v11, %v6353_v6  ;;  %v2163_v37 = vadd.f32 1e-06, %v2099_v13  ;;  %v907_v45 = vmul.f32 0.0078125, %v826_v42 }
 0x2f4   : > { %v5311_v21 = vpop.eup %5310  ;;  %v2164_v26 = vadd.f32 1e-06, %v2100_v39  ;;  %v7237_v53 = vadd.f32 %v2766_v24, %v6864_v16  ;;  %v908_v23 = vmul.f32 0.0078125, %v828_v28  ;;  %v2768_v36 = vpop.f32.mrb[35].mxu0  ;;  %v2417_v47 = vmul.f32 %v2353_v60, %v6353_v6 }
 0x2f5   : > { %v5313_v9 = vpop.eup %5312  ;;  %v2482_v49 = vadd.f32 %v2418_v17, %v6367_v3  ;;  %v1290_v62 = vmul.f32 %v5311_v21, %v1226_v25  ;;  %v1035_v18 = vsub.f32 %v907_v45, %v971_v15 }
 0x2f6   : > { %5314 = vrsqrt.f32 %v2164_v26  ;;  %v1036_v61 = vsub.f32 %v908_v23, %v972_v38  ;;  %v2481_v14 = vadd.f32 %v2417_v47, %v6367_v3  ;;  %v1289_v20 = vmul.f32 %v5313_v9, %v1225_v54  ;;  %v1638_v39 = vpop.xlane.xlu0 %1637  ;;  %v5455_v26 = vld [vmem:[%s6131_s8 + $0x178] sm:$0xff]  ;;  %v5456_v9 = vld [vmem:[%s6131_s8 + $0x170] sm:$0xff] }
 0x2f7   : > { %5316 = vrsqrt.f32 %v2163_v37  ;;  %v1640_v27 = vpop.xlane.xlu1 %1639  ;;  %v1358_v11 = vmul.f32 %v6353_v6, %v1290_v62  ;;  %v1099_v60 = vadd.f32 1e-06, %v1035_v18  ;;  %v7250_v28 = vmul.f32 0.0078125, %v1638_v39 }
 0x2f8   : > { %v1100_v33 = vadd.f32 1e-06, %v1036_v61  ;;  %v2523_v40 = vpack.c.bf16 %v2482_v49, %v2481_v14  ;;  %v1357_v25 = vmul.f32 %v6353_v6, %v1289_v20  ;;  %v7248_v24 = vmul.f32 0.0078125, %v1640_v27  ;;  %v5457_v14 = vld [vmem:[%s6123_s23 + $0x178] sm:$0xff] }
 0x2f9   : > { %v1426_v13 = vadd.f32 %v6367_v3, %v1358_v11  ;;  %v2292_v23 = vsub.f32 %v5455_v26, %v7208_v34  ;;  %v2291_v37 = vsub.f32 %v5456_v9, %v7210_v30  ;;  %v1228_v18 = vsub.f32 %v5457_v14, %v7212_v10 }
 0x2fa   : > { %5318 = vrsqrt.f32 %v1100_v33  ;;  %2873 = vmatprep.mubr.bf16.mxu0 %v2523_v40  ;;  %v1425_v15 = vadd.f32 %v6367_v3, %v1357_v25  ;;  %v573_v54 = vpop.xlane.xlu0 %572  ;;  %v2038_v45 = vmul.f32 %v7248_v24, %v7248_v24  ;;  %v2037_v34 = vmul.f32 %v7250_v28, %v7250_v28  ;;  %v5458_v33 = vld [vmem:[%s6123_s23 + $0x170] sm:$0xff] }
 0x2fb   : > { %5320 = vrsqrt.f32 %v1099_v60  ;;  %v575_v38 = vpop.xlane.xlu1 %574  ;;  %v7256_v42 = vmul.f32 0.0078125, %v573_v54  ;;  %v1227_v39 = vsub.f32 %v5458_v33, %v7216_v44  ;;  %v8007_v5 = vpack.c.bf16 %v7237_v53, %v7233_v63 }
 0x2fc   : > { %v1467_v17 = vpack.c.bf16 %v1426_v13, %v1425_v15  ;;  %v7252_v21 = vmul.f32 0.0078125, %v575_v38 }
 0x2fd   : > { %v973_v13 = vmul.f32 %v7256_v42, %v7256_v42 }
 0x2fe   : > { %2874 = vmatmul.mubr.bf16.gmra.mrb[88].mxu0 %v1467_v17  ;;  %v1894_v62 = vpop.xlane.xlu0 %1893  ;;  %v974_v30 = vmul.f32 %v7252_v21, %v7252_v21 }
 0x2ff   : > { %v1896_v36 = vpop.xlane.xlu1 %1895  ;;  %v1973_v27 = vmul.f32 0.0078125, %v1894_v62 }
 0x300   : > { %v5315_v47 = vpop.eup %5314  ;;  %v1974_v49 = vmul.f32 0.0078125, %v1896_v36 }
 0x301   : > { %v5317_v61 = vpop.eup %5316  ;;  %v2771_v20 = vpop.f32.mrb[36].mxu0  ;;  %v2356_v11 = vmul.f32 %v5315_v47, %v2292_v23  ;;  %v2101_v38 = vsub.f32 %v1973_v27, %v2037_v34 }
 0x302   : > { %v2102_v40 = vsub.f32 %v1974_v49, %v2038_v45  ;;  %v2773_v60 = vpop.f32.mrb[37].mxu0  ;;  %v2355_v25 = vmul.f32 %v5317_v61, %v2291_v37  ;;  %v7273_v10 = vadd.f32 %v2771_v20, %v6864_v16  ;;  %v830_v47 = vpop.xlane.xlu0 %829 }
 0x303   : > { %v2774_v15 = vpop.f32.mrb[38].mxu0  ;;  %v832_v54 = vpop.xlane.xlu1 %831  ;;  %v2420_v17 = vmul.f32 %v2356_v11, %v6353_v6  ;;  %v2165_v49 = vadd.f32 1e-06, %v2101_v38  ;;  %v909_v62 = vmul.f32 0.0078125, %v830_v47 }
 0x304   : > { %v5319_v26 = vpop.eup %5318  ;;  %v2166_v23 = vadd.f32 1e-06, %v2102_v40  ;;  %v7277_v44 = vadd.f32 %v2774_v15, %v6864_v16  ;;  %v910_v36 = vmul.f32 0.0078125, %v832_v54  ;;  %v2776_v9 = vpop.f32.mrb[39].mxu0  ;;  %v2419_v37 = vmul.f32 %v2355_v25, %v6353_v6 }
 0x305   : > { %v5321_v45 = vpop.eup %5320  ;;  %v2484_v61 = vadd.f32 %v2420_v17, %v6367_v3  ;;  %v1292_v14 = vmul.f32 %v5319_v26, %v1228_v18  ;;  %v1037_v11 = vsub.f32 %v909_v62, %v973_v13  ;;  %v5459_v9 = vld [vmem:[%s6131_s8 + $0x188] sm:$0xff] }
 0x306   : > { %5322 = vrsqrt.f32 %v2166_v23  ;;  %v1038_v27 = vsub.f32 %v910_v36, %v974_v30  ;;  %v2483_v20 = vadd.f32 %v2419_v37, %v6367_v3  ;;  %v1291_v40 = vmul.f32 %v5321_v45, %v1227_v39  ;;  %v1642_v38 = vpop.xlane.xlu0 %1641 }
 0x307   : > { %5324 = vrsqrt.f32 %v2165_v49  ;;  %v1644_v33 = vpop.xlane.xlu1 %1643  ;;  %v1360_v60 = vmul.f32 %v6353_v6, %v1292_v14  ;;  %v1101_v54 = vadd.f32 1e-06, %v1037_v11  ;;  %v7290_v23 = vmul.f32 0.0078125, %v1642_v38 }
 0x308   : > { %v1102_v25 = vadd.f32 1e-06, %v1038_v27  ;;  %v2524_v15 = vpack.c.bf16 %v2484_v61, %v2483_v20  ;;  %v1359_v18 = vmul.f32 %v6353_v6, %v1291_v40  ;;  %v7288_v26 = vmul.f32 0.0078125, %v1644_v33  ;;  %v5460_v61 = vld [vmem:[%s6131_s8 + $0x180] sm:$0xff]  ;;  %v5461_v40 = vld [vmem:[%s6123_s23 + $0x188] sm:$0xff] }
 0x309   : > { %v1428_v17 = vadd.f32 %v6367_v3, %v1360_v60  ;;  %v2294_v37 = vsub.f32 %v5459_v9, %v7248_v24  ;;  %v2293_v14 = vsub.f32 %v5460_v61, %v7250_v28  ;;  %v1230_v60 = vsub.f32 %v5461_v40, %v7252_v21 }
 0x30a   : > { %5326 = vrsqrt.f32 %v1102_v25  ;;  %2881 = vmatprep.mubr.bf16.mxu0 %v2524_v15  ;;  %v1427_v13 = vadd.f32 %v6367_v3, %v1359_v18  ;;  %v577_v39 = vpop.xlane.xlu0 %576  ;;  %v2040_v27 = vmul.f32 %v7288_v26, %v7288_v26  ;;  %v2039_v24 = vmul.f32 %v7290_v23, %v7290_v23 }
 0x30b   : > { %5328 = vrsqrt.f32 %v1101_v54  ;;  %v579_v30 = vpop.xlane.xlu1 %578  ;;  %v7296_v45 = vmul.f32 0.0078125, %v577_v39  ;;  %v5462_v54 = vld [vmem:[%s6123_s23 + $0x180] sm:$0xff] }
 0x30c   : > { %v1468_v36 = vpack.c.bf16 %v1428_v17, %v1427_v13  ;;  %v7292_v47 = vmul.f32 0.0078125, %v579_v30  ;;  %v1229_v18 = vsub.f32 %v5462_v54, %v7256_v42 }
 0x30d   : > { %v975_v39 = vmul.f32 %v7296_v45, %v7296_v45 }
 0x30e   : > { %2882 = vmatmul.mubr.bf16.gmra.mrb[92].mxu0 %v1468_v36  ;;  %v1898_v11 = vpop.xlane.xlu0 %1897  ;;  %v976_v28 = vmul.f32 %v7292_v47, %v7292_v47 }
 0x30f   : > { %v1900_v49 = vpop.xlane.xlu1 %1899  ;;  %v1975_v25 = vmul.f32 0.0078125, %v1898_v11 }
 0x310   : > { %v5323_v62 = vpop.eup %5322  ;;  %v1976_v20 = vmul.f32 0.0078125, %v1900_v49 }
 0x311   : > { %v5325_v33 = vpop.eup %5324  ;;  %v2779_v38 = vpop.f32.mrb[40].mxu0  ;;  %v2358_v15 = vmul.f32 %v5323_v62, %v2294_v37  ;;  %v2103_v36 = vsub.f32 %v1975_v25, %v2039_v24 }
 0x312   : > { %v2104_v17 = vsub.f32 %v1976_v20, %v2040_v27  ;;  %v2781_v30 = vpop.f32.mrb[41].mxu0  ;;  %v2357_v13 = vmul.f32 %v5325_v33, %v2293_v14  ;;  %v7313_v21 = vadd.f32 %v2779_v38, %v6864_v16  ;;  %v834_v27 = vpop.xlane.xlu0 %833 }
 0x313   : > { %v2782_v9 = vpop.f32.mrb[42].mxu0  ;;  %v836_v49 = vpop.xlane.xlu1 %835  ;;  %v2422_v37 = vmul.f32 %v2358_v15, %v6353_v6  ;;  %v2167_v40 = vadd.f32 1e-06, %v2103_v36  ;;  %v911_v24 = vmul.f32 0.0078125, %v834_v27 }
 0x314   : > { %v5327_v62 = vpop.eup %5326  ;;  %v2168_v61 = vadd.f32 1e-06, %v2104_v17  ;;  %v7317_v42 = vadd.f32 %v2782_v9, %v6864_v16  ;;  %v912_v11 = vmul.f32 0.0078125, %v836_v49  ;;  %v2784_v20 = vpop.f32.mrb[43].mxu0  ;;  %v2421_v14 = vmul.f32 %v2357_v13, %v6353_v6 }
 0x315   : > { %v5329_v33 = vpop.eup %5328  ;;  %v2486_v25 = vadd.f32 %v2422_v37, %v6367_v3  ;;  %v1294_v38 = vmul.f32 %v5327_v62, %v1230_v60  ;;  %v1039_v30 = vsub.f32 %v911_v24, %v975_v39 }
 0x316   : > { %5330 = vrsqrt.f32 %v2168_v61  ;;  %v1040_v54 = vsub.f32 %v912_v11, %v976_v28  ;;  %v2485_v17 = vadd.f32 %v2421_v14, %v6367_v3  ;;  %v1293_v49 = vmul.f32 %v5329_v33, %v1229_v18  ;;  %v1646_v36 = vpop.xlane.xlu0 %1645  ;;  %v5463_v33 = vld [vmem:[%s6131_s8 + $0x198] sm:$0xff] }
 0x317   : > { %5332 = vrsqrt.f32 %v2167_v40  ;;  %v1648_v9 = vpop.xlane.xlu1 %1647  ;;  %v1362_v20 = vmul.f32 %v6353_v6, %v1294_v38  ;;  %v1103_v34 = vadd.f32 1e-06, %v1039_v30  ;;  %v7330_v61 = vmul.f32 0.0078125, %v1646_v36  ;;  %v5464_v38 = vld [vmem:[%s6131_s8 + $0x190] sm:$0xff] }
 0x318   : > { %v1104_v13 = vadd.f32 1e-06, %v1040_v54  ;;  %v2525_v27 = vpack.c.bf16 %v2486_v25, %v2485_v17  ;;  %v1361_v60 = vmul.f32 %v6353_v6, %v1293_v49  ;;  %v7328_v62 = vmul.f32 0.0078125, %v1648_v9 }
 0x319   : > { %v1430_v37 = vadd.f32 %v6367_v3, %v1362_v20  ;;  %v2296_v40 = vsub.f32 %v5463_v33, %v7288_v26  ;;  %v2295_v54 = vsub.f32 %v5464_v38, %v7290_v23  ;;  %v5465_v20 = vld [vmem:[%s6123_s23 + $0x198] sm:$0xff]  ;;  %v2041_v26 = vmul.f32 %v7330_v61, %v7330_v61 }
 0x31a   : > { %5334 = vrsqrt.f32 %v1104_v13  ;;  %2889 = vmatprep.mubr.bf16.mxu0 %v2525_v27  ;;  %v1429_v39 = vadd.f32 %v6367_v3, %v1361_v60  ;;  %v581_v18 = vpop.xlane.xlu0 %580  ;;  %v2042_v17 = vmul.f32 %v7328_v62, %v7328_v62  ;;  %v1232_v13 = vsub.f32 %v5465_v20, %v7292_v47 }
 0x31b   : > { %5336 = vrsqrt.f32 %v1103_v34  ;;  %v583_v28 = vpop.xlane.xlu1 %582  ;;  %v7336_v24 = vmul.f32 0.0078125, %v581_v18  ;;  %v8009_v19 = vpack.c.bf16 %v7317_v42, %v7313_v21 }
 0x31c   : > { %v1469_v11 = vpack.c.bf16 %v1430_v37, %v1429_v39  ;;  %v7332_v14 = vmul.f32 0.0078125, %v583_v28  ;;  %v5466_v37 = vld [vmem:[%s6123_s23 + $0x190] sm:$0xff] }
 0x31d   : > { %v1231_v28 = vsub.f32 %v5466_v37, %v7296_v45  ;;  %v977_v33 = vmul.f32 %v7336_v24, %v7336_v24 }
 0x31e   : > { %2890 = vmatmul.mubr.bf16.gmra.mrb[96].mxu0 %v1469_v11  ;;  %v1902_v9 = vpop.xlane.xlu0 %1901  ;;  %v978_v23 = vmul.f32 %v7332_v14, %v7332_v14 }
 0x31f   : > { %v1904_v34 = vpop.xlane.xlu1 %1903  ;;  %v1977_v36 = vmul.f32 0.0078125, %v1902_v9 }
 0x320   : > { %v5331_v25 = vpop.eup %5330  ;;  %v1978_v30 = vmul.f32 0.0078125, %v1904_v34 }
 0x321   : > { %v5333_v49 = vpop.eup %5332  ;;  %v2787_v27 = vpop.f32.mrb[44].mxu0  ;;  %v2360_v60 = vmul.f32 %v5331_v25, %v2296_v40  ;;  %v2105_v34 = vsub.f32 %v1977_v36, %v2041_v26 }
 0x322   : > { %v2106_v39 = vsub.f32 %v1978_v30, %v2042_v17  ;;  %v2789_v18 = vpop.f32.mrb[45].mxu0  ;;  %v2359_v11 = vmul.f32 %v5333_v49, %v2295_v54  ;;  %v7353_v47 = vadd.f32 %v2787_v27, %v6864_v16  ;;  %v838_v17 = vpop.xlane.xlu0 %837 }
 0x323   : > { %v2790_v38 = vpop.f32.mrb[46].mxu0  ;;  %v840_v9 = vpop.xlane.xlu1 %839  ;;  %v2424_v40 = vmul.f32 %v2360_v60, %v6353_v6  ;;  %v2169_v18 = vadd.f32 1e-06, %v2105_v34  ;;  %v913_v26 = vmul.f32 0.0078125, %v838_v17 }
 0x324   : > { %v5335_v25 = vpop.eup %5334  ;;  %v2170_v20 = vadd.f32 1e-06, %v2106_v39  ;;  %v7357_v45 = vadd.f32 %v2790_v38, %v6864_v16  ;;  %v914_v37 = vmul.f32 0.0078125, %v840_v9  ;;  %v2792_v30 = vpop.f32.mrb[47].mxu0  ;;  %v2423_v54 = vmul.f32 %v2359_v11, %v6353_v6 }
 0x325   : > { %v5337_v49 = vpop.eup %5336  ;;  %v2488_v36 = vadd.f32 %v2424_v40, %v6367_v3  ;;  %v1296_v27 = vmul.f32 %v5335_v25, %v1232_v13  ;;  %v1041_v38 = vsub.f32 %v913_v26, %v977_v33  ;;  %v5468_v26 = vld [vmem:[%s6131_s8 + $0x1a0] sm:$0xff] }
 0x326   : > { %5338 = vrsqrt.f32 %v2170_v20  ;;  %v1042_v15 = vsub.f32 %v914_v37, %v978_v23  ;;  %v2487_v39 = vadd.f32 %v2423_v54, %v6367_v3  ;;  %v1295_v7 = vmul.f32 %v5337_v49, %v1231_v28  ;;  %v1650_v34 = vpop.xlane.xlu0 %1649  ;;  %v5467_v54 = vld [vmem:[%s6131_s8 + $0x1a8] sm:$0xff] }
 0x327   : > { %5340 = vrsqrt.f32 %v2169_v18  ;;  %v1652_v9 = vpop.xlane.xlu1 %1651  ;;  %v1364_v30 = vmul.f32 %v6353_v6, %v1296_v27  ;;  %v1105_v22 = vadd.f32 1e-06, %v1041_v38  ;;  %v8010_v59 = vpack.c.bf16 %v7357_v45, %v7353_v47 }
 0x328   : > { %v1106_v11 = vadd.f32 1e-06, %v1042_v15  ;;  %v2526_v17 = vpack.c.bf16 %v2488_v36, %v2487_v39  ;;  %v1363_v13 = vmul.f32 %v6353_v6, %v1295_v7  ;;  %v7368_v25 = vmul.f32 0.0078125, %v1652_v9 }
 0x329   : > { %v1432_v40 = vadd.f32 %v6367_v3, %v1364_v30  ;;  %v7370_v15 = vmul.f32 0.0078125, %v1650_v34  ;;  %v2298_v7 = vsub.f32 %v5467_v54, %v7328_v62  ;;  %v2297_v36 = vsub.f32 %v5468_v26, %v7330_v61  ;;  %v5469_v30 = vld [vmem:[%s6123_s23 + $0x1a8] sm:$0xff] }
 0x32a   : > { %5342 = vrsqrt.f32 %v1106_v11  ;;  %2897 = vmatprep.mubr.bf16.mxu0 %v2526_v17  ;;  %v1431_v33 = vadd.f32 %v6367_v3, %v1363_v13  ;;  %v585_v28 = vpop.xlane.xlu0 %584  ;;  %v2044_v27 = vmul.f32 %v7368_v25, %v7368_v25  ;;  %v1234_v11 = vsub.f32 %v5469_v30, %v7332_v14 }
 0x32b   : > { %5344 = vrsqrt.f32 %v1105_v22  ;;  %v587_v23 = vpop.xlane.xlu1 %586  ;;  %v7376_v49 = vmul.f32 0.0078125, %v585_v28  ;;  %v2043_v62 = vmul.f32 %v7370_v15, %v7370_v15 }
 0x32c   : > { %v1470_v20 = vpack.c.bf16 %v1432_v40, %v1431_v33  ;;  %v7372_v37 = vmul.f32 0.0078125, %v587_v23  ;;  %v5470_v40 = vld [vmem:[%s6123_s23 + $0x1a0] sm:$0xff] }
 0x32d   : > { %v1233_v23 = vsub.f32 %v5470_v40, %v7336_v24  ;;  %v979_v54 = vmul.f32 %v7376_v49, %v7376_v49 }
 0x32e   : > { %2898 = vmatmul.mubr.bf16.gmra.mrb[100].mxu0 %v1470_v20  ;;  %v1906_v38 = vpop.xlane.xlu0 %1905  ;;  %v980_v61 = vmul.f32 %v7372_v37, %v7372_v37 }
 0x32f   : > { %v1908_v22 = vpop.xlane.xlu1 %1907  ;;  %v1979_v34 = vmul.f32 0.0078125, %v1906_v38 }
 0x330   : > { %v5339_v18 = vpop.eup %5338  ;;  %v1980_v39 = vmul.f32 0.0078125, %v1908_v22 }
 0x331   : > { %v5341_v9 = vpop.eup %5340  ;;  %v2795_v17 = vpop.f32.mrb[48].mxu0  ;;  %v2362_v13 = vmul.f32 %v5339_v18, %v2298_v7  ;;  %v2107_v22 = vsub.f32 %v1979_v34, %v2043_v62 }
 0x332   : > { %v2108_v33 = vsub.f32 %v1980_v39, %v2044_v27  ;;  %v2797_v28 = vpop.f32.mrb[49].mxu0  ;;  %v2361_v20 = vmul.f32 %v5341_v9, %v2297_v36  ;;  %v2796_v14 = vadd.f32 %v2795_v17, %v6864_v16  ;;  %v842_v60 = vpop.xlane.xlu0 %841 }
 0x333   : > { %v2798_v26 = vpop.f32.mrb[50].mxu0  ;;  %v844_v30 = vpop.xlane.xlu1 %843  ;;  %v2426_v38 = vmul.f32 %v2362_v13, %v6353_v6  ;;  %v2171_v39 = vadd.f32 1e-06, %v2107_v22  ;;  %v915_v9 = vmul.f32 0.0078125, %v842_v60 }
 0x334   : > { %v5343_v7 = vpop.eup %5342  ;;  %v2172_v18 = vadd.f32 1e-06, %v2108_v33  ;;  %v2799_v24 = vadd.f32 %v2798_v26, %v6864_v16  ;;  %v916_v40 = vmul.f32 0.0078125, %v844_v30  ;;  %v2800_v29 = vpop.f32.mrb[51].mxu0  ;;  %v2425_v27 = vmul.f32 %v2361_v20, %v6353_v6 }
 0x335   : > { %v5345_v36 = vpop.eup %5344  ;;  %v2490_v62 = vadd.f32 %v2426_v38, %v6367_v3  ;;  %v1298_v34 = vmul.f32 %v5343_v7, %v1234_v11  ;;  %v1043_v33 = vsub.f32 %v915_v9, %v979_v54  ;;  %v5472_v9 = vld [vmem:[%s6131_s8 + $0x1b0] sm:$0xff] }
 0x336   : > { %5346 = vrsqrt.f32 %v2172_v18  ;;  %v1044_v17 = vsub.f32 %v916_v40, %v980_v61  ;;  %v2966_v28 = vpack.c.bf16 %v2799_v24, %v2796_v14  ;;  %v2489_v13 = vadd.f32 %v2425_v27, %v6367_v3  ;;  %v1654_v2 = vpop.xlane.xlu0 %1653  ;;  %v5471_v24 = vld [vmem:[%s6131_s8 + $0x1b8] sm:$0xff] }
 0x337   : > { %5348 = vrsqrt.f32 %v2171_v39  ;;  %v1656_v0 = vpop.xlane.xlu1 %1655  ;;  %v1297_v26 = vmul.f32 %v5345_v36, %v1233_v23  ;;  %v1366_v30 = vmul.f32 %v6353_v6, %v1298_v34  ;;  %v1107_v60 = vadd.f32 1e-06, %v1043_v33 }
 0x338   : > { %v1108_v29 = vadd.f32 1e-06, %v1044_v17  ;;  %4765 = vmatprep.mubr.bf16.mxu1 %v2966_v28  ;;  %v2527_v20 = vpack.c.bf16 %v2490_v62, %v2489_v13  ;;  %v7402_v23 = vmul.f32 0.0078125, %v1656_v0  ;;  %v7404_v38 = vmul.f32 0.0078125, %v1654_v2  ;;  %v5473_v28 = vld [vmem:[%s6123_s23 + $0x1b8] sm:$0xff] }
 0x339   : > { %v1365_v22 = vmul.f32 %v6353_v6, %v1297_v26  ;;  %v1434_v11 = vadd.f32 %v6367_v3, %v1366_v30  ;;  %v2300_v40 = vsub.f32 %v5471_v24, %v7368_v25  ;;  %v2299_v0 = vsub.f32 %v5472_v9, %v7370_v15 }
 0x33a   : > { %5350 = vrsqrt.f32 %v1108_v29  ;;  %2905 = vmatprep.mubr.bf16.mxu0 %v2527_v20  ;;  %v589_v14 = vpop.xlane.xlu0 %588  ;;  %v2046_v62 = vmul.f32 %v7402_v23, %v7402_v23  ;;  %v1236_v13 = vsub.f32 %v5473_v28, %v7372_v37  ;;  %v2045_v25 = vmul.f32 %v7404_v38, %v7404_v38  ;;  %v5474_v29 = vld [vmem:[%s6123_s23 + $0x1b0] sm:$0xff] }
 0x33b   : > { %5352 = vrsqrt.f32 %v1107_v60  ;;  %v591_v61 = vpop.xlane.xlu1 %590  ;;  %v1433_v54 = vadd.f32 %v6367_v3, %v1365_v22  ;;  %v7410_v27 = vmul.f32 0.0078125, %v589_v14  ;;  %v1235_v20 = vsub.f32 %v5474_v29, %v7376_v49 }
 0x33c   : > { %v7406_v18 = vmul.f32 0.0078125, %v591_v61 }
 0x33d   : > { %v1471_v7 = vpack.c.bf16 %v1434_v11, %v1433_v54  ;;  %v981_v61 = vmul.f32 %v7410_v27, %v7410_v27 }
 0x33e   : > { %v1910_v34 = vpop.xlane.xlu0 %1909  ;;  %v982_v15 = vmul.f32 %v7406_v18, %v7406_v18 }
 0x33f   : > { %2906 = vmatmul.mubr.bf16.gmra.mrb[104].mxu0 %v1471_v7  ;;  %v1912_v36 = vpop.xlane.xlu1 %1911  ;;  %v1981_v33 = vmul.f32 0.0078125, %v1910_v34 }
 0x340   : > { %v5347_v39 = vpop.eup %5346  ;;  %v1982_v2 = vmul.f32 0.0078125, %v1912_v36 }
 0x341   : > { %v5349_v17 = vpop.eup %5348  ;;  %v2803_v26 = vpop.f32.mrb[52].mxu0  ;;  %v2364_v30 = vmul.f32 %v5347_v39, %v2300_v40  ;;  %v2109_v54 = vsub.f32 %v1981_v33, %v2045_v25 }
 0x342   : > { %v2110_v60 = vsub.f32 %v1982_v2, %v2046_v62  ;;  %v2805_v22 = vpop.f32.mrb[53].mxu0  ;;  %v2363_v11 = vmul.f32 %v5349_v17, %v2299_v0  ;;  %v2804_v37 = vadd.f32 %v2803_v26, %v6864_v16  ;;  %v846_v9 = vpop.xlane.xlu0 %845 }
 0x343   : > { %v2806_v14 = vpop.f32.mrb[54].mxu0  ;;  %v848_v7 = vpop.xlane.xlu1 %847  ;;  %v2428_v24 = vmul.f32 %v2364_v30, %v6353_v6  ;;  %v2173_v2 = vadd.f32 1e-06, %v2109_v54  ;;  %v917_v17 = vmul.f32 0.0078125, %v846_v9 }
 0x344   : > { %v5351_v40 = vpop.eup %5350  ;;  %v2174_v36 = vadd.f32 1e-06, %v2110_v60  ;;  %v2807_v49 = vadd.f32 %v2806_v14, %v6864_v16  ;;  %v918_v39 = vmul.f32 0.0078125, %v848_v7  ;;  %v2808_v34 = vpop.f32.mrb[55].mxu0  ;;  %v2427_v62 = vmul.f32 %v2363_v11, %v6353_v6 }
 0x345   : > { %v5353_v0 = vpop.eup %5352  ;;  %v2492_v28 = vadd.f32 %v2428_v24, %v6367_v3  ;;  %v1300_v25 = vmul.f32 %v5351_v40, %v1236_v13  ;;  %v1045_v29 = vsub.f32 %v917_v17, %v981_v61  ;;  %v5476_v17 = vld [vmem:[%s6131_s8 + $0x1c0] sm:$0xff] }
 0x346   : > { %5354 = vrsqrt.f32 %v2174_v36  ;;  %v2967_v33 = vpack.c.bf16 %v2807_v49, %v2804_v37  ;;  %v1046_v26 = vsub.f32 %v918_v39, %v982_v15  ;;  %v2491_v30 = vadd.f32 %v2427_v62, %v6367_v3  ;;  %v1658_v11 = vpop.xlane.xlu0 %1657  ;;  %v5475_v49 = vld [vmem:[%s6131_s8 + $0x1c8] sm:$0xff] }
 0x347   : > { %5356 = vrsqrt.f32 %v2173_v2  ;;  %v1660_v60 = vpop.xlane.xlu1 %1659  ;;  %v1299_v22 = vmul.f32 %v5353_v0, %v1235_v20  ;;  %v1368_v14 = vmul.f32 %v6353_v6, %v1300_v25  ;;  %v1109_v9 = vadd.f32 1e-06, %v1045_v29 }
 0x348   : > { %v1110_v7 = vadd.f32 1e-06, %v1046_v26  ;;  %4766 = vmatmul.mubr.bf16.vlgmr.msra.gmra.mrb[0].mxu1 %v2967_v33  ;;  %v2528_v54 = vpack.c.bf16 %v2492_v28, %v2491_v30  ;;  %v7436_v20 = vmul.f32 0.0078125, %v1660_v60  ;;  %v7438_v40 = vmul.f32 0.0078125, %v1658_v11 }
 0x349   : > { %v1367_v24 = vmul.f32 %v6353_v6, %v1299_v22  ;;  %v1436_v13 = vadd.f32 %v6367_v3, %v1368_v14  ;;  %v2302_v39 = vsub.f32 %v5475_v49, %v7402_v23  ;;  %v2301_v28 = vsub.f32 %v5476_v17, %v7404_v38  ;;  %v5477_v22 = vld [vmem:[%s6123_s23 + $0x1c8] sm:$0xff] }
 0x34a   : > { %5358 = vrsqrt.f32 %v1110_v7  ;;  %2913 = vmatprep.mubr.bf16.mxu0 %v2528_v54  ;;  %v593_v37 = vpop.xlane.xlu0 %592  ;;  %v2048_v25 = vmul.f32 %v7436_v20, %v7436_v20  ;;  %v2047_v23 = vmul.f32 %v7438_v40, %v7438_v40  ;;  %v1238_v14 = vsub.f32 %v5477_v22, %v7406_v18  ;;  %v5478_v7 = vld [vmem:[%s6123_s23 + $0x1c0] sm:$0xff] }
 0x34b   : > { %5360 = vrsqrt.f32 %v1109_v9  ;;  %v595_v15 = vpop.xlane.xlu1 %594  ;;  %v1435_v61 = vadd.f32 %v6367_v3, %v1367_v24  ;;  %v7444_v62 = vmul.f32 0.0078125, %v593_v37  ;;  %v1237_v11 = vsub.f32 %v5478_v7, %v7410_v27 }
 0x34c   : > { %v7442_v34 = vmul.f32 0.0078125, %v595_v15 }
 0x34d   : > { %v1472_v36 = vpack.c.bf16 %v1436_v13, %v1435_v61  ;;  %v983_v13 = vmul.f32 %v7444_v62, %v7444_v62 }
 0x34e   : > { %v1914_v26 = vpop.xlane.xlu0 %1913  ;;  %v984_v24 = vmul.f32 %v7442_v34, %v7442_v34 }
 0x34f   : > { %2914 = vmatmul.mubr.bf16.gmra.mrb[108].mxu0 %v1472_v36  ;;  %v1916_v0 = vpop.xlane.xlu1 %1915  ;;  %v1983_v29 = vmul.f32 0.0078125, %v1914_v26 }
 0x350   : > { %v5355_v2 = vpop.eup %5354  ;;  %v1984_v33 = vmul.f32 0.0078125, %v1916_v0 }
 0x351   : > { %v5357_v30 = vpop.eup %5356  ;;  %v2366_v60 = vmul.f32 %v5355_v2, %v2302_v39  ;;  %v2811_v9 = vpop.f32.mrb[56].mxu0  ;;  %v2111_v15 = vsub.f32 %v1983_v29, %v2047_v23 }
 0x352   : > { %v2112_v54 = vsub.f32 %v1984_v33, %v2048_v25  ;;  %v2365_v38 = vmul.f32 %v5357_v30, %v2301_v28  ;;  %v2813_v61 = vpop.f32.mrb[57].mxu0  ;;  %v2812_v18 = vadd.f32 %v2811_v9, %v6864_v16  ;;  %v850_v2 = vpop.xlane.xlu0 %849 }
 0x353   : > { %v852_v37 = vpop.xlane.xlu1 %851  ;;  %v2430_v36 = vmul.f32 %v2366_v60, %v6353_v6  ;;  %v2814_v0 = vpop.f32.mrb[58].mxu0  ;;  %v2175_v25 = vadd.f32 1e-06, %v2111_v15  ;;  %v919_v26 = vmul.f32 0.0078125, %v850_v2 }
 0x354   : > { %v5359_v49 = vpop.eup %5358  ;;  %v2176_v39 = vadd.f32 1e-06, %v2112_v54  ;;  %v920_v27 = vmul.f32 0.0078125, %v852_v37  ;;  %v2429_v17 = vmul.f32 %v2365_v38, %v6353_v6  ;;  %v2815_v33 = vadd.f32 %v2814_v0, %v6864_v16  ;;  %v2816_v30 = vpop.f32.mrb[59].mxu0 }
 0x355   : > { %v5361_v28 = vpop.eup %5360  ;;  %v2494_v23 = vadd.f32 %v2430_v36, %v6367_v3  ;;  %v1047_v54 = vsub.f32 %v919_v26, %v983_v13  ;;  %v1302_v61 = vmul.f32 %v5359_v49, %v1238_v14  ;;  %v5480_v30 = vld [vmem:[%s6131_s8 + $0x1d0] sm:$0xff] }
 0x356   : > { %5362 = vrsqrt.f32 %v2176_v39  ;;  %v1048_v29 = vsub.f32 %v920_v27, %v984_v24  ;;  %v2493_v60 = vadd.f32 %v2429_v17, %v6367_v3  ;;  %v1301_v22 = vmul.f32 %v5361_v28, %v1237_v11  ;;  %v1662_v38 = vpop.xlane.xlu0 %1661  ;;  %v5479_v27 = vld [vmem:[%s6131_s8 + $0x1d8] sm:$0xff] }
 0x357   : > { %5364 = vrsqrt.f32 %v2175_v25  ;;  %v2968_v7 = vpack.c.bf16 %v2815_v33, %v2812_v18  ;;  %v1664_v9 = vpop.xlane.xlu1 %1663  ;;  %v1111_v2 = vadd.f32 1e-06, %v1047_v54  ;;  %v1370_v36 = vmul.f32 %v6353_v6, %v1302_v61  ;;  %v5481_v61 = vld [vmem:[%s6123_s23 + $0x1d8] sm:$0xff] }
 0x358   : > { %v1112_v37 = vadd.f32 1e-06, %v1048_v29  ;;  %v2529_v15 = vpack.c.bf16 %v2494_v23, %v2493_v60  ;;  %v1369_v0 = vmul.f32 %v6353_v6, %v1301_v22  ;;  %v7470_v14 = vmul.f32 0.0078125, %v1664_v9 }
 0x359   : > { %4769 = vmatprep.mubr.bf16.mxu1 %v2968_v7  ;;  %v1438_v13 = vadd.f32 %v6367_v3, %v1370_v36  ;;  %v7472_v39 = vmul.f32 0.0078125, %v1662_v38  ;;  %v2304_v17 = vsub.f32 %v5479_v27, %v7436_v20  ;;  %v2303_v23 = vsub.f32 %v5480_v30, %v7438_v40  ;;  %v5482_v38 = vld [vmem:[%s6123_s23 + $0x1d0] sm:$0xff] }
 0x35a   : > { %5366 = vrsqrt.f32 %v1112_v37  ;;  %2921 = vmatprep.mubr.bf16.mxu0 %v2529_v15  ;;  %v1437_v11 = vadd.f32 %v6367_v3, %v1369_v0  ;;  %v597_v49 = vpop.xlane.xlu0 %596  ;;  %v2050_v29 = vmul.f32 %v7470_v14, %v7470_v14  ;;  %v1240_v37 = vsub.f32 %v5481_v61, %v7442_v34 }
 0x35b   : > { %5368 = vrsqrt.f32 %v1111_v2  ;;  %v599_v24 = vpop.xlane.xlu1 %598  ;;  %v7478_v25 = vmul.f32 0.0078125, %v597_v49  ;;  %v2049_v20 = vmul.f32 %v7472_v39, %v7472_v39  ;;  %v1239_v15 = vsub.f32 %v5482_v38, %v7444_v62 }
 0x35c   : > { %v1473_v18 = vpack.c.bf16 %v1438_v13, %v1437_v11  ;;  %v7476_v28 = vmul.f32 0.0078125, %v599_v24 }
 0x35d   : > { %v985_v11 = vmul.f32 %v7478_v25, %v7478_v25 }
 0x35e   : > { %2922 = vmatmul.mubr.bf16.gmra.mrb[112].mxu0 %v1473_v18  ;;  %v1918_v22 = vpop.xlane.xlu0 %1917  ;;  %v986_v36 = vmul.f32 %v7476_v28, %v7476_v28 }
 0x35f   : > { %v1920_v33 = vpop.xlane.xlu1 %1919  ;;  %v1985_v54 = vmul.f32 0.0078125, %v1918_v22 }
 0x360   : > { %v5363_v26 = vpop.eup %5362  ;;  %v1986_v60 = vmul.f32 0.0078125, %v1920_v33 }
 0x361   : > { %v5365_v7 = vpop.eup %5364  ;;  %v2368_v9 = vmul.f32 %v5363_v26, %v2304_v17  ;;  %v2819_v2 = vpop.f32.mrb[60].mxu0  ;;  %v2113_v24 = vsub.f32 %v1985_v54, %v2049_v20 }
 0x362   : > { %v2114_v0 = vsub.f32 %v1986_v60, %v2050_v29  ;;  %v2367_v40 = vmul.f32 %v5365_v7, %v2303_v23  ;;  %v2821_v13 = vpop.f32.mrb[61].mxu0  ;;  %v2820_v34 = vadd.f32 %v2819_v2, %v6864_v16  ;;  %v854_v26 = vpop.xlane.xlu0 %853 }
 0x363   : > { %v856_v49 = vpop.xlane.xlu1 %855  ;;  %v2432_v18 = vmul.f32 %v2368_v9, %v6353_v6  ;;  %v2822_v33 = vpop.f32.mrb[62].mxu0  ;;  %v2177_v29 = vadd.f32 1e-06, %v2113_v24  ;;  %v921_v22 = vmul.f32 0.0078125, %v854_v26 }
 0x364   : > { %v5367_v27 = vpop.eup %5366  ;;  %v2178_v17 = vadd.f32 1e-06, %v2114_v0  ;;  %v922_v62 = vmul.f32 0.0078125, %v856_v49  ;;  %v2431_v30 = vmul.f32 %v2367_v40, %v6353_v6  ;;  %v2823_v60 = vadd.f32 %v2822_v33, %v6864_v16  ;;  %v2824_v7 = vpop.f32.mrb[63].mxu0 }
 0x365   : > { %v5369_v23 = vpop.eup %5368  ;;  %v2496_v20 = vadd.f32 %v2432_v18, %v6367_v3  ;;  %v1049_v0 = vsub.f32 %v921_v22, %v985_v11  ;;  %v1304_v13 = vmul.f32 %v5367_v27, %v1240_v37  ;;  %v5484_v7 = vld [vmem:[%s6131_s8 + $0x1e0] sm:$0xff] }
 0x366   : > { %5370 = vrsqrt.f32 %v2178_v17  ;;  %v1050_v54 = vsub.f32 %v922_v62, %v986_v36  ;;  %v2495_v9 = vadd.f32 %v2431_v30, %v6367_v3  ;;  %v1303_v61 = vmul.f32 %v5369_v23, %v1239_v15  ;;  %v1666_v40 = vpop.xlane.xlu0 %1665  ;;  %v5483_v62 = vld [vmem:[%s6131_s8 + $0x1e8] sm:$0xff] }
 0x367   : > { %5372 = vrsqrt.f32 %v2177_v29  ;;  %v2969_v38 = vpack.c.bf16 %v2823_v60, %v2820_v34  ;;  %v1668_v2 = vpop.xlane.xlu1 %1667  ;;  %v1113_v26 = vadd.f32 1e-06, %v1049_v0  ;;  %v1372_v18 = vmul.f32 %v6353_v6, %v1304_v13  ;;  %v5485_v13 = vld [vmem:[%s6123_s23 + $0x1e8] sm:$0xff] }
 0x368   : > { %v1114_v49 = vadd.f32 1e-06, %v1050_v54  ;;  %v2530_v24 = vpack.c.bf16 %v2496_v20, %v2495_v9  ;;  %v1371_v33 = vmul.f32 %v6353_v6, %v1303_v61  ;;  %v7504_v37 = vmul.f32 0.0078125, %v1668_v2 }
 0x369   : > { %4770 = vmatmul.mubr.bf16.gmra.mrb[4].mxu1 %v2969_v38  ;;  %v1440_v11 = vadd.f32 %v6367_v3, %v1372_v18  ;;  %v7506_v17 = vmul.f32 0.0078125, %v1666_v40  ;;  %v2306_v30 = vsub.f32 %v5483_v62, %v7470_v14  ;;  %v2305_v20 = vsub.f32 %v5484_v7, %v7472_v39  ;;  %v5486_v40 = vld [vmem:[%s6123_s23 + $0x1e0] sm:$0xff] }
 0x36a   : > { %5374 = vrsqrt.f32 %v1114_v49  ;;  %2929 = vmatprep.mubr.bf16.mxu0 %v2530_v24  ;;  %v1439_v15 = vadd.f32 %v6367_v3, %v1371_v33  ;;  %v601_v27 = vpop.xlane.xlu0 %600  ;;  %v2052_v54 = vmul.f32 %v7504_v37, %v7504_v37  ;;  %v1242_v49 = vsub.f32 %v5485_v13, %v7476_v28 }
 0x36b   : > { %5376 = vrsqrt.f32 %v1113_v26  ;;  %v603_v36 = vpop.xlane.xlu1 %602  ;;  %v7512_v29 = vmul.f32 0.0078125, %v601_v27  ;;  %v2051_v14 = vmul.f32 %v7506_v17, %v7506_v17  ;;  %v1241_v24 = vsub.f32 %v5486_v40, %v7478_v25 }
 0x36c   : > { %v1474_v34 = vpack.c.bf16 %v1440_v11, %v1439_v15  ;;  %v7510_v23 = vmul.f32 0.0078125, %v603_v36 }
 0x36d   : > { %v987_v15 = vmul.f32 %v7512_v29, %v7512_v29 }
 0x36e   : > { %2930 = vmatmul.mubr.bf16.gmra.mrb[116].mxu0 %v1474_v34  ;;  %v1922_v61 = vpop.xlane.xlu0 %1921  ;;  %v988_v18 = vmul.f32 %v7510_v23, %v7510_v23 }
 0x36f   : > { %v1924_v60 = vpop.xlane.xlu1 %1923  ;;  %v1987_v0 = vmul.f32 0.0078125, %v1922_v61 }
 0x370   : > { %v5371_v22 = vpop.eup %5370  ;;  %v1988_v9 = vmul.f32 0.0078125, %v1924_v60 }
 0x371   : > { %v5373_v38 = vpop.eup %5372  ;;  %v2370_v2 = vmul.f32 %v5371_v22, %v2306_v30  ;;  %v2827_v26 = vpop.f32.mrb[64].mxu0  ;;  %v2115_v36 = vsub.f32 %v1987_v0, %v2051_v14 }
 0x372   : > { %v2116_v33 = vsub.f32 %v1988_v9, %v2052_v54  ;;  %v2369_v39 = vmul.f32 %v5373_v38, %v2305_v20  ;;  %v2829_v11 = vpop.f32.mrb[65].mxu0  ;;  %v2828_v28 = vadd.f32 %v2827_v26, %v6864_v16  ;;  %v858_v22 = vpop.xlane.xlu0 %857 }
 0x373   : > { %v860_v27 = vpop.xlane.xlu1 %859  ;;  %v2434_v34 = vmul.f32 %v2370_v2, %v6353_v6  ;;  %v2830_v60 = vpop.f32.mrb[66].mxu0  ;;  %v2179_v54 = vadd.f32 1e-06, %v2115_v36  ;;  %v923_v61 = vmul.f32 0.0078125, %v858_v22 }
 0x374   : > { %v5375_v62 = vpop.eup %5374  ;;  %v2180_v30 = vadd.f32 1e-06, %v2116_v33  ;;  %v924_v25 = vmul.f32 0.0078125, %v860_v27  ;;  %v2433_v7 = vmul.f32 %v2369_v39, %v6353_v6  ;;  %v2831_v9 = vadd.f32 %v2830_v60, %v6864_v16  ;;  %v2832_v38 = vpop.f32.mrb[67].mxu0 }
 0x375   : > { %v5377_v20 = vpop.eup %5376  ;;  %v2498_v14 = vadd.f32 %v2434_v34, %v6367_v3  ;;  %v1051_v33 = vsub.f32 %v923_v61, %v987_v15  ;;  %v1306_v26 = vmul.f32 %v5375_v62, %v1242_v49  ;;  %v5487_v49 = vld [vmem:[%s6131_s8 + $0x1f8] sm:$0xff] }
 0x376   : > { %5378 = vrsqrt.f32 %v2180_v30  ;;  %v1052_v0 = vsub.f32 %v924_v25, %v988_v18  ;;  %v2497_v2 = vadd.f32 %v2433_v7, %v6367_v3  ;;  %v1305_v13 = vmul.f32 %v5377_v20, %v1241_v24  ;;  %v5488_v30 = vld [vmem:[%s6131_s8 + $0x1f0] sm:$0xff] }
 0x377   : > { %5380 = vrsqrt.f32 %v2179_v54  ;;  %v2970_v40 = vpack.c.bf16 %v2831_v9, %v2828_v28  ;;  %v1115_v27 = vadd.f32 1e-06, %v1051_v33  ;;  %v1374_v60 = vmul.f32 %v6353_v6, %v1306_v26  ;;  %v5489_v54 = vld [vmem:[%s6123_s23 + $0x1f8] sm:$0xff] }
 0x378   : > { %v1116_v11 = vadd.f32 1e-06, %v1052_v0  ;;  %v2531_v39 = vpack.c.bf16 %v2498_v14, %v2497_v2  ;;  %v1373_v36 = vmul.f32 %v6353_v6, %v1305_v13  ;;  %v2308_v15 = vsub.f32 %v5487_v49, %v7504_v37  ;;  %v5490_v0 = vld [vmem:[%s6123_s23 + $0x1f0] sm:$0xff] }
 0x379   : > { %4773 = vmatprep.mubr.bf16.mxu1 %v2970_v40  ;;  %v1442_v24 = vadd.f32 %v6367_v3, %v1374_v60  ;;  %v2307_v28 = vsub.f32 %v5488_v30, %v7506_v17  ;;  %v1244_v9 = vsub.f32 %v5489_v54, %v7510_v23  ;;  %v1243_v2 = vsub.f32 %v5490_v0, %v7512_v29 }
 0x37a   : > { %5382 = vrsqrt.f32 %v1116_v11  ;;  %2937 = vmatprep.mubr.bf16.mxu0 %v2531_v39  ;;  %v1441_v18 = vadd.f32 %v6367_v3, %v1373_v36 }
 0x37b   : > { %5384 = vrsqrt.f32 %v1115_v27 }
 0x37c   : > { %v1475_v34 = vpack.c.bf16 %v1442_v24, %v1441_v18 }
 0x37e   : > { %2938 = vmatmul.mubr.bf16.gmra.mrb[120].mxu0 %v1475_v34 }
 0x380   : > { %v5379_v62 = vpop.eup %5378 }
 0x381   : > { %v5381_v25 = vpop.eup %5380  ;;  %v2372_v22 = vmul.f32 %v5379_v62, %v2308_v15  ;;  %v2835_v7 = vpop.f32.mrb[68].mxu0 }
 0x382   : > { %v2371_v20 = vmul.f32 %v5381_v25, %v2307_v28  ;;  %v2837_v61 = vpop.f32.mrb[69].mxu0  ;;  %v2836_v17 = vadd.f32 %v2835_v7, %v6864_v16 }
 0x383   : > { %v2436_v38 = vmul.f32 %v2372_v22, %v6353_v6  ;;  %v2838_v37 = vpop.f32.mrb[70].mxu0 }
 0x384   : > { %v5383_v14 = vpop.eup %5382  ;;  %v2435_v13 = vmul.f32 %v2371_v20, %v6353_v6  ;;  %v2839_v33 = vadd.f32 %v2838_v37, %v6864_v16  ;;  %v2840_v26 = vpop.f32.mrb[71].mxu0  ;;  %v5116_v37 = vld [vmem:[#allocation11 + $0x10] sm:$0xff]  }
 0x385   : > { %v5385_v40 = vpop.eup %5384  ;;  %v2500_v11 = vadd.f32 %v2436_v38, %v6367_v3  ;;  %v1308_v39 = vmul.f32 %v5383_v14, %v1244_v9  ;;  %v5114_v14 = vld [vmem:[#allocation11] sm:$0xff]  }
 0x386   : > { %v2499_v23 = vadd.f32 %v2435_v13, %v6367_v3  ;;  %v1307_v36 = vmul.f32 %v5385_v40, %v1243_v2  ;;  %v2971_v27 = vpack.c.bf16 %v2839_v33, %v2836_v17  ;;  %4805 = vmatprep.subr.bf16.mxu1 %v5114_v14  ;;  %v5115_v2 = vld [vmem:[#allocation11 + $0x8] sm:$0xff]   ;;  %v5117_v13 = vld [vmem:[#allocation11 + $0x18] sm:$0xff]   ;;  %v5118_v33 = vld [vmem:[#allocation11 + $0x20] sm:$0xff]  }
 0x387   : > { %v1376_v60 = vmul.f32 %v6353_v6, %v1308_v39  ;;  %4806 = vmatpush3.bf16.msra.mxu1 %v5114_v14 }
 0x388   : > { %v2532_v18 = vpack.c.bf16 %v2500_v11, %v2499_v23  ;;  %v1375_v29 = vmul.f32 %v6353_v6, %v1307_v36  ;;  %4774 = vmatmul.mubr.bf16.gmra.mrb[8].mxu1 %v2971_v27  ;;  %4807 = vmatprep.subr.bf16.mxu1 %v5115_v2  ;;  %v5119_v27 = vld [vmem:[#allocation11 + $0x28] sm:$0xff]  }
 0x389   : > { %v1444_v24 = vadd.f32 %v6367_v3, %v1376_v60  ;;  %v5120_v60 = vld [vmem:[#allocation11 + $0x30] sm:$0xff]  }
 0x38a   : > { %2945 = vmatprep.mubr.bf16.mxu0 %v2532_v18  ;;  %v1443_v34 = vadd.f32 %v6367_v3, %v1375_v29  ;;  %v8003_v3 = vpack.c.bf16 %v7066_v56, %v7062_v41  ;;  %v5121_v18 = vld [vmem:[#allocation11 + $0x38] sm:$0xff]  }
 0x38b   : > { %4808 = vmatpush3.bf16.msra.mxu1 %v5115_v2 }
 0x38c   : > { %v1476_v49 = vpack.c.bf16 %v1444_v24, %v1443_v34  ;;  %4809 = vmatprep.subr.bf16.mxu1 %v5116_v37 }
 0x38e   : > { %2946 = vmatmul.mubr.bf16.gmra.mrb[124].mxu0 %v1476_v49 }
 0x38f   : > { %4741 = vmatprep.mubr.bf16.mxu0 %v2954_v48  ;;  %4810 = vmatpush3.bf16.msra.mxu1 %v5116_v37 }
 0x390   : > { %4811 = vmatprep.subr.bf16.mxu1 %v5117_v13 }
 0x391   : > { %v2843_v15 = vpop.f32.mrb[72].mxu0 }
 0x392   : > { %v2845_v62 = vpop.f32.mrb[73].mxu0  ;;  %v2844_v28 = vadd.f32 %v2843_v15, %v6864_v16 }
 0x393   : > { %v2846_v30 = vpop.f32.mrb[74].mxu0  ;;  %4812 = vmatpush3.bf16.msra.mxu1 %v5117_v13 }
 0x394   : > { %v2847_v25 = vadd.f32 %v2846_v30, %v6864_v16  ;;  %v2848_v6 = vpop.f32.mrb[75].mxu0  ;;  %4813 = vmatprep.subr.bf16.mxu1 %v5118_v33 }
 0x396   : > { %4742 = vmatmul.mubr.bf16.vlgmr.msra.gmra.mrb[128].mxu0 %v2955_v58  ;;  %v2972_v22 = vpack.c.bf16 %v2847_v25, %v2844_v28 }
 0x397   : > { %4745 = vmatprep.mubr.bf16.mxu0 %v2956_v1  ;;  %v8005_v1 = vpack.c.bf16 %v7154_v46, %v7150_v4  ;;  %v8008_v4 = vpack.c.bf16 %v7277_v44, %v7273_v10  ;;  %4814 = vmatpush3.bf16.msra.mxu1 %v5118_v33 }
 0x398   : > { %4777 = vmatprep.mubr.bf16.mxu1 %v2972_v22  ;;  %4815 = vmatprep.subr.bf16.mxu1 %v5119_v27 }
 0x39b   : > { %4816 = vmatpush3.bf16.msra.mxu1 %v5119_v27 }
 0x39c   : > { %4817 = vmatprep.subr.bf16.mxu1 %v5120_v60 }
 0x39e   : > { %4746 = vmatmul.mubr.bf16.gmra.mrb[132].mxu0 %v2957_v35 }
 0x39f   : > { %4749 = vmatprep.mubr.bf16.mxu0 %v8003_v3  ;;  %4818 = vmatpush3.bf16.msra.mxu1 %v5120_v60 }
 0x3a0   : > { %4819 = vmatprep.subr.bf16.mxu1 %v5121_v18 }
 0x3a1   : > { %v2851_v55 = vpop.f32.mrb[76].mxu0 }
 0x3a2   : > { %v2853_v8 = vpop.f32.mrb[77].mxu0  ;;  %v2852_v57 = vadd.f32 %v2851_v55, %v6864_v16 }
 0x3a3   : > { %v2854_v48 = vpop.f32.mrb[78].mxu0  ;;  %4820 = vmatpush3.bf16.msra.mxu1 %v5121_v18 }
 0x3a4   : > { %v2855_v50 = vadd.f32 %v2854_v48, %v6864_v16  ;;  %v2856_v58 = vpop.f32.mrb[79].mxu0 }
 0x3a5   : > { %v3004_v58 = vsub.s32 3, %v6341_v32 }
 0x3a6   : > { %4750 = vmatmul.mubr.bf16.gmra.mrb[136].mxu0 %v8004_v52  ;;  %v2973_v51 = vpack.c.bf16 %v2855_v50, %v2852_v57 }
 0x3a7   : > { %4753 = vmatprep.mubr.bf16.mxu0 %v8005_v1 }
 0x3a8   : > { %4778 = vmatmul.mubr.bf16.gmra.mrb[12].mxu1 %v2973_v51 }
 0x3ae   : > { %4754 = vmatmul.mubr.bf16.gmra.mrb[140].mxu0 %v8006_v12 }
 0x3af   : > { %4757 = vmatprep.mubr.bf16.mxu0 %v8007_v5  ;;  %v7611_v5 = vld [vmem:[#allocation7] sm:$0xff] }
 0x3b1   : > { %v2859_v35 = vpop.f32.mrb[80].mxu0 }
 0x3b2   : > { %v2861_v41 = vpop.f32.mrb[81].mxu0  ;;  %v2860_v43 = vadd.f32 %v2859_v35, %v6864_v16  ;;  %v7614_v35 = vrot.slane %v7611_v5, %v3004_v58 }
 0x3b3   : > { %v2862_v56 = vpop.f32.mrb[82].mxu0 }
 0x3b4   : > { %v2863_v31 = vadd.f32 %v2862_v56, %v6864_v16  ;;  %v2864_v7 = vpop.f32.mrb[83].mxu0 }
 0x3b6   : > { %4758 = vmatmul.mubr.bf16.gmra.mrb[144].mxu0 %v8008_v4  ;;  %v2974_v46 = vpack.c.bf16 %v2863_v31, %v2860_v43 }
 0x3b7   : > { %4761 = vmatprep.mubr.bf16.mxu0 %v8009_v19 }
 0x3b8   : > { %4781 = vmatprep.mubr.bf16.mxu1 %v2974_v46 }
 0x3be   : > { %4762 = vmatmul.mubr.bf16.gmra.mrb[148].mxu0 %v8010_v59 }
 0x3c1   : > { %v2867_v63 = vpop.f32.mrb[84].mxu0 }
 0x3c2   : > { %v2869_v53 = vpop.f32.mrb[85].mxu0  ;;  %v2868_v54 = vadd.f32 %v2867_v63, %v6864_v16 }
 0x3c3   : > { %v2870_v20 = vpop.f32.mrb[86].mxu0 }
 0x3c4   : > { %v2871_v9 = vadd.f32 %v2870_v20, %v6864_v16  ;;  %v2872_v61 = vpop.f32.mrb[87].mxu0 }
 0x3c6   : > { %v2975_v10 = vpack.c.bf16 %v2871_v9, %v2868_v54 }
 0x3c8   : > { %4782 = vmatmul.mubr.bf16.gmra.mrb[16].mxu1 %v2975_v10 }
 0x3d1   : > { %v2875_v44 = vpop.f32.mrb[88].mxu0 }
 0x3d2   : > { %v2877_v38 = vpop.f32.mrb[89].mxu0  ;;  %v2876_v42 = vadd.f32 %v2875_v44, %v6864_v16 }
 0x3d3   : > { %v2878_v21 = vpop.f32.mrb[90].mxu0 }
 0x3d4   : > { %v2879_v0 = vadd.f32 %v2878_v21, %v6864_v16  ;;  %v2880_v47 = vpop.f32.mrb[91].mxu0 }
 0x3d6   : > { %v2976_v45 = vpack.c.bf16 %v2879_v0, %v2876_v42 }
 0x3d8   : > { %4785 = vmatprep.mubr.bf16.mxu1 %v2976_v45 }
 0x3e1   : > { %v2883_v40 = vpop.f32.mrb[92].mxu0 }
 0x3e2   : > { %v2885_v17 = vpop.f32.mrb[93].mxu0  ;;  %v2884_v11 = vadd.f32 %v2883_v40, %v6864_v16 }
 0x3e3   : > { %v2886_v26 = vpop.f32.mrb[94].mxu0 }
 0x3e4   : > { %v2887_v39 = vadd.f32 %v2886_v26, %v6864_v16  ;;  %v2888_v23 = vpop.f32.mrb[95].mxu0 }
 0x3e6   : > { %v2977_v36 = vpack.c.bf16 %v2887_v39, %v2884_v11 }
 0x3e8   : > { %4786 = vmatmul.mubr.bf16.gmra.mrb[20].mxu1 %v2977_v36 }
 0x3f1   : > { %v2891_v29 = vpop.f32.mrb[96].mxu0 }
 0x3f2   : > { %v2893_v24 = vpop.f32.mrb[97].mxu0  ;;  %v2892_v49 = vadd.f32 %v2891_v29, %v6864_v16 }
 0x3f3   : > { %v2894_v34 = vpop.f32.mrb[98].mxu0 }
 0x3f4   : > { %v2895_v15 = vadd.f32 %v2894_v34, %v6864_v16  ;;  %v2896_v62 = vpop.f32.mrb[99].mxu0 }
 0x3f6   : > { %v2978_v30 = vpack.c.bf16 %v2895_v15, %v2892_v49 }
 0x3f8   : > { %4789 = vmatprep.mubr.bf16.mxu1 %v2978_v30 }
 0x401   : > { %v2899_v28 = vpop.f32.mrb[100].mxu0 }
 0x402   : > { %v2901_v25 = vpop.f32.mrb[101].mxu0  ;;  %v2900_v22 = vadd.f32 %v2899_v28, %v6864_v16 }
 0x403   : > { %v2902_v6 = vpop.f32.mrb[102].mxu0 }
 0x404   : > { %v2903_v3 = vadd.f32 %v2902_v6, %v6864_v16  ;;  %v2904_v55 = vpop.f32.mrb[103].mxu0 }
 0x406   : > { %v2979_v8 = vpack.c.bf16 %v2903_v3, %v2900_v22 }
 0x408   : > { %4790 = vmatmul.mubr.bf16.gmra.mrb[24].mxu1 %v2979_v8 }
 0x412   : > { %v2907_v48 = vpop.f32.mrb[104].mxu0 }
 0x413   : > { %v2909_v57 = vpop.f32.mrb[105].mxu0  ;;  %v2908_v52 = vadd.f32 %v2907_v48, %v6864_v16 }
 0x414   : > { %v2910_v50 = vpop.f32.mrb[106].mxu0 }
 0x415   : > { %v2911_v51 = vadd.f32 %v2910_v50, %v6864_v16  ;;  %v2912_v1 = vpop.f32.mrb[107].mxu0 }
 0x417   : > { %v2980_v12 = vpack.c.bf16 %v2911_v51, %v2908_v52 }
 0x419   : > { %4793 = vmatprep.mubr.bf16.mxu1 %v2980_v12 }
 0x41b   : > { %v4767_v41 = vpop.f32.mrb[0].mxu1 }
 0x41c   : > { %v3193_v56 = vadd.f32 %v4767_v41, %v7614_v35  ;;  %v3184_v43 = vpop.f32.mrb[1].mxu1 }
 0x41d   : > { %v3185_v31 = vadd.f32 %v3184_v43, %v7614_v35  ;;  %v4768_v7 = vpop.f32.mrb[2].mxu1 }
 0x41e   : > { %v3196_v4 = vadd.f32 %v4768_v7, %v7614_v35  ;;  %v3187_v46 = vpop.f32.mrb[3].mxu1  ;;  %v3369_v59 = vmax.f32 %v3193_v56, 0.0 }
 0x41f   : > { %v3188_v19 = vadd.f32 %v3187_v46, %v7614_v35  ;;  %v3367_v53 = vmax.f32 %v3185_v31, 0.0 }
 0x420   : > { %v3370_v63 = vmax.f32 %v3196_v4, 0.0 }
 0x421   : > { %v3368_v20 = vmax.f32 %v3188_v19, 0.0 }
 0x422   : > { %v7620_v54 = vpack.c.bf16 %v3370_v63, %v3369_v59  ;;  %v2915_v9 = vpop.f32.mrb[108].mxu0 }
 0x423   : > { %v7622_v61 = vpack.c.bf16 %v3368_v20, %v3367_v53  ;;  %v2917_v10 = vpop.f32.mrb[109].mxu0  ;;  %v2916_v38 = vadd.f32 %v2915_v9, %v6864_v16 }
 0x424   : > { %v2918_v44 = vpop.f32.mrb[110].mxu0 }
 0x425   : > { %v2919_v14 = vadd.f32 %v2918_v44, %v6864_v16  ;;  %v2920_v21 = vpop.f32.mrb[111].mxu0 }
 0x427   : > { %v2981_v42 = vpack.c.bf16 %v2919_v14, %v2916_v38 }
 0x429   : > { %4794 = vmatmul.mubr.bf16.gmra.mrb[28].mxu1 %v2981_v42 }
 0x431   : > { %v2923_v0 = vpop.f32.mrb[112].mxu0 }
 0x432   : > { %v2925_v47 = vpop.f32.mrb[113].mxu0  ;;  %v2924_v2 = vadd.f32 %v2923_v0, %v6864_v16 }
 0x433   : > { %v2926_v45 = vpop.f32.mrb[114].mxu0 }
 0x434   : > { %v2927_v37 = vadd.f32 %v2926_v45, %v6864_v16  ;;  %v2928_v13 = vpop.f32.mrb[115].mxu0 }
 0x436   : > { %v2982_v40 = vpack.c.bf16 %v2927_v37, %v2924_v2 }
 0x438   : > { %4797 = vmatprep.mubr.bf16.mxu1 %v2982_v40 }
 0x43c   : > { %v4771_v17 = vpop.f32.mrb[4].mxu1 }
 0x43d   : > { %v3209_v33 = vadd.f32 %v4771_v17, %v7614_v35  ;;  %v3200_v26 = vpop.f32.mrb[5].mxu1 }
 0x43e   : > { %v3201_v11 = vadd.f32 %v3200_v26, %v7614_v35  ;;  %v4772_v39 = vpop.f32.mrb[6].mxu1 }
 0x43f   : > { %v3212_v23 = vadd.f32 %v4772_v39, %v7614_v35  ;;  %v3203_v36 = vpop.f32.mrb[7].mxu1  ;;  %v3373_v60 = vmax.f32 %v3209_v33, 0.0 }
 0x440   : > { %v3204_v27 = vadd.f32 %v3203_v36, %v7614_v35  ;;  %v3371_v29 = vmax.f32 %v3201_v11, 0.0 }
 0x441   : > { %v3374_v18 = vmax.f32 %v3212_v23, 0.0  ;;  %v2931_v34 = vpop.f32.mrb[116].mxu0 }
 0x442   : > { %v3372_v24 = vmax.f32 %v3204_v27, 0.0  ;;  %v2933_v15 = vpop.f32.mrb[117].mxu0  ;;  %v2932_v28 = vadd.f32 %v2931_v34, %v6864_v16 }
 0x443   : > { %v7632_v49 = vpack.c.bf16 %v3374_v18, %v3373_v60  ;;  %v2934_v30 = vpop.f32.mrb[118].mxu0 }
 0x444   : > { %v7634_v62 = vpack.c.bf16 %v3372_v24, %v3371_v29  ;;  %v2935_v25 = vadd.f32 %v2934_v30, %v6864_v16  ;;  %v2936_v6 = vpop.f32.mrb[119].mxu0 }
 0x446   : > { %v2983_v22 = vpack.c.bf16 %v2935_v25, %v2932_v28 }
 0x448   : > { %4798 = vmatmul.mubr.bf16.gmra.mrb[32].mxu1 %v2983_v22 }
 0x451   : > { %v2939_v3 = vpop.f32.mrb[120].mxu0 }
 0x452   : > { %v2941_v55 = vpop.f32.mrb[121].mxu0  ;;  %v2940_v48 = vadd.f32 %v2939_v3, %v6864_v16 }
 0x453   : > { %v2942_v8 = vpop.f32.mrb[122].mxu0 }
 0x454   : > { %v2943_v57 = vadd.f32 %v2942_v8, %v6864_v16  ;;  %v2944_v50 = vpop.f32.mrb[123].mxu0 }
 0x456   : > { %v2984_v58 = vpack.c.bf16 %v2943_v57, %v2940_v48 }
 0x458   : > { %4801 = vmatprep.mubr.bf16.mxu1 %v2984_v58 }
 0x45b   : > { %v4775_v52 = vpop.f32.mrb[8].mxu1 }
 0x45c   : > { %v3225_v51 = vadd.f32 %v4775_v52, %v7614_v35  ;;  %v3216_v1 = vpop.f32.mrb[9].mxu1 }
 0x45d   : > { %v3217_v12 = vadd.f32 %v3216_v1, %v7614_v35  ;;  %v4776_v41 = vpop.f32.mrb[10].mxu1 }
 0x45e   : > { %v3228_v56 = vadd.f32 %v4776_v41, %v7614_v35  ;;  %v3219_v43 = vpop.f32.mrb[11].mxu1  ;;  %v3377_v7 = vmax.f32 %v3225_v51, 0.0 }
 0x45f   : > { %v3220_v31 = vadd.f32 %v3219_v43, %v7614_v35  ;;  %v3375_v19 = vmax.f32 %v3217_v12, 0.0 }
 0x460   : > { %v3378_v4 = vmax.f32 %v3228_v56, 0.0 }
 0x461   : > { %v2947_v46 = vpop.f32.mrb[124].mxu0  ;;  %v3376_v59 = vmax.f32 %v3220_v31, 0.0 }
 0x462   : > { %v2949_v63 = vpop.f32.mrb[125].mxu0  ;;  %v7644_v53 = vpack.c.bf16 %v3378_v4, %v3377_v7  ;;  %v2948_v10 = vadd.f32 %v2947_v46, %v6864_v16 }
 0x463   : > { %v2950_v20 = vpop.f32.mrb[126].mxu0  ;;  %v7646_v9 = vpack.c.bf16 %v3376_v59, %v3375_v19 }
 0x464   : > { %v2951_v44 = vadd.f32 %v2950_v20, %v6864_v16  ;;  %v2952_v38 = vpop.f32.mrb[127].mxu0 }
 0x466   : > { %v2985_v14 = vpack.c.bf16 %v2951_v44, %v2948_v10 }
 0x468   : > { %4802 = vmatmul.mubr.bf16.gmra.mrb[36].mxu1 %v2985_v14 }
 0x469   : > { %v4743_v21 = vpop.f32.mrb[128].mxu0 }
 0x46a   : > { %v3097_v42 = vadd.f32 %v4743_v21, %v7614_v35  ;;  %v3088_v0 = vpop.f32.mrb[129].mxu0 }
 0x46b   : > { %v3089_v47 = vadd.f32 %v3088_v0, %v7614_v35  ;;  %v4744_v45 = vpop.f32.mrb[130].mxu0 }
 0x46c   : > { %v3100_v2 = vadd.f32 %v4744_v45, %v7614_v35  ;;  %v3091_v37 = vpop.f32.mrb[131].mxu0  ;;  %v3345_v40 = vmax.f32 %v3097_v42, 0.0 }
 0x46d   : > { %v3092_v13 = vadd.f32 %v3091_v37, %v7614_v35  ;;  %v3343_v33 = vmax.f32 %v3089_v47, 0.0 }
 0x46e   : > { %v3346_v17 = vmax.f32 %v3100_v2, 0.0 }
 0x46f   : > { %v3344_v26 = vmax.f32 %v3092_v13, 0.0 }
 0x470   : > { %v3408_v16 = vpack.c.bf16 %v3346_v17, %v3345_v40 }
 0x471   : > { %v3407_v11 = vpack.c.bf16 %v3344_v26, %v3343_v33  ;;  %v4747_v39 = vpop.f32.mrb[132].mxu0 }
 0x472   : > { %v3113_v23 = vadd.f32 %v4747_v39, %v7614_v35  ;;  %v3104_v36 = vpop.f32.mrb[133].mxu0 }
 0x473   : > { %v3105_v27 = vadd.f32 %v3104_v36, %v7614_v35  ;;  %v4748_v60 = vpop.f32.mrb[134].mxu0  ;;  %4821 = vmatprep.mubr.bf16.mxu1 %v3407_v11 }
 0x474   : > { %v3116_v18 = vadd.f32 %v4748_v60, %v7614_v35  ;;  %v3107_v29 = vpop.f32.mrb[135].mxu0  ;;  %4822 = vmatmul.mubr.bf16.vlgmr.msra.gmra.mrb[40].mxu1 %v3408_v16  ;;  %v3349_v34 = vmax.f32 %v3113_v23, 0.0 }
 0x475   : > { %v3108_v24 = vadd.f32 %v3107_v29, %v7614_v35  ;;  %v3347_v30 = vmax.f32 %v3105_v27, 0.0 }
 0x476   : > { %v3350_v15 = vmax.f32 %v3116_v18, 0.0 }
 0x477   : > { %v3348_v28 = vmax.f32 %v3108_v24, 0.0 }
 0x478   : > { %v3410_v25 = vpack.c.bf16 %v3350_v15, %v3349_v34 }
 0x479   : > { %v3409_v6 = vpack.c.bf16 %v3348_v28, %v3347_v30  ;;  %v4751_v22 = vpop.f32.mrb[136].mxu0 }
 0x47a   : > { %v3129_v3 = vadd.f32 %v4751_v22, %v7614_v35  ;;  %v3120_v55 = vpop.f32.mrb[137].mxu0 }
 0x47b   : > { %v3121_v8 = vadd.f32 %v3120_v55, %v7614_v35  ;;  %v4752_v48 = vpop.f32.mrb[138].mxu0  ;;  %4825 = vmatprep.mubr.bf16.mxu1 %v3409_v6  ;;  %v4779_v50 = vpop.f32.mrb[12].mxu1 }
 0x47c   : > { %v3132_v57 = vadd.f32 %v4752_v48, %v7614_v35  ;;  %v3123_v58 = vpop.f32.mrb[139].mxu0  ;;  %4826 = vmatmul.mubr.bf16.gmra.mrb[44].mxu1 %v3410_v25  ;;  %v3241_v52 = vadd.f32 %v4779_v50, %v7614_v35  ;;  %v3232_v1 = vpop.f32.mrb[13].mxu1  ;;  %v3353_v12 = vmax.f32 %v3129_v3, 0.0 }
 0x47d   : > { %v3124_v51 = vadd.f32 %v3123_v58, %v7614_v35  ;;  %v3233_v56 = vadd.f32 %v3232_v1, %v7614_v35  ;;  %v4780_v43 = vpop.f32.mrb[14].mxu1  ;;  %v3351_v31 = vmax.f32 %v3121_v8, 0.0 }
 0x47e   : > { %v3354_v41 = vmax.f32 %v3132_v57, 0.0  ;;  %v3244_v4 = vadd.f32 %v4780_v43, %v7614_v35  ;;  %v3235_v46 = vpop.f32.mrb[15].mxu1  ;;  %v3381_v63 = vmax.f32 %v3241_v52, 0.0 }
 0x47f   : > { %v3352_v7 = vmax.f32 %v3124_v51, 0.0  ;;  %v3236_v59 = vadd.f32 %v3235_v46, %v7614_v35  ;;  %v3379_v38 = vmax.f32 %v3233_v56, 0.0 }
 0x480   : > { %v3412_v19 = vpack.c.bf16 %v3354_v41, %v3353_v12  ;;  %v3382_v10 = vmax.f32 %v3244_v4, 0.0 }
 0x481   : > { %v3411_v20 = vpack.c.bf16 %v3352_v7, %v3351_v31  ;;  %v4755_v44 = vpop.f32.mrb[140].mxu0  ;;  %v3380_v14 = vmax.f32 %v3236_v59, 0.0 }
 0x482   : > { %v3145_v21 = vadd.f32 %v4755_v44, %v7614_v35  ;;  %v3136_v42 = vpop.f32.mrb[141].mxu0  ;;  %v7667_v0 = vpack.c.bf16 %v3382_v10, %v3381_v63 }
 0x483   : > { %v3137_v47 = vadd.f32 %v3136_v42, %v7614_v35  ;;  %v4756_v45 = vpop.f32.mrb[142].mxu0  ;;  %4829 = vmatprep.mubr.bf16.mxu1 %v3411_v20  ;;  %v7670_v2 = vpack.c.bf16 %v3380_v14, %v3379_v38 }
 0x484   : > { %v3148_v37 = vadd.f32 %v4756_v45, %v7614_v35  ;;  %v3139_v13 = vpop.f32.mrb[143].mxu0  ;;  %4830 = vmatmul.mubr.bf16.gmra.mrb[48].mxu1 %v3412_v19  ;;  %v3357_v17 = vmax.f32 %v3145_v21, 0.0  ;;  %v5124_v45 = vld [vmem:[#allocation13 + $0x10] sm:$0xff]  }
 0x485   : > { %v3140_v40 = vadd.f32 %v3139_v13, %v7614_v35  ;;  %v3355_v26 = vmax.f32 %v3137_v47, 0.0  ;;  %v5122_v47 = vld [vmem:[#allocation13] sm:$0xff]   ;;  %v5125_v13 = vld [vmem:[#allocation13 + $0x18] sm:$0xff]  }
 0x486   : > { %v3358_v33 = vmax.f32 %v3148_v37, 0.0  ;;  %4885 = vmatprep.subr.bf16.mxu1 %v5122_v47 }
 0x487   : > { %v3356_v16 = vmax.f32 %v3140_v40, 0.0  ;;  %4886 = vmatpush3.bf16.msra.mxu1 %v5122_v47 }
 0x488   : > { %v3414_v11 = vpack.c.bf16 %v3358_v33, %v3357_v17 }
 0x489   : > { %v3413_v39 = vpack.c.bf16 %v3356_v16, %v3355_v26  ;;  %v4759_v23 = vpop.f32.mrb[144].mxu0  ;;  %v5126_v26 = vld [vmem:[#allocation13 + $0x20] sm:$0xff]  }
 0x48a   : > { %v3161_v36 = vadd.f32 %v4759_v23, %v7614_v35  ;;  %v3152_v27 = vpop.f32.mrb[145].mxu0  ;;  %v5127_v23 = vld [vmem:[#allocation13 + $0x28] sm:$0xff]  }
 0x48b   : > { %v3153_v60 = vadd.f32 %v3152_v27, %v7614_v35  ;;  %v4760_v18 = vpop.f32.mrb[146].mxu0  ;;  %4833 = vmatprep.mubr.bf16.mxu1 %v3413_v39  ;;  %v5129_v27 = vld [vmem:[#allocation13 + $0x38] sm:$0xff]  }
 0x48c   : > { %v3164_v29 = vadd.f32 %v4760_v18, %v7614_v35  ;;  %v3155_v24 = vpop.f32.mrb[147].mxu0  ;;  %4834 = vmatmul.mubr.bf16.gmra.mrb[52].mxu1 %v3414_v11  ;;  %v3361_v15 = vmax.f32 %v3161_v36, 0.0  ;;  %v5128_v36 = vld [vmem:[#allocation13 + $0x30] sm:$0xff]  }
 0x48d   : > { %v3156_v34 = vadd.f32 %v3155_v24, %v7614_v35  ;;  %v3359_v28 = vmax.f32 %v3153_v60, 0.0 }
 0x48e   : > { %v3362_v30 = vmax.f32 %v3164_v29, 0.0 }
 0x48f   : > { %v3360_v25 = vmax.f32 %v3156_v34, 0.0 }
 0x490   : > { %v3416_v6 = vpack.c.bf16 %v3362_v30, %v3361_v15 }
 0x491   : > { %v3415_v22 = vpack.c.bf16 %v3360_v25, %v3359_v28  ;;  %v4763_v3 = vpop.f32.mrb[148].mxu0 }
 0x492   : > { %v3177_v55 = vadd.f32 %v4763_v3, %v7614_v35  ;;  %v3168_v8 = vpop.f32.mrb[149].mxu0 }
 0x493   : > { %v3169_v48 = vadd.f32 %v3168_v8, %v7614_v35  ;;  %v4764_v57 = vpop.f32.mrb[150].mxu0  ;;  %4837 = vmatprep.mubr.bf16.mxu1 %v3415_v22 }
 0x494   : > { %v3180_v50 = vadd.f32 %v4764_v57, %v7614_v35  ;;  %v3171_v58 = vpop.f32.mrb[151].mxu0  ;;  %4838 = vmatmul.mubr.bf16.gmra.mrb[56].mxu1 %v3416_v6  ;;  %v3365_v51 = vmax.f32 %v3177_v55, 0.0 }
 0x495   : > { %v3172_v52 = vadd.f32 %v3171_v58, %v7614_v35  ;;  %v3363_v12 = vmax.f32 %v3169_v48, 0.0 }
 0x496   : > { %v3366_v1 = vmax.f32 %v3180_v50, 0.0 }
 0x497   : > { %v3364_v41 = vmax.f32 %v3172_v52, 0.0 }
 0x498   : > { %v3418_v56 = vpack.c.bf16 %v3366_v1, %v3365_v51 }
 0x499   : > { %v3417_v43 = vpack.c.bf16 %v3364_v41, %v3363_v12 }
 0x49b   : > { %4841 = vmatprep.mubr.bf16.mxu1 %v3417_v43  ;;  %v4783_v31 = vpop.f32.mrb[16].mxu1 }
 0x49c   : > { %4842 = vmatmul.mubr.bf16.gmra.mrb[60].mxu1 %v3418_v56  ;;  %v3257_v7 = vadd.f32 %v4783_v31, %v7614_v35  ;;  %v3248_v4 = vpop.f32.mrb[17].mxu1 }
 0x49d   : > { %4845 = vmatprep.mubr.bf16.mxu1 %v7622_v61  ;;  %v3249_v46 = vadd.f32 %v3248_v4, %v7614_v35  ;;  %v4784_v19 = vpop.f32.mrb[18].mxu1  ;;  %v5123_v61 = vld [vmem:[#allocation13 + $0x8] sm:$0xff]  }
 0x49e   : > { %v3260_v59 = vadd.f32 %v4784_v19, %v7614_v35  ;;  %v3251_v63 = vpop.f32.mrb[19].mxu1  ;;  %v3385_v10 = vmax.f32 %v3257_v7, 0.0  ;;  %4887 = vmatprep.subr.bf16.mxu1 %v5123_v61 }
 0x49f   : > { %v3252_v20 = vadd.f32 %v3251_v63, %v7614_v35  ;;  %v3383_v38 = vmax.f32 %v3249_v46, 0.0  ;;  %4888 = vmatpush3.bf16.msra.mxu1 %v5123_v61 }
 0x4a0   : > { %v3386_v44 = vmax.f32 %v3260_v59, 0.0  ;;  %4889 = vmatprep.subr.bf16.mxu1 %v5124_v45 }
 0x4a1   : > { %v3384_v14 = vmax.f32 %v3252_v20, 0.0 }
 0x4a2   : > { %v3428_v21 = vpack.c.bf16 %v3386_v44, %v3385_v10 }
 0x4a3   : > { %v3427_v42 = vpack.c.bf16 %v3384_v14, %v3383_v38  ;;  %4890 = vmatpush3.bf16.msra.mxu1 %v5124_v45 }
 0x4a4   : > { %4846 = vmatmul.mubr.bf16.gmra.mrb[64].mxu1 %v7620_v54  ;;  %4891 = vmatprep.subr.bf16.mxu1 %v5125_v13 }
 0x4a5   : > { %4849 = vmatprep.mubr.bf16.mxu1 %v7634_v62 }
 0x4a7   : > { %4892 = vmatpush3.bf16.msra.mxu1 %v5125_v13 }
 0x4a8   : > { %4893 = vmatprep.subr.bf16.mxu1 %v5126_v26 }
 0x4ab   : > { %4894 = vmatpush3.bf16.msra.mxu1 %v5126_v26 }
 0x4ac   : > { %4850 = vmatmul.mubr.bf16.gmra.mrb[68].mxu1 %v7632_v49  ;;  %4895 = vmatprep.subr.bf16.mxu1 %v5127_v23 }
 0x4ad   : > { %4853 = vmatprep.mubr.bf16.mxu1 %v7646_v9 }
 0x4af   : > { %4896 = vmatpush3.bf16.msra.mxu1 %v5127_v23 }
 0x4b0   : > { %4897 = vmatprep.subr.bf16.mxu1 %v5128_v36 }
 0x4b3   : > { %4898 = vmatpush3.bf16.msra.mxu1 %v5128_v36 }
 0x4b4   : > { %4854 = vmatmul.mubr.bf16.gmra.mrb[72].mxu1 %v7644_v53  ;;  %4899 = vmatprep.subr.bf16.mxu1 %v5129_v27 }
 0x4b5   : > { %4857 = vmatprep.mubr.bf16.mxu1 %v7670_v2 }
 0x4b7   : > { %4900 = vmatpush3.bf16.msra.mxu1 %v5129_v27 }
 0x4bb   : > { %v4787_v54 = vpop.f32.mrb[20].mxu1 }
 0x4bc   : > { %4858 = vmatmul.mubr.bf16.gmra.mrb[76].mxu1 %v7667_v0  ;;  %v3273_v62 = vadd.f32 %v4787_v54, %v7614_v35  ;;  %v3264_v37 = vpop.f32.mrb[21].mxu1 }
 0x4bd   : > { %4861 = vmatprep.mubr.bf16.mxu1 %v3427_v42  ;;  %v3265_v40 = vadd.f32 %v3264_v37, %v7614_v35  ;;  %v4788_v49 = vpop.f32.mrb[22].mxu1 }
 0x4be   : > { %v3276_v9 = vadd.f32 %v4788_v49, %v7614_v35  ;;  %v3267_v17 = vpop.f32.mrb[23].mxu1  ;;  %v3389_v53 = vmax.f32 %v3273_v62, 0.0 }
 0x4bf   : > { %v3268_v33 = vadd.f32 %v3267_v17, %v7614_v35  ;;  %v3387_v16 = vmax.f32 %v3265_v40, 0.0 }
 0x4c0   : > { %v3390_v2 = vmax.f32 %v3276_v9, 0.0 }
 0x4c1   : > { %v3388_v0 = vmax.f32 %v3268_v33, 0.0 }
 0x4c2   : > { %v3430_v11 = vpack.c.bf16 %v3390_v2, %v3389_v53  ;;  %v3457_v2 = vsub.s32 4, %v6341_v32 }
 0x4c3   : > { %v3429_v39 = vpack.c.bf16 %v3388_v0, %v3387_v16 }
 0x4c4   : > { %4862 = vmatmul.mubr.bf16.gmra.mrb[80].mxu1 %v3428_v21 }
 0x4c5   : > { %4865 = vmatprep.mubr.bf16.mxu1 %v3429_v39  ;;  %v7716_v39 = vrot.slane %v7611_v5, %v3457_v2 }
 0x4cc   : > { %4866 = vmatmul.mubr.bf16.gmra.mrb[84].mxu1 %v3430_v11 }
 0x4db   : > { %v4791_v60 = vpop.f32.mrb[24].mxu1 }
 0x4dc   : > { %v3289_v18 = vadd.f32 %v4791_v60, %v7614_v35  ;;  %v3280_v29 = vpop.f32.mrb[25].mxu1 }
 0x4dd   : > { %v3281_v24 = vadd.f32 %v3280_v29, %v7614_v35  ;;  %v4792_v34 = vpop.f32.mrb[26].mxu1 }
 0x4de   : > { %v3292_v15 = vadd.f32 %v4792_v34, %v7614_v35  ;;  %v3283_v30 = vpop.f32.mrb[27].mxu1  ;;  %v3393_v25 = vmax.f32 %v3289_v18, 0.0 }
 0x4df   : > { %v3284_v28 = vadd.f32 %v3283_v30, %v7614_v35  ;;  %v3391_v22 = vmax.f32 %v3281_v24, 0.0 }
 0x4e0   : > { %v3394_v6 = vmax.f32 %v3292_v15, 0.0 }
 0x4e1   : > { %v3392_v3 = vmax.f32 %v3284_v28, 0.0 }
 0x4e2   : > { %v3432_v55 = vpack.c.bf16 %v3394_v6, %v3393_v25 }
 0x4e3   : > { %v3431_v8 = vpack.c.bf16 %v3392_v3, %v3391_v22 }
 0x4e5   : > { %4869 = vmatprep.mubr.bf16.mxu1 %v3431_v8 }
 0x4e6   : > { %4870 = vmatmul.mubr.bf16.gmra.mrb[88].mxu1 %v3432_v55 }
 0x4fc   : > { %v4795_v48 = vpop.f32.mrb[28].mxu1 }
 0x4fd   : > { %v3305_v57 = vadd.f32 %v4795_v48, %v7614_v35  ;;  %v3296_v50 = vpop.f32.mrb[29].mxu1 }
 0x4fe   : > { %v3297_v58 = vadd.f32 %v3296_v50, %v7614_v35  ;;  %v4796_v52 = vpop.f32.mrb[30].mxu1 }
 0x4ff   : > { %v3308_v51 = vadd.f32 %v4796_v52, %v7614_v35  ;;  %v3299_v1 = vpop.f32.mrb[31].mxu1  ;;  %v3397_v41 = vmax.f32 %v3305_v57, 0.0 }
 0x500   : > { %v3300_v12 = vadd.f32 %v3299_v1, %v7614_v35  ;;  %v3395_v43 = vmax.f32 %v3297_v58, 0.0 }
 0x501   : > { %v3398_v56 = vmax.f32 %v3308_v51, 0.0 }
 0x502   : > { %v3396_v31 = vmax.f32 %v3300_v12, 0.0 }
 0x503   : > { %v3434_v7 = vpack.c.bf16 %v3398_v56, %v3397_v41 }
 0x504   : > { %v3433_v4 = vpack.c.bf16 %v3396_v31, %v3395_v43 }
 0x506   : > { %4873 = vmatprep.mubr.bf16.mxu1 %v3433_v4 }
 0x507   : > { %4874 = vmatmul.mubr.bf16.gmra.mrb[92].mxu1 %v3434_v7 }
 0x51b   : > { %v4799_v46 = vpop.f32.mrb[32].mxu1 }
 0x51c   : > { %v3321_v19 = vadd.f32 %v4799_v46, %v7614_v35  ;;  %v3312_v59 = vpop.f32.mrb[33].mxu1 }
 0x51d   : > { %v3313_v63 = vadd.f32 %v3312_v59, %v7614_v35  ;;  %v4800_v20 = vpop.f32.mrb[34].mxu1 }
 0x51e   : > { %v3324_v10 = vadd.f32 %v4800_v20, %v7614_v35  ;;  %v3315_v44 = vpop.f32.mrb[35].mxu1  ;;  %v3401_v14 = vmax.f32 %v3321_v19, 0.0 }
 0x51f   : > { %v3316_v38 = vadd.f32 %v3315_v44, %v7614_v35  ;;  %v3399_v42 = vmax.f32 %v3313_v63, 0.0 }
 0x520   : > { %v3402_v21 = vmax.f32 %v3324_v10, 0.0 }
 0x521   : > { %v3400_v47 = vmax.f32 %v3316_v38, 0.0 }
 0x522   : > { %v3436_v61 = vpack.c.bf16 %v3402_v21, %v3401_v14 }
 0x523   : > { %v3435_v45 = vpack.c.bf16 %v3400_v47, %v3399_v42 }
 0x525   : > { %4877 = vmatprep.mubr.bf16.mxu1 %v3435_v45 }
 0x526   : > { %4878 = vmatmul.mubr.bf16.gmra.mrb[96].mxu1 %v3436_v61 }
 0x53b   : > { %v4803_v54 = vpop.f32.mrb[36].mxu1 }
 0x53c   : > { %v3337_v62 = vadd.f32 %v4803_v54, %v7614_v35  ;;  %v3328_v37 = vpop.f32.mrb[37].mxu1 }
 0x53d   : > { %v3329_v13 = vadd.f32 %v3328_v37, %v7614_v35  ;;  %v4804_v40 = vpop.f32.mrb[38].mxu1 }
 0x53e   : > { %v3340_v49 = vadd.f32 %v4804_v40, %v7614_v35  ;;  %v3331_v9 = vpop.f32.mrb[39].mxu1  ;;  %v3405_v33 = vmax.f32 %v3337_v62, 0.0 }
 0x53f   : > { %v3332_v17 = vadd.f32 %v3331_v9, %v7614_v35  ;;  %v3403_v26 = vmax.f32 %v3329_v13, 0.0 }
 0x540   : > { %v3406_v53 = vmax.f32 %v3340_v49, 0.0 }
 0x541   : > { %v3404_v16 = vmax.f32 %v3332_v17, 0.0 }
 0x542   : > { %v3438_v0 = vpack.c.bf16 %v3406_v53, %v3405_v33 }
 0x543   : > { %v3437_v11 = vpack.c.bf16 %v3404_v16, %v3403_v26 }
 0x545   : > { %4881 = vmatprep.mubr.bf16.mxu1 %v3437_v11 }
 0x546   : > { %4882 = vmatmul.mubr.bf16.gmra.mrb[100].mxu1 %v3438_v0 }
 0x547   : > { %v4823_v23 = vpop.f32.mrb[40].mxu1 }
 0x548   : > { %v3550_v36 = vadd.f32 %v4823_v23, %v7716_v39  ;;  %v3541_v27 = vpop.f32.mrb[41].mxu1 }
 0x549   : > { %v3542_v60 = vadd.f32 %v3541_v27, %v7716_v39  ;;  %v4824_v35 = vpop.f32.mrb[42].mxu1 }
 0x54a   : > { %v3553_v18 = vadd.f32 %v4824_v35, %v7716_v39  ;;  %v3544_v29 = vpop.f32.mrb[43].mxu1  ;;  %v3798_v34 = vmax.f32 %v3550_v36, 0.0 }
 0x54b   : > { %v3545_v24 = vadd.f32 %v3544_v29, %v7716_v39  ;;  %v3796_v30 = vmax.f32 %v3542_v60, 0.0 }
 0x54c   : > { %v3799_v15 = vmax.f32 %v3553_v18, 0.0 }
 0x54d   : > { %v3797_v28 = vmax.f32 %v3545_v24, 0.0 }
 0x54e   : > { %v3861_v5 = vpack.c.bf16 %v3799_v15, %v3798_v34 }
 0x54f   : > { %v3860_v25 = vpack.c.bf16 %v3797_v28, %v3796_v30  ;;  %v4827_v6 = vpop.f32.mrb[44].mxu1 }
 0x550   : > { %v3566_v22 = vadd.f32 %v4827_v6, %v7716_v39  ;;  %v3557_v3 = vpop.f32.mrb[45].mxu1 }
 0x551   : > { %v3558_v55 = vadd.f32 %v3557_v3, %v7716_v39  ;;  %v4828_v8 = vpop.f32.mrb[46].mxu1  ;;  %4901 = vmatprep.mubr.bf16.mxu1 %v3860_v25 }
 0x552   : > { %v3569_v48 = vadd.f32 %v4828_v8, %v7716_v39  ;;  %v3560_v57 = vpop.f32.mrb[47].mxu1  ;;  %4902 = vmatmul.mubr.bf16.vlgmr.msra.gmra.mrb[104].mxu1 %v3861_v5  ;;  %v3802_v58 = vmax.f32 %v3566_v22, 0.0 }
 0x553   : > { %v3561_v50 = vadd.f32 %v3560_v57, %v7716_v39  ;;  %v3800_v51 = vmax.f32 %v3558_v55, 0.0 }
 0x554   : > { %v3803_v52 = vmax.f32 %v3569_v48, 0.0 }
 0x555   : > { %v3801_v1 = vmax.f32 %v3561_v50, 0.0 }
 0x556   : > { %v3863_v12 = vpack.c.bf16 %v3803_v52, %v3802_v58 }
 0x557   : > { %v3862_v41 = vpack.c.bf16 %v3801_v1, %v3800_v51  ;;  %v4831_v56 = vpop.f32.mrb[48].mxu1 }
 0x558   : > { %v3582_v43 = vadd.f32 %v4831_v56, %v7716_v39  ;;  %v3573_v31 = vpop.f32.mrb[49].mxu1 }
 0x559   : > { %v3574_v7 = vadd.f32 %v3573_v31, %v7716_v39  ;;  %v4832_v4 = vpop.f32.mrb[50].mxu1  ;;  %4905 = vmatprep.mubr.bf16.mxu1 %v3862_v41 }
 0x55a   : > { %v3585_v46 = vadd.f32 %v4832_v4, %v7716_v39  ;;  %v3576_v19 = vpop.f32.mrb[51].mxu1  ;;  %4906 = vmatmul.mubr.bf16.gmra.mrb[108].mxu1 %v3863_v12  ;;  %v3806_v63 = vmax.f32 %v3582_v43, 0.0 }
 0x55b   : > { %v3577_v59 = vadd.f32 %v3576_v19, %v7716_v39  ;;  %v3804_v10 = vmax.f32 %v3574_v7, 0.0 }
 0x55c   : > { %v3807_v20 = vmax.f32 %v3585_v46, 0.0 }
 0x55d   : > { %v3805_v44 = vmax.f32 %v3577_v59, 0.0 }
 0x55e   : > { %v3865_v38 = vpack.c.bf16 %v3807_v20, %v3806_v63 }
 0x55f   : > { %v3864_v14 = vpack.c.bf16 %v3805_v44, %v3804_v10  ;;  %v4835_v21 = vpop.f32.mrb[52].mxu1 }
 0x560   : > { %v3598_v42 = vadd.f32 %v4835_v21, %v7716_v39  ;;  %v3589_v47 = vpop.f32.mrb[53].mxu1 }
 0x561   : > { %v3590_v61 = vadd.f32 %v3589_v47, %v7716_v39  ;;  %v4836_v45 = vpop.f32.mrb[54].mxu1  ;;  %4909 = vmatprep.mubr.bf16.mxu1 %v3864_v14 }
 0x562   : > { %v3601_v54 = vadd.f32 %v4836_v45, %v7716_v39  ;;  %v3592_v62 = vpop.f32.mrb[55].mxu1  ;;  %4910 = vmatmul.mubr.bf16.gmra.mrb[112].mxu1 %v3865_v38  ;;  %v3810_v13 = vmax.f32 %v3598_v42, 0.0 }
 0x563   : > { %v3593_v37 = vadd.f32 %v3592_v62, %v7716_v39  ;;  %v3808_v49 = vmax.f32 %v3590_v61, 0.0 }
 0x564   : > { %v3811_v40 = vmax.f32 %v3601_v54, 0.0 }
 0x565   : > { %v3809_v9 = vmax.f32 %v3593_v37, 0.0 }
 0x566   : > { %v3867_v17 = vpack.c.bf16 %v3811_v40, %v3810_v13 }
 0x567   : > { %v3866_v33 = vpack.c.bf16 %v3809_v9, %v3808_v49  ;;  %v4839_v53 = vpop.f32.mrb[56].mxu1 }
 0x568   : > { %v3614_v2 = vadd.f32 %v4839_v53, %v7716_v39  ;;  %v3605_v26 = vpop.f32.mrb[57].mxu1 }
 0x569   : > { %v3606_v16 = vadd.f32 %v3605_v26, %v7716_v39  ;;  %v4840_v0 = vpop.f32.mrb[58].mxu1  ;;  %4913 = vmatprep.mubr.bf16.mxu1 %v3866_v33 }
 0x56a   : > { %v3617_v11 = vadd.f32 %v4840_v0, %v7716_v39  ;;  %v3608_v23 = vpop.f32.mrb[59].mxu1  ;;  %4914 = vmatmul.mubr.bf16.gmra.mrb[116].mxu1 %v3867_v17  ;;  %v3814_v27 = vmax.f32 %v3614_v2, 0.0 }
 0x56b   : > { %v3609_v36 = vadd.f32 %v3608_v23, %v7716_v39  ;;  %v3812_v35 = vmax.f32 %v3606_v16, 0.0 }
 0x56c   : > { %v3815_v60 = vmax.f32 %v3617_v11, 0.0 }
 0x56d   : > { %v3813_v18 = vmax.f32 %v3609_v36, 0.0 }
 0x56e   : > { %v3869_v29 = vpack.c.bf16 %v3815_v60, %v3814_v27 }
 0x56f   : > { %v3868_v24 = vpack.c.bf16 %v3813_v18, %v3812_v35  ;;  %v4843_v34 = vpop.f32.mrb[60].mxu1 }
 0x570   : > { %v3630_v15 = vadd.f32 %v4843_v34, %v7716_v39  ;;  %v3621_v30 = vpop.f32.mrb[61].mxu1 }
 0x571   : > { %v3622_v28 = vadd.f32 %v3621_v30, %v7716_v39  ;;  %v4844_v5 = vpop.f32.mrb[62].mxu1  ;;  %4917 = vmatprep.mubr.bf16.mxu1 %v3868_v24 }
 0x572   : > { %v3633_v25 = vadd.f32 %v4844_v5, %v7716_v39  ;;  %v3624_v6 = vpop.f32.mrb[63].mxu1  ;;  %4918 = vmatmul.mubr.bf16.gmra.mrb[120].mxu1 %v3869_v29  ;;  %v3818_v3 = vmax.f32 %v3630_v15, 0.0 }
 0x573   : > { %v3625_v22 = vadd.f32 %v3624_v6, %v7716_v39  ;;  %v3816_v8 = vmax.f32 %v3622_v28, 0.0 }
 0x574   : > { %v3819_v55 = vmax.f32 %v3633_v25, 0.0 }
 0x575   : > { %v3817_v48 = vmax.f32 %v3625_v22, 0.0 }
 0x576   : > { %v3871_v57 = vpack.c.bf16 %v3819_v55, %v3818_v3 }
 0x577   : > { %v3870_v50 = vpack.c.bf16 %v3817_v48, %v3816_v8  ;;  %v4847_v58 = vpop.f32.mrb[64].mxu1 }
 0x578   : > { %v3646_v52 = vadd.f32 %v4847_v58, %v7716_v39  ;;  %v3637_v51 = vpop.f32.mrb[65].mxu1 }
 0x579   : > { %v3638_v1 = vadd.f32 %v3637_v51, %v7716_v39  ;;  %v4848_v12 = vpop.f32.mrb[66].mxu1  ;;  %4921 = vmatprep.mubr.bf16.mxu1 %v3870_v50 }
 0x57a   : > { %v3649_v41 = vadd.f32 %v4848_v12, %v7716_v39  ;;  %v3640_v56 = vpop.f32.mrb[67].mxu1  ;;  %4922 = vmatmul.mubr.bf16.gmra.mrb[124].mxu1 %v3871_v57  ;;  %v3822_v31 = vmax.f32 %v3646_v52, 0.0 }
 0x57b   : > { %v3641_v43 = vadd.f32 %v3640_v56, %v7716_v39  ;;  %v3820_v4 = vmax.f32 %v3638_v1, 0.0 }
 0x57c   : > { %v3823_v7 = vmax.f32 %v3649_v41, 0.0 }
 0x57d   : > { %v3821_v46 = vmax.f32 %v3641_v43, 0.0 }
 0x57e   : > { %v3873_v19 = vpack.c.bf16 %v3823_v7, %v3822_v31 }
 0x57f   : > { %v3872_v59 = vpack.c.bf16 %v3821_v46, %v3820_v4  ;;  %v4851_v63 = vpop.f32.mrb[68].mxu1 }
 0x580   : > { %v3662_v20 = vadd.f32 %v4851_v63, %v7716_v39  ;;  %v3653_v10 = vpop.f32.mrb[69].mxu1 }
 0x581   : > { %v3654_v44 = vadd.f32 %v3653_v10, %v7716_v39  ;;  %v4852_v38 = vpop.f32.mrb[70].mxu1  ;;  %4925 = vmatprep.mubr.bf16.mxu1 %v3872_v59 }
 0x582   : > { %v3665_v14 = vadd.f32 %v4852_v38, %v7716_v39  ;;  %v3656_v21 = vpop.f32.mrb[71].mxu1  ;;  %4926 = vmatmul.mubr.bf16.gmra.mrb[128].mxu1 %v3873_v19  ;;  %v3826_v47 = vmax.f32 %v3662_v20, 0.0 }
 0x583   : > { %v3657_v42 = vadd.f32 %v3656_v21, %v7716_v39  ;;  %v3824_v45 = vmax.f32 %v3654_v44, 0.0 }
 0x584   : > { %v3827_v61 = vmax.f32 %v3665_v14, 0.0 }
 0x585   : > { %v3825_v54 = vmax.f32 %v3657_v42, 0.0 }
 0x586   : > { %v3875_v62 = vpack.c.bf16 %v3827_v61, %v3826_v47 }
 0x587   : > { %v3874_v37 = vpack.c.bf16 %v3825_v54, %v3824_v45  ;;  %v4855_v13 = vpop.f32.mrb[72].mxu1 }
 0x588   : > { %v3678_v40 = vadd.f32 %v4855_v13, %v7716_v39  ;;  %v3669_v49 = vpop.f32.mrb[73].mxu1 }
 0x589   : > { %v3670_v9 = vadd.f32 %v3669_v49, %v7716_v39  ;;  %v4856_v17 = vpop.f32.mrb[74].mxu1  ;;  %4929 = vmatprep.mubr.bf16.mxu1 %v3874_v37 }
 0x58a   : > { %v3681_v33 = vadd.f32 %v4856_v17, %v7716_v39  ;;  %v3672_v53 = vpop.f32.mrb[75].mxu1  ;;  %4930 = vmatmul.mubr.bf16.gmra.mrb[132].mxu1 %v3875_v62  ;;  %v3830_v26 = vmax.f32 %v3678_v40, 0.0 }
 0x58b   : > { %v3673_v2 = vadd.f32 %v3672_v53, %v7716_v39  ;;  %v3828_v0 = vmax.f32 %v3670_v9, 0.0 }
 0x58c   : > { %v3831_v16 = vmax.f32 %v3681_v33, 0.0 }
 0x58d   : > { %v3829_v11 = vmax.f32 %v3673_v2, 0.0 }
 0x58e   : > { %v3877_v23 = vpack.c.bf16 %v3831_v16, %v3830_v26 }
 0x58f   : > { %v3876_v36 = vpack.c.bf16 %v3829_v11, %v3828_v0  ;;  %v4859_v27 = vpop.f32.mrb[76].mxu1 }
 0x590   : > { %v3694_v60 = vadd.f32 %v4859_v27, %v7716_v39  ;;  %v3685_v35 = vpop.f32.mrb[77].mxu1 }
 0x591   : > { %v3686_v18 = vadd.f32 %v3685_v35, %v7716_v39  ;;  %v4860_v29 = vpop.f32.mrb[78].mxu1  ;;  %4933 = vmatprep.mubr.bf16.mxu1 %v3876_v36 }
 0x592   : > { %v3697_v24 = vadd.f32 %v4860_v29, %v7716_v39  ;;  %v3688_v34 = vpop.f32.mrb[79].mxu1  ;;  %4934 = vmatmul.mubr.bf16.gmra.mrb[136].mxu1 %v3877_v23  ;;  %v3834_v30 = vmax.f32 %v3694_v60, 0.0 }
 0x593   : > { %v3689_v15 = vadd.f32 %v3688_v34, %v7716_v39  ;;  %v3832_v5 = vmax.f32 %v3686_v18, 0.0 }
 0x594   : > { %v3835_v28 = vmax.f32 %v3697_v24, 0.0 }
 0x595   : > { %v3833_v25 = vmax.f32 %v3689_v15, 0.0 }
 0x596   : > { %v3879_v6 = vpack.c.bf16 %v3835_v28, %v3834_v30 }
 0x597   : > { %v3878_v22 = vpack.c.bf16 %v3833_v25, %v3832_v5  ;;  %v4863_v3 = vpop.f32.mrb[80].mxu1 }
 0x598   : > { %v3710_v55 = vadd.f32 %v4863_v3, %v7716_v39  ;;  %v3701_v8 = vpop.f32.mrb[81].mxu1 }
 0x599   : > { %v3702_v48 = vadd.f32 %v3701_v8, %v7716_v39  ;;  %v4864_v57 = vpop.f32.mrb[82].mxu1  ;;  %4937 = vmatprep.mubr.bf16.mxu1 %v3878_v22 }
 0x59a   : > { %v3713_v50 = vadd.f32 %v4864_v57, %v7716_v39  ;;  %v3704_v58 = vpop.f32.mrb[83].mxu1  ;;  %4938 = vmatmul.mubr.bf16.gmra.mrb[140].mxu1 %v3879_v6  ;;  %v3838_v51 = vmax.f32 %v3710_v55, 0.0 }
 0x59b   : > { %v3705_v52 = vadd.f32 %v3704_v58, %v7716_v39  ;;  %v3836_v12 = vmax.f32 %v3702_v48, 0.0 }
 0x59c   : > { %v3839_v1 = vmax.f32 %v3713_v50, 0.0 }
 0x59d   : > { %v3837_v41 = vmax.f32 %v3705_v52, 0.0 }
 0x59e   : > { %v3881_v56 = vpack.c.bf16 %v3839_v1, %v3838_v51 }
 0x59f   : > { %v3880_v43 = vpack.c.bf16 %v3837_v41, %v3836_v12  ;;  %v4867_v31 = vpop.f32.mrb[84].mxu1 }
 0x5a0   : > { %v3726_v7 = vadd.f32 %v4867_v31, %v7716_v39  ;;  %v3717_v4 = vpop.f32.mrb[85].mxu1 }
 0x5a1   : > { %v3718_v46 = vadd.f32 %v3717_v4, %v7716_v39  ;;  %v4868_v19 = vpop.f32.mrb[86].mxu1  ;;  %4941 = vmatprep.mubr.bf16.mxu1 %v3880_v43 }
 0x5a2   : > { %v3729_v59 = vadd.f32 %v4868_v19, %v7716_v39  ;;  %v3720_v63 = vpop.f32.mrb[87].mxu1  ;;  %4942 = vmatmul.mubr.bf16.gmra.mrb[144].mxu1 %v3881_v56  ;;  %v3842_v10 = vmax.f32 %v3726_v7, 0.0  ;;  %v3910_v19 = vsub.s32 5, %v6341_v32 }
 0x5a3   : > { %v3721_v20 = vadd.f32 %v3720_v63, %v7716_v39  ;;  %v3840_v38 = vmax.f32 %v3718_v46, 0.0 }
 0x5a4   : > { %v3843_v44 = vmax.f32 %v3729_v59, 0.0 }
 0x5a5   : > { %v3841_v14 = vmax.f32 %v3721_v20, 0.0 }
 0x5a6   : > { %v3883_v21 = vpack.c.bf16 %v3843_v44, %v3842_v10  ;;  %v5492_v44 = vld [vmem:[#allocation7] sm:$0xff] }
 0x5a7   : > { %v3882_v42 = vpack.c.bf16 %v3841_v14, %v3840_v38  ;;  %v7783_v38 = vrot.slane %v5492_v44, %v3910_v19 }
 0x5a9   : > { %4945 = vmatprep.mubr.bf16.mxu1 %v3882_v42 }
 0x5aa   : > { %4946 = vmatmul.mubr.bf16.gmra.mrb[148].mxu1 %v3883_v21 }
 0x5b9   : > { %v4871_v47 = vpop.f32.mrb[88].mxu1 }
 0x5ba   : > { %v3742_v61 = vadd.f32 %v4871_v47, %v7716_v39  ;;  %v3733_v45 = vpop.f32.mrb[89].mxu1 }
 0x5bb   : > { %v3734_v54 = vadd.f32 %v3733_v45, %v7716_v39  ;;  %v4872_v62 = vpop.f32.mrb[90].mxu1 }
 0x5bc   : > { %v3745_v37 = vadd.f32 %v4872_v62, %v7716_v39  ;;  %v3736_v13 = vpop.f32.mrb[91].mxu1  ;;  %v3846_v49 = vmax.f32 %v3742_v61, 0.0 }
 0x5bd   : > { %v3737_v40 = vadd.f32 %v3736_v13, %v7716_v39  ;;  %v3844_v17 = vmax.f32 %v3734_v54, 0.0 }
 0x5be   : > { %v3847_v9 = vmax.f32 %v3745_v37, 0.0 }
 0x5bf   : > { %v3845_v33 = vmax.f32 %v3737_v40, 0.0 }
 0x5c0   : > { %v3885_v53 = vpack.c.bf16 %v3847_v9, %v3846_v49 }
 0x5c1   : > { %v3884_v2 = vpack.c.bf16 %v3845_v33, %v3844_v17 }
 0x5c3   : > { %4949 = vmatprep.mubr.bf16.mxu1 %v3884_v2 }
 0x5c4   : > { %4950 = vmatmul.mubr.bf16.gmra.mrb[152].mxu1 %v3885_v53 }
 0x5da   : > { %v4875_v26 = vpop.f32.mrb[92].mxu1 }
 0x5db   : > { %v3758_v16 = vadd.f32 %v4875_v26, %v7716_v39  ;;  %v3749_v0 = vpop.f32.mrb[93].mxu1 }
 0x5dc   : > { %v3750_v11 = vadd.f32 %v3749_v0, %v7716_v39  ;;  %v4876_v23 = vpop.f32.mrb[94].mxu1 }
 0x5dd   : > { %v3761_v36 = vadd.f32 %v4876_v23, %v7716_v39  ;;  %v3752_v27 = vpop.f32.mrb[95].mxu1  ;;  %v3850_v35 = vmax.f32 %v3758_v16, 0.0 }
 0x5de   : > { %v3753_v60 = vadd.f32 %v3752_v27, %v7716_v39  ;;  %v3848_v29 = vmax.f32 %v3750_v11, 0.0 }
 0x5df   : > { %v3851_v18 = vmax.f32 %v3761_v36, 0.0 }
 0x5e0   : > { %v3849_v24 = vmax.f32 %v3753_v60, 0.0 }
 0x5e1   : > { %v3887_v34 = vpack.c.bf16 %v3851_v18, %v3850_v35 }
 0x5e2   : > { %v3886_v15 = vpack.c.bf16 %v3849_v24, %v3848_v29 }
 0x5e4   : > { %4953 = vmatprep.mubr.bf16.mxu1 %v3886_v15 }
 0x5e5   : > { %4954 = vmatmul.mubr.bf16.gmra.mrb[156].mxu1 %v3887_v34 }
 0x5f9   : > { %v4879_v30 = vpop.f32.mrb[96].mxu1 }
 0x5fa   : > { %v3774_v28 = vadd.f32 %v4879_v30, %v7716_v39  ;;  %v3765_v5 = vpop.f32.mrb[97].mxu1 }
 0x5fb   : > { %v3766_v25 = vadd.f32 %v3765_v5, %v7716_v39  ;;  %v4880_v6 = vpop.f32.mrb[98].mxu1 }
 0x5fc   : > { %v3777_v22 = vadd.f32 %v4880_v6, %v7716_v39  ;;  %v3768_v3 = vpop.f32.mrb[99].mxu1  ;;  %v3854_v8 = vmax.f32 %v3774_v28, 0.0 }
 0x5fd   : > { %v3769_v55 = vadd.f32 %v3768_v3, %v7716_v39  ;;  %v3852_v57 = vmax.f32 %v3766_v25, 0.0 }
 0x5fe   : > { %v3855_v48 = vmax.f32 %v3777_v22, 0.0 }
 0x5ff   : > { %v3853_v50 = vmax.f32 %v3769_v55, 0.0 }
 0x600   : > { %v3889_v58 = vpack.c.bf16 %v3855_v48, %v3854_v8 }
 0x601   : > { %v3888_v52 = vpack.c.bf16 %v3853_v50, %v3852_v57 }
 0x603   : > { %4957 = vmatprep.mubr.bf16.mxu1 %v3888_v52 }
 0x604   : > { %4958 = vmatmul.mubr.bf16.gmra.mrb[160].mxu1 %v3889_v58 }
 0x619   : > { %v4883_v51 = vpop.f32.mrb[100].mxu1 }
 0x61a   : > { %v3790_v1 = vadd.f32 %v4883_v51, %v7716_v39  ;;  %v3781_v12 = vpop.f32.mrb[101].mxu1 }
 0x61b   : > { %v3782_v41 = vadd.f32 %v3781_v12, %v7716_v39  ;;  %v4884_v56 = vpop.f32.mrb[102].mxu1 }
 0x61c   : > { %v3793_v43 = vadd.f32 %v4884_v56, %v7716_v39  ;;  %v3784_v31 = vpop.f32.mrb[103].mxu1  ;;  %v3858_v4 = vmax.f32 %v3790_v1, 0.0 }
 0x61d   : > { %v3785_v7 = vadd.f32 %v3784_v31, %v7716_v39  ;;  %v3856_v59 = vmax.f32 %v3782_v41, 0.0 }
 0x61e   : > { %v3859_v46 = vmax.f32 %v3793_v43, 0.0 }
 0x61f   : > { %v3857_v63 = vmax.f32 %v3785_v7, 0.0 }
 0x620   : > { %v3891_v20 = vpack.c.bf16 %v3859_v46, %v3858_v4 }
 0x621   : > { %v3890_v10 = vpack.c.bf16 %v3857_v63, %v3856_v59 }
 0x623   : > { %4961 = vmatprep.mubr.bf16.mxu1 %v3890_v10 }
 0x624   : > { %4962 = vmatmul.mubr.bf16.gmra.mrb[164].mxu1 %v3891_v20 }
 0x625   : > { %v4903_v14 = vpop.f32.mrb[104].mxu1 }
 0x626   : > { %v4003_v21 = vadd.f32 %v4903_v14, %v7783_v38  ;;  %v3994_v42 = vpop.f32.mrb[105].mxu1 }
 0x627   : > { %v3995_v39 = vadd.f32 %v3994_v42, %v7783_v38  ;;  %v4904_v47 = vpop.f32.mrb[106].mxu1 }
 0x628   : > { %v4251_v61 = vmax.f32 %v4003_v21, 0.0  ;;  %v4006_v32 = vadd.f32 %v4904_v47, %v7783_v38  ;;  %v3997_v45 = vpop.f32.mrb[107].mxu1 }
 0x629   : > { %v4249_v54 = vmax.f32 %v3995_v39, 0.0  ;;  %v3998_v62 = vadd.f32 %v3997_v45, %v7783_v38 }
 0x62a   : > { %4315 = vst [vmem:[%s7790_s20 + $0x10] sm:$0xff] %v4251_v61  ;;  %v4252_v37 = vmax.f32 %v4006_v32, 0.0 }
 0x62b   : > { %4313 = vst [vmem:[%s7790_s20] sm:$0xff] %v4249_v54  ;;  %v4250_v13 = vmax.f32 %v3998_v62, 0.0 }
 0x62c   : > { %4316 = vst [vmem:[%s7790_s20 + $0x18] sm:$0xff] %v4252_v37 }
 0x62d   : > { %4314 = vst [vmem:[%s7790_s20 + $0x8] sm:$0xff] %v4250_v13  ;;  %v4907_v40 = vpop.f32.mrb[108].mxu1 }
 0x62e   : > { %v4019_v49 = vadd.f32 %v4907_v40, %v7783_v38  ;;  %v4010_v9 = vpop.f32.mrb[109].mxu1 }
 0x62f   : > { %v4011_v17 = vadd.f32 %v4010_v9, %v7783_v38  ;;  %v4908_v33 = vpop.f32.mrb[110].mxu1 }
 0x630   : > { %v4255_v53 = vmax.f32 %v4019_v49, 0.0  ;;  %v4022_v2 = vadd.f32 %v4908_v33, %v7783_v38  ;;  %v4013_v26 = vpop.f32.mrb[111].mxu1 }
 0x631   : > { %v4253_v16 = vmax.f32 %v4011_v17, 0.0  ;;  %v4014_v0 = vadd.f32 %v4013_v26, %v7783_v38 }
 0x632   : > { %4319 = vst [vmem:[%s7790_s20 + $0x30] sm:$0xff] %v4255_v53  ;;  %v4256_v11 = vmax.f32 %v4022_v2, 0.0 }
 0x633   : > { %4317 = vst [vmem:[%s7790_s20 + $0x20] sm:$0xff] %v4253_v16  ;;  %v4254_v23 = vmax.f32 %v4014_v0, 0.0 }
 0x634   : > { %4320 = vst [vmem:[%s7790_s20 + $0x38] sm:$0xff] %v4256_v11 }
 0x635   : > { %4318 = vst [vmem:[%s7790_s20 + $0x28] sm:$0xff] %v4254_v23  ;;  %v4911_v36 = vpop.f32.mrb[112].mxu1 }
 0x636   : > { %v4035_v27 = vadd.f32 %v4911_v36, %v7783_v38  ;;  %v4026_v60 = vpop.f32.mrb[113].mxu1 }
 0x637   : > { %v4027_v35 = vadd.f32 %v4026_v60, %v7783_v38  ;;  %v4912_v18 = vpop.f32.mrb[114].mxu1 }
 0x638   : > { %v4259_v29 = vmax.f32 %v4035_v27, 0.0  ;;  %v4038_v24 = vadd.f32 %v4912_v18, %v7783_v38  ;;  %v4029_v34 = vpop.f32.mrb[115].mxu1 }
 0x639   : > { %v4257_v15 = vmax.f32 %v4027_v35, 0.0  ;;  %v4030_v30 = vadd.f32 %v4029_v34, %v7783_v38 }
 0x63a   : > { %4323 = vst [vmem:[%s7790_s20 + $0x50] sm:$0xff] %v4259_v29  ;;  %v4260_v28 = vmax.f32 %v4038_v24, 0.0 }
 0x63b   : > { %4321 = vst [vmem:[%s7790_s20 + $0x40] sm:$0xff] %v4257_v15  ;;  %v4258_v5 = vmax.f32 %v4030_v30, 0.0 }
 0x63c   : > { %4324 = vst [vmem:[%s7790_s20 + $0x58] sm:$0xff] %v4260_v28 }
 0x63d   : > { %4322 = vst [vmem:[%s7790_s20 + $0x48] sm:$0xff] %v4258_v5  ;;  %v4915_v25 = vpop.f32.mrb[116].mxu1 }
 0x63e   : > { %v4051_v6 = vadd.f32 %v4915_v25, %v7783_v38  ;;  %v4042_v22 = vpop.f32.mrb[117].mxu1 }
 0x63f   : > { %v4043_v3 = vadd.f32 %v4042_v22, %v7783_v38  ;;  %v4916_v55 = vpop.f32.mrb[118].mxu1 }
 0x640   : > { %v4263_v8 = vmax.f32 %v4051_v6, 0.0  ;;  %v4054_v48 = vadd.f32 %v4916_v55, %v7783_v38  ;;  %v4045_v57 = vpop.f32.mrb[119].mxu1 }
 0x641   : > { %v4261_v50 = vmax.f32 %v4043_v3, 0.0  ;;  %v4046_v58 = vadd.f32 %v4045_v57, %v7783_v38 }
 0x642   : > { %4327 = vst [vmem:[%s7790_s20 + $0x70] sm:$0xff] %v4263_v8  ;;  %v4264_v52 = vmax.f32 %v4054_v48, 0.0 }
 0x643   : > { %4325 = vst [vmem:[%s7790_s20 + $0x60] sm:$0xff] %v4261_v50  ;;  %v4262_v51 = vmax.f32 %v4046_v58, 0.0 }
 0x644   : > { %4328 = vst [vmem:[%s7790_s20 + $0x78] sm:$0xff] %v4264_v52 }
 0x645   : > { %4326 = vst [vmem:[%s7790_s20 + $0x68] sm:$0xff] %v4262_v51  ;;  %v4919_v1 = vpop.f32.mrb[120].mxu1 }
 0x646   : > { %v4067_v12 = vadd.f32 %v4919_v1, %v7783_v38  ;;  %v4058_v41 = vpop.f32.mrb[121].mxu1 }
 0x647   : > { %v4059_v56 = vadd.f32 %v4058_v41, %v7783_v38  ;;  %v4920_v43 = vpop.f32.mrb[122].mxu1 }
 0x648   : > { %v4267_v31 = vmax.f32 %v4067_v12, 0.0  ;;  %v4070_v7 = vadd.f32 %v4920_v43, %v7783_v38  ;;  %v4061_v4 = vpop.f32.mrb[123].mxu1 }
 0x649   : > { %v4265_v46 = vmax.f32 %v4059_v56, 0.0  ;;  %v4062_v19 = vadd.f32 %v4061_v4, %v7783_v38 }
 0x64a   : > { %4331 = vst [vmem:[%s7790_s20 + $0x90] sm:$0xff] %v4267_v31  ;;  %v4268_v59 = vmax.f32 %v4070_v7, 0.0 }
 0x64b   : > { %4329 = vst [vmem:[%s7790_s20 + $0x80] sm:$0xff] %v4265_v46  ;;  %v4266_v63 = vmax.f32 %v4062_v19, 0.0 }
 0x64c   : > { %4332 = vst [vmem:[%s7790_s20 + $0x98] sm:$0xff] %v4268_v59 }
 0x64d   : > { %4330 = vst [vmem:[%s7790_s20 + $0x88] sm:$0xff] %v4266_v63  ;;  %v4923_v20 = vpop.f32.mrb[124].mxu1 }
 0x64e   : > { %v4083_v10 = vadd.f32 %v4923_v20, %v7783_v38  ;;  %v4074_v44 = vpop.f32.mrb[125].mxu1 }
 0x64f   : > { %v4075_v14 = vadd.f32 %v4074_v44, %v7783_v38  ;;  %v4924_v21 = vpop.f32.mrb[126].mxu1 }
 0x650   : > { %v4271_v42 = vmax.f32 %v4083_v10, 0.0  ;;  %v4086_v39 = vadd.f32 %v4924_v21, %v7783_v38  ;;  %v4077_v47 = vpop.f32.mrb[127].mxu1 }
 0x651   : > { %v4269_v61 = vmax.f32 %v4075_v14, 0.0  ;;  %v4078_v32 = vadd.f32 %v4077_v47, %v7783_v38 }
 0x652   : > { %4335 = vst [vmem:[%s7790_s20 + $0xb0] sm:$0xff] %v4271_v42  ;;  %v4272_v45 = vmax.f32 %v4086_v39, 0.0 }
 0x653   : > { %4333 = vst [vmem:[%s7790_s20 + $0xa0] sm:$0xff] %v4269_v61  ;;  %v4270_v54 = vmax.f32 %v4078_v32, 0.0 }
 0x654   : > { %4336 = vst [vmem:[%s7790_s20 + $0xb8] sm:$0xff] %v4272_v45 }
 0x655   : > { %4334 = vst [vmem:[%s7790_s20 + $0xa8] sm:$0xff] %v4270_v54  ;;  %v4927_v62 = vpop.f32.mrb[128].mxu1 }
 0x656   : > { %v4099_v37 = vadd.f32 %v4927_v62, %v7783_v38  ;;  %v4090_v13 = vpop.f32.mrb[129].mxu1 }
 0x657   : > { %v4091_v40 = vadd.f32 %v4090_v13, %v7783_v38  ;;  %v4928_v49 = vpop.f32.mrb[130].mxu1 }
 0x658   : > { %v4275_v9 = vmax.f32 %v4099_v37, 0.0  ;;  %v4102_v17 = vadd.f32 %v4928_v49, %v7783_v38  ;;  %v4093_v33 = vpop.f32.mrb[131].mxu1 }
 0x659   : > { %v4273_v53 = vmax.f32 %v4091_v40, 0.0  ;;  %v4094_v2 = vadd.f32 %v4093_v33, %v7783_v38 }
 0x65a   : > { %4339 = vst [vmem:[%s7790_s20 + $0xd0] sm:$0xff] %v4275_v9  ;;  %v4276_v26 = vmax.f32 %v4102_v17, 0.0 }
 0x65b   : > { %4337 = vst [vmem:[%s7790_s20 + $0xc0] sm:$0xff] %v4273_v53  ;;  %v4274_v16 = vmax.f32 %v4094_v2, 0.0 }
 0x65c   : > { %4340 = vst [vmem:[%s7790_s20 + $0xd8] sm:$0xff] %v4276_v26 }
 0x65d   : > { %4338 = vst [vmem:[%s7790_s20 + $0xc8] sm:$0xff] %v4274_v16  ;;  %v4931_v0 = vpop.f32.mrb[132].mxu1 }
 0x65e   : > { %v4115_v11 = vadd.f32 %v4931_v0, %v7783_v38  ;;  %v4106_v23 = vpop.f32.mrb[133].mxu1 }
 0x65f   : > { %v4107_v36 = vadd.f32 %v4106_v23, %v7783_v38  ;;  %v4932_v27 = vpop.f32.mrb[134].mxu1 }
 0x660   : > { %v4279_v60 = vmax.f32 %v4115_v11, 0.0  ;;  %v4118_v35 = vadd.f32 %v4932_v27, %v7783_v38  ;;  %v4109_v18 = vpop.f32.mrb[135].mxu1 }
 0x661   : > { %v4277_v29 = vmax.f32 %v4107_v36, 0.0  ;;  %v4110_v24 = vadd.f32 %v4109_v18, %v7783_v38 }
 0x662   : > { %4343 = vst [vmem:[%s7790_s20 + $0xf0] sm:$0xff] %v4279_v60  ;;  %v4280_v34 = vmax.f32 %v4118_v35, 0.0 }
 0x663   : > { %4341 = vst [vmem:[%s7790_s20 + $0xe0] sm:$0xff] %v4277_v29  ;;  %v4278_v15 = vmax.f32 %v4110_v24, 0.0 }
 0x664   : > { %4344 = vst [vmem:[%s7790_s20 + $0xf8] sm:$0xff] %v4280_v34 }
 0x665   : > { %4342 = vst [vmem:[%s7790_s20 + $0xe8] sm:$0xff] %v4278_v15  ;;  %v4935_v30 = vpop.f32.mrb[136].mxu1 }
 0x666   : > { %v4131_v28 = vadd.f32 %v4935_v30, %v7783_v38  ;;  %v4122_v5 = vpop.f32.mrb[137].mxu1 }
 0x667   : > { %v4123_v25 = vadd.f32 %v4122_v5, %v7783_v38  ;;  %v4936_v6 = vpop.f32.mrb[138].mxu1 }
 0x668   : > { %v4283_v22 = vmax.f32 %v4131_v28, 0.0  ;;  %v4134_v3 = vadd.f32 %v4936_v6, %v7783_v38  ;;  %v4125_v55 = vpop.f32.mrb[139].mxu1 }
 0x669   : > { %v4281_v8 = vmax.f32 %v4123_v25, 0.0  ;;  %v4126_v48 = vadd.f32 %v4125_v55, %v7783_v38 }
 0x66a   : > { %4347 = vst [vmem:[%s7790_s20 + $0x110] sm:$0xff] %v4283_v22  ;;  %v4284_v57 = vmax.f32 %v4134_v3, 0.0 }
 0x66b   : > { %4345 = vst [vmem:[%s7790_s20 + $0x100] sm:$0xff] %v4281_v8  ;;  %v4282_v50 = vmax.f32 %v4126_v48, 0.0 }
 0x66c   : > { %4348 = vst [vmem:[%s7790_s20 + $0x118] sm:$0xff] %v4284_v57 }
 0x66d   : > { %4346 = vst [vmem:[%s7790_s20 + $0x108] sm:$0xff] %v4282_v50  ;;  %v4939_v58 = vpop.f32.mrb[140].mxu1 }
 0x66e   : > { %v4147_v52 = vadd.f32 %v4939_v58, %v7783_v38  ;;  %v4138_v51 = vpop.f32.mrb[141].mxu1 }
 0x66f   : > { %v4139_v1 = vadd.f32 %v4138_v51, %v7783_v38  ;;  %v4940_v12 = vpop.f32.mrb[142].mxu1 }
 0x670   : > { %v4287_v41 = vmax.f32 %v4147_v52, 0.0  ;;  %v4150_v56 = vadd.f32 %v4940_v12, %v7783_v38  ;;  %v4141_v43 = vpop.f32.mrb[143].mxu1 }
 0x671   : > { %v4285_v31 = vmax.f32 %v4139_v1, 0.0  ;;  %v4142_v7 = vadd.f32 %v4141_v43, %v7783_v38 }
 0x672   : > { %4351 = vst [vmem:[%s7790_s20 + $0x130] sm:$0xff] %v4287_v41  ;;  %v4288_v4 = vmax.f32 %v4150_v56, 0.0 }
 0x673   : > { %4349 = vst [vmem:[%s7790_s20 + $0x120] sm:$0xff] %v4285_v31  ;;  %v4286_v46 = vmax.f32 %v4142_v7, 0.0 }
 0x674   : > { %4352 = vst [vmem:[%s7790_s20 + $0x138] sm:$0xff] %v4288_v4 }
 0x675   : > { %4350 = vst [vmem:[%s7790_s20 + $0x128] sm:$0xff] %v4286_v46  ;;  %v4943_v19 = vpop.f32.mrb[144].mxu1 }
 0x676   : > { %v4163_v59 = vadd.f32 %v4943_v19, %v7783_v38  ;;  %v4154_v63 = vpop.f32.mrb[145].mxu1 }
 0x677   : > { %v4155_v20 = vadd.f32 %v4154_v63, %v7783_v38  ;;  %v4944_v10 = vpop.f32.mrb[146].mxu1 }
 0x678   : > { %v4291_v44 = vmax.f32 %v4163_v59, 0.0  ;;  %v4166_v14 = vadd.f32 %v4944_v10, %v7783_v38  ;;  %v4157_v21 = vpop.f32.mrb[147].mxu1 }
 0x679   : > { %v4289_v42 = vmax.f32 %v4155_v20, 0.0  ;;  %v4158_v39 = vadd.f32 %v4157_v21, %v7783_v38 }
 0x67a   : > { %4355 = vst [vmem:[%s7790_s20 + $0x150] sm:$0xff] %v4291_v44  ;;  %v4292_v47 = vmax.f32 %v4166_v14, 0.0 }
 0x67b   : > { %4353 = vst [vmem:[%s7790_s20 + $0x140] sm:$0xff] %v4289_v42  ;;  %v4290_v61 = vmax.f32 %v4158_v39, 0.0 }
 0x67c   : > { %4356 = vst [vmem:[%s7790_s20 + $0x158] sm:$0xff] %v4292_v47 }
 0x67d   : > { %4354 = vst [vmem:[%s7790_s20 + $0x148] sm:$0xff] %v4290_v61  ;;  %v4947_v32 = vpop.f32.mrb[148].mxu1 }
 0x67e   : > { %v4179_v45 = vadd.f32 %v4947_v32, %v7783_v38  ;;  %v4170_v54 = vpop.f32.mrb[149].mxu1 }
 0x67f   : > { %v4171_v62 = vadd.f32 %v4170_v54, %v7783_v38  ;;  %v4948_v37 = vpop.f32.mrb[150].mxu1 }
 0x680   : > { %v4295_v13 = vmax.f32 %v4179_v45, 0.0  ;;  %v4182_v40 = vadd.f32 %v4948_v37, %v7783_v38  ;;  %v4173_v49 = vpop.f32.mrb[151].mxu1 }
 0x681   : > { %v4293_v9 = vmax.f32 %v4171_v62, 0.0  ;;  %v4174_v17 = vadd.f32 %v4173_v49, %v7783_v38 }
 0x682   : > { %4359 = vst [vmem:[%s7790_s20 + $0x170] sm:$0xff] %v4295_v13  ;;  %v4296_v33 = vmax.f32 %v4182_v40, 0.0 }
 0x683   : > { %4357 = vst [vmem:[%s7790_s20 + $0x160] sm:$0xff] %v4293_v9  ;;  %v4294_v53 = vmax.f32 %v4174_v17, 0.0 }
 0x684   : > { %4360 = vst [vmem:[%s7790_s20 + $0x178] sm:$0xff] %v4296_v33 }
 0x685   : > { %4358 = vst [vmem:[%s7790_s20 + $0x168] sm:$0xff] %v4294_v53 }
 0x697   : > { %v4951_v2 = vpop.f32.mrb[152].mxu1 }
 0x698   : > { %v4195_v26 = vadd.f32 %v4951_v2, %v7783_v38  ;;  %v4186_v16 = vpop.f32.mrb[153].mxu1 }
 0x699   : > { %v4187_v0 = vadd.f32 %v4186_v16, %v7783_v38  ;;  %v4952_v11 = vpop.f32.mrb[154].mxu1 }
 0x69a   : > { %v4299_v23 = vmax.f32 %v4195_v26, 0.0  ;;  %v4198_v36 = vadd.f32 %v4952_v11, %v7783_v38  ;;  %v4189_v27 = vpop.f32.mrb[155].mxu1 }
 0x69b   : > { %v4297_v60 = vmax.f32 %v4187_v0, 0.0  ;;  %v4190_v35 = vadd.f32 %v4189_v27, %v7783_v38 }
 0x69c   : > { %4363 = vst [vmem:[%s7790_s20 + $0x190] sm:$0xff] %v4299_v23  ;;  %v4300_v18 = vmax.f32 %v4198_v36, 0.0 }
 0x69d   : > { %4361 = vst [vmem:[%s7790_s20 + $0x180] sm:$0xff] %v4297_v60  ;;  %v4298_v29 = vmax.f32 %v4190_v35, 0.0 }
 0x69e   : > { %4364 = vst [vmem:[%s7790_s20 + $0x198] sm:$0xff] %v4300_v18 }
 0x69f   : > { %4362 = vst [vmem:[%s7790_s20 + $0x188] sm:$0xff] %v4298_v29 }
 0x6b8   : > { %v4955_v24 = vpop.f32.mrb[156].mxu1 }
 0x6b9   : > { %v4211_v34 = vadd.f32 %v4955_v24, %v7783_v38  ;;  %v4202_v15 = vpop.f32.mrb[157].mxu1 }
 0x6ba   : > { %v4203_v30 = vadd.f32 %v4202_v15, %v7783_v38  ;;  %v4956_v28 = vpop.f32.mrb[158].mxu1 }
 0x6bb   : > { %v4303_v5 = vmax.f32 %v4211_v34, 0.0  ;;  %v4214_v25 = vadd.f32 %v4956_v28, %v7783_v38  ;;  %v4205_v6 = vpop.f32.mrb[159].mxu1 }
 0x6bc   : > { %v4301_v22 = vmax.f32 %v4203_v30, 0.0  ;;  %v4206_v3 = vadd.f32 %v4205_v6, %v7783_v38 }
 0x6bd   : > { %4367 = vst [vmem:[%s7790_s20 + $0x1b0] sm:$0xff] %v4303_v5  ;;  %v4304_v55 = vmax.f32 %v4214_v25, 0.0 }
 0x6be   : > { %4365 = vst [vmem:[%s7790_s20 + $0x1a0] sm:$0xff] %v4301_v22  ;;  %v4302_v8 = vmax.f32 %v4206_v3, 0.0 }
 0x6bf   : > { %4368 = vst [vmem:[%s7790_s20 + $0x1b8] sm:$0xff] %v4304_v55 }
 0x6c0   : > { %4366 = vst [vmem:[%s7790_s20 + $0x1a8] sm:$0xff] %v4302_v8 }
 0x6d7   : > { %v4959_v48 = vpop.f32.mrb[160].mxu1 }
 0x6d8   : > { %v4227_v57 = vadd.f32 %v4959_v48, %v7783_v38  ;;  %v4218_v50 = vpop.f32.mrb[161].mxu1 }
 0x6d9   : > { %v4219_v58 = vadd.f32 %v4218_v50, %v7783_v38  ;;  %v4960_v52 = vpop.f32.mrb[162].mxu1 }
 0x6da   : > { %v4307_v51 = vmax.f32 %v4227_v57, 0.0  ;;  %v4230_v1 = vadd.f32 %v4960_v52, %v7783_v38  ;;  %v4221_v12 = vpop.f32.mrb[163].mxu1 }
 0x6db   : > { %v4305_v41 = vmax.f32 %v4219_v58, 0.0  ;;  %v4222_v56 = vadd.f32 %v4221_v12, %v7783_v38 }
 0x6dc   : > { %4371 = vst [vmem:[%s7790_s20 + $0x1d0] sm:$0xff] %v4307_v51  ;;  %v4308_v43 = vmax.f32 %v4230_v1, 0.0 }
 0x6dd   : > { %4369 = vst [vmem:[%s7790_s20 + $0x1c0] sm:$0xff] %v4305_v41  ;;  %v4306_v31 = vmax.f32 %v4222_v56, 0.0 }
 0x6de   : > { %4372 = vst [vmem:[%s7790_s20 + $0x1d8] sm:$0xff] %v4308_v43 }
 0x6df   : > { %4370 = vst [vmem:[%s7790_s20 + $0x1c8] sm:$0xff] %v4306_v31 }
 0x6f7   : > { %v4963_v7 = vpop.f32.mrb[164].mxu1 }
 0x6f8   : > { %v4243_v4 = vadd.f32 %v4963_v7, %v7783_v38  ;;  %v4234_v46 = vpop.f32.mrb[165].mxu1 }
 0x6f9   : > { %v4235_v19 = vadd.f32 %v4234_v46, %v7783_v38  ;;  %v4964_v59 = vpop.f32.mrb[166].mxu1 }
 0x6fa   : > { %v4311_v63 = vmax.f32 %v4243_v4, 0.0  ;;  %v4246_v20 = vadd.f32 %v4964_v59, %v7783_v38  ;;  %v4237_v10 = vpop.f32.mrb[167].mxu1 }
 0x6fb   : > { %v4309_v44 = vmax.f32 %v4235_v19, 0.0  ;;  %v4238_v14 = vadd.f32 %v4237_v10, %v7783_v38 }
 0x6fc   : > { %4375 = vst [vmem:[%s7790_s20 + $0x1f0] sm:$0xff] %v4311_v63  ;;  %v4312_v21 = vmax.f32 %v4246_v20, 0.0 }
 0x6fd   : > { %4373 = vst [vmem:[%s7790_s20 + $0x1e0] sm:$0xff] %v4309_v44  ;;  %v4310_v42 = vmax.f32 %v4238_v14, 0.0 }
 0x6fe   : > { %4376 = vst [vmem:[%s7790_s20 + $0x1f8] sm:$0xff] %v4312_v21 }
 0x6ff   : > { %4374 = vst [vmem:[%s7790_s20 + $0x1e8] sm:$0xff] %v4310_v42 }
 0x700   : > { %5706 = shalt.err (!%p5703_p8)
}
 0x701   : > { %s5707_s15 = scalar_lea.hbm %s7918_s18, 8192  ;;  %s5711_s23 = scalar_lea.hbm %s7974_s7, 16384 }
 0x702   : > { %p5708_p2 = scmp.ne.s32.totalorder %s7918_s18, %s5707_s15  ;;  %p5712_p7 = scmp.lt.u32.totalorder %s7918_s18, %s7974_s7 }
 0x703   : > { %p5713_p4 = scmp.lt.u32.totalorder %s5711_s23, %s5707_s15  ;;  %p5715_p11 = scmp.lt.u32.totalorder %s5707_s15, %s7918_s18 }
 0x704   : > { %p5709_p9 = pnand %p5708_p2, %p8011_p3 }
 0x705   : > { %p5714_p1 = por %p5713_p4, %p5712_p7 }
 0x706   : > { %p5710_p5 = pneg %p5709_p9 }
 0x707   : > { %p5716_p6 = por %p5715_p11, %p5714_p1 }
 0x709   : > { %p5717_p0 = pnand %p5716_p6, %p5710_p5 }
 0x70b   : > { %5720 = shalt.err (!%p5717_p0)
}
 0x70c   : > { %s5790_s8 = smov 128   ;;  %s5791_s20 = smov 8  }
 0x70d   : > { %5005 = dma.vmem_to_hbm [thread:$0]  (%p8011_p3), %s7920_s17, 8192, %s7918_s18, %s4378_s30, %s5790_s8, %s5790_s8, %s5791_s20  }
 0x70e PF: > { %s4406_s29 = sand.u32 1, %s5763_s24   ;;  %p8012_p10 = scmp.ne.s32.totalorder %s7992_s12, 0 }
 0x70f   : > { %p8013_p12 = scmp.ge.s32.totalorder %s5775_s27, 2  ;;  %s4407_s16 = scalar_lea.sflag [#allocation4], %s4406_s29 }
 0x711   : > { %p5031_p13 = pnand %p8013_p12, %p8012_p10 }
 0x713   : > { %5758 = dma.done.wait (!%p5031_p13), %s4407_s16, 8192  }
 0x714   : > { %5760 = vsyncadd (!%p5031_p13), %s4407_s16, 4294959104  ;;  %p25_p8 = scmp.ge.s32.totalorder %s5995_s19, 4   ;;  %s8014_s24 = smov %s5767_s25 }
 0x715   : > { %s8015_s25 = smov %s5771_s26  ;;  %s8016_s26 = smov %s6007_s28 }
 0x716   : > { %s8017_s27 = smov %s5995_s19  ;;  %27 = sbr.rel (!%p25_p8) target bundleno = 14 (0xe), region = 126 }
 0x71d   :  { %4412 = vsyncpa [#allocation3], 1 }
 0x71e   :  { %4414 = vsyncpa [#allocation3 + $0x1], 1 }
 0x71f   :  { %4415 = vsyncpa [#allocation6], 1 }
 0x720   :  { %4417 = vsyncpa [#allocation6 + $0x1], 1 }
 0x721   :  { %4418 = vsyncpa [#allocation9], 1 }
 0x722   :  { %4419 = vsyncpa [#allocation12], 1 }
 0x723   :  { %4420 = vsyncpa [#allocation4], 1 }
 0x724   :  { %4422 = vsyncpa [#allocation4 + $0x1], 1 }

</bundles_post_ra>
